<compile_context>
chip_gen: v7x
topology: tpu7x:2x2x1
jax: 0.10.0
libtpu: 0.0.40
codegen_flags: <defaults>
</compile_context>

<pallas_src>
import numpy as np
import jax
import jax.numpy as jnp
from jax import lax
from jax.experimental import pallas as pl
from jax.experimental.pallas import tpu as pltpu

KW = 5  # conv kernel width


# ----------------------------------------------------------------------------
# Fused Pallas kernel: the entire Lenet5 forward pass for one image.
# Activation layout: (C*H, W) -- channel-rows in sublanes, image width in lanes.
# ----------------------------------------------------------------------------
def _lenet5_kernel(x_ref, a1_ref, pc2_ref, a3_ref, pc4_ref, a5_ref,
                   w6_ref, w7_ref, o_ref):
    f32 = jnp.float32
    cdt = a1_ref.dtype                                    # bf16 MXU operand dtype

    def shifted_stack(x, wo):
        # x: (K, W) f32 -> (5*K + 1, wo) f32: the 5 column-shifted copies stacked
        # along sublanes (K blocks are multiples of 8 -> aligned f32 concat) plus
        # a trailing ones row that multiplies the bias column folded into the
        # merged conv operand.
        blocks = [x[:, dj:dj + wo] for dj in range(KW)]
        blocks.append(jnp.ones((1, wo), f32))
        return jnp.concatenate(blocks, axis=0)

    x0 = x_ref[...]                                                  # (32, 32) f32

    # C1 (+bias +ReLU): single MXU matmul over the merged-K operand.
    s1 = shifted_stack(x0, 28).astype(cdt)                           # (161, 28)
    y1 = jnp.maximum(jnp.dot(a1_ref[...], s1,
                             preferred_element_type=f32), 0.0)       # (168, 28)

    # S2: column half of the 2x2 avg pool (row half folded into A3).
    x2 = jnp.dot(y1.astype(cdt), pc2_ref[...],
                 preferred_element_type=f32)                         # (168, 14)

    # C3 (+bias +ReLU), LeNet connection table baked into A3 at pack time.
    s3 = shifted_stack(x2, 10).astype(cdt)                           # (841, 10)
    y3 = jnp.maximum(jnp.dot(a3_ref[...], s3,
                             preferred_element_type=f32), 0.0)       # (160, 10)

    # S4: column half of the 2x2 avg pool (row half folded into A5).
    x4 = jnp.dot(y3.astype(cdt), pc4_ref[...],
                 preferred_element_type=f32)                         # (160, 5)

    # C5 (+bias +ReLU): 1x1 spatial output.
    s5 = shifted_stack(x4, 1).astype(cdt)                            # (801, 1)
    y5 = jnp.maximum(jnp.dot(a5_ref[...], s5,
                             preferred_element_type=f32), 0.0)       # (120, 1)

    # F6 (+bias +ReLU) on the MXU in column orientation.
    y5e = jnp.concatenate([y5, jnp.ones((1, 1), f32)], axis=0).astype(cdt)  # (121,1)
    h6 = jnp.maximum(jnp.dot(w6_ref[...], y5e,
                             preferred_element_type=f32), 0.0)       # (384, 1)

    # F7 (+bias) on the MXU in column orientation, then one tiny transpose.
    h6e = jnp.concatenate([h6, jnp.ones((1, 1), f32)], axis=0).astype(cdt)  # (385,1)
    logit_col = jnp.dot(w7_ref[...], h6e, preferred_element_type=f32)       # (54,1)
    logits = jnp.transpose(logit_col)                                # (1, 54)

    # softmax(dim=1) * 100   (exact divide: negligible cost at this size).
    m = jnp.max(logits, axis=-1, keepdims=True)
    e = jnp.exp(logits - m)
    s = jnp.sum(e, axis=-1, keepdims=True)
    o_ref[...] = (e / s * 100.0).astype(o_ref.dtype)


def lenet5_forward(x, pk):
    """x: (B, 1, 32, 32) batch of single-channel 32x32 images, each processed
    with the exact unbatched Lenet5.forward semantics -> (B, 54)."""
    B = x.shape[0]
    x2d = x.reshape(B, 32, 32)
    weights = (pk["A1"], pk["Pc2"], pk["A3"], pk["Pc4"], pk["A5"],
               pk["W6"], pk["W7"])

    # Per-image grid: the 4 KB image block streams (double-buffered) across the
    # grid while every weight BlockSpec uses a constant index_map, so the packed
    # weights are DMA'd once and stay resident in VMEM for all images.
    grid_spec = pltpu.PrefetchScalarGridSpec(
        num_scalar_prefetch=0,
        grid=(B,),
        in_specs=[pl.BlockSpec((None, 32, 32), lambda b: (b, 0, 0))]
                 + [pl.BlockSpec(w.shape, lambda b: (0, 0)) for w in weights],
        out_specs=pl.BlockSpec((None, 1, 54), lambda b: (b, 0, 0)),
    )

    flops_per_img = 2 * (168 * 161 * 28 + 168 * 28 * 14 + 160 * 841 * 10
                         + 160 * 10 * 5 + 120 * 801 + 384 * 121 + 54 * 385)
    weight_bytes = sum(int(np.prod(w.shape)) * w.dtype.itemsize for w in weights)

    out = pl.pallas_call(
        _lenet5_kernel,
        out_shape=jax.ShapeDtypeStruct((B, 1, 54), jnp.float32),
        grid_spec=grid_spec,
        compiler_params=pltpu.CompilerParams(
            dimension_semantics=("parallel",)),   # v7x: images split across 2 TCs
        cost_estimate=pl.CostEstimate(
            flops=flops_per_img * B,
            transcendentals=54 * B,
            bytes_accessed=weight_bytes + int(x.size) * 4 + B * 54 * 4),
    )(x2d, *weights)
    return out.reshape(B, 54)


# ----------------------------------------------------------------------------
# One-time weight preprocessing (outside the kernel / outside the hot path).
# ----------------------------------------------------------------------------
def _conv_shift_matrices(W, H):
    """W: (OC, C, 5, 5) raw conv weights, input height H.
    Returns A: (5, OC*Ho, C*H) with A[dj, oc*Ho+i, c*H+h] = W[oc, c, h-i, dj]
    (0 elsewhere), so that valid-conv = sum_dj A[dj] @ X[:, dj:dj+Wo] on an
    activation stored as X[c*H+h, w] = x[c, h, w]."""
    OC, C, KH, KWd = W.shape
    Ho = H - KH + 1
    E = np.zeros((KH, Ho, H), np.float32)
    for di in range(KH):
        for i in range(Ho):
            E[di, i, i + di] = 1.0
    A = np.einsum("ocdj,dih->joich", np.asarray(W, np.float32), E)
    return A.reshape(KWd, OC * Ho, C * H)


def _row_pool_matrix(C, H):
    """(C*(H//2), C*H): per-channel average of adjacent rows (factor 0.5)."""
    Ho = H // 2
    P = np.zeros((C * Ho, C * H), np.float32)
    for c in range(C):
        for i in range(Ho):
            P[c * Ho + i, c * H + 2 * i] = 0.5
            P[c * Ho + i, c * H + 2 * i + 1] = 0.5
    return P


def _col_pool_matrix(W):
    """(W, W//2): average of adjacent columns (factor 0.5)."""
    Wo = W // 2
    P = np.zeros((W, Wo), np.float32)
    for j in range(Wo):
        P[2 * j, j] = 0.5
        P[2 * j + 1, j] = 0.5
    return P


def _merge_dj_and_bias(A, bias_rows):
    """A: (5, M, K) per-dj operands; bias_rows: (M,) per-output-row bias.
    Returns (M, 5*K + 1): dj blocks concatenated along K (matching the kernel's
    shifted activation stack) + bias as the final column (times the ones row)."""
    KWd, M, K = A.shape
    Am = np.transpose(A, (1, 0, 2)).reshape(M, KWd * K)
    return np.concatenate([Am, np.asarray(bias_rows, np.float32).reshape(M, 1)],
                          axis=1)


def pack_params(p, compute_dtype=jnp.bfloat16):
    """One-time rearrangement of raw module parameters into MXU-friendly,
    lane-dense (long axis last) 2-D bf16 operands for the fused kernel."""
    b1, b3, b5 = np.asarray(p["b1"]), np.asarray(p["b3"]), np.asarray(p["b5"])
    b6, b7 = np.asarray(p["b6"]), np.asarray(p["b7"])
    W6, W7 = np.asarray(p["W6"]), np.asarray(p["W7"])

    A1 = _conv_shift_matrices(p["W1"], 32)                  # (5, 168, 32)
    A3 = _conv_shift_matrices(p["W3"], 14)                  # (5, 160, 84)
    A5 = _conv_shift_matrices(p["W5"], 5)                   # (5, 120, 80)
    # Fold the row half of the 2x2 average pools (S2 / S4) into A3 / A5.
    A3 = A3 @ _row_pool_matrix(6, 28)                       # (5, 160, 168)
    A5 = A5 @ _row_pool_matrix(16, 10)                      # (5, 120, 160)

    return dict(
        A1=jnp.asarray(_merge_dj_and_bias(A1, np.repeat(b1, 28)), compute_dtype),  # (168,161)
        Pc2=jnp.asarray(_col_pool_matrix(28), compute_dtype),                      # (28, 14)
        A3=jnp.asarray(_merge_dj_and_bias(A3, np.repeat(b3, 10)), compute_dtype),  # (160,841)
        Pc4=jnp.asarray(_col_pool_matrix(10), compute_dtype),                      # (10, 5)
        A5=jnp.asarray(_merge_dj_and_bias(A5, b5), compute_dtype),                 # (120,801)
        W6=jnp.asarray(np.concatenate([W6, b6.reshape(-1, 1)], 1), compute_dtype), # (384,121)
        W7=jnp.asarray(np.concatenate([W7, b7.reshape(-1, 1)], 1), compute_dtype), # (54, 385)
    )


# ----------------------------------------------------------------------------
# Parameters (deterministic synthetic init; shapes from Lenet5.__init__,
# FE=1, TanH=False -> ReLU).  ConvC3's unused self.weights/self.bias and the
# training-only members (error / optimizador) are not part of forward.
# ----------------------------------------------------------------------------
C3_GROUPS = [  # exactly the slices/concats in ConvC3.forward
    (0, 1, 2), (1, 2, 3), (2, 3, 4), (3, 4, 5), (4, 5, 0), (5, 0, 1),
    (0, 1, 2, 3), (1, 2, 3, 4), (2, 3, 4, 5), (3, 4, 5, 0), (4, 5, 0, 1),
    (5, 0, 1, 2), (0, 1, 3, 4), (1, 2, 4, 5), (0, 2, 3, 5),
    (0, 1, 2, 3, 4, 5),
]


def init_params(key):
    s = 0.1
    keys = jax.random.split(key, 10)
    W1 = s * jax.random.normal(keys[0], (6, 1, 5, 5), jnp.float32)
    b1 = s * jax.random.normal(keys[1], (6,), jnp.float32)
    # ConvC3: 16 sub-convs over fixed input-channel subsets, realized as one
    # dense (16, 6, 5, 5) kernel with zeros on unconnected channels --
    # mathematically identical to the sliced/concatenated convs.
    ck = jax.random.split(keys[2], 16)
    W3 = np.zeros((16, 6, 5, 5), np.float32)
    for g, chans in enumerate(C3_GROUPS):
        wg = np.asarray(s * jax.random.normal(ck[g], (len(chans), 5, 5)))
        for k, ch in enumerate(chans):
            W3[g, ch] = wg[k]
    W3 = jnp.asarray(W3)
    b3 = s * jax.random.normal(keys[3], (16,), jnp.float32)
    W5 = s * jax.random.normal(keys[4], (120, 16, 5, 5), jnp.float32)
    b5 = s * jax.random.normal(keys[5], (120,), jnp.float32)
    W6 = s * jax.random.normal(keys[6], (384, 120), jnp.float32)   # 16*24*FE^2
    b6 = s * jax.random.normal(keys[7], (384,), jnp.float32)
    W7 = s * jax.random.normal(keys[8], (54, 384), jnp.float32)
    b7 = s * jax.random.normal(keys[9], (54,), jnp.float32)
    return dict(W1=W1, b1=b1, W3=W3, b3=b3, W5=W5, b5=b5,
                W6=W6, b6=b6, W7=W7, b7=b7)


def lenet5_reference(x, p):
    """Pure-JAX f32 reference of Lenet5.forward (FE=1, ReLU) for ONE CHW image.
    x: (1, 32, 32) -> (1, 54)."""
    def conv(h, W, b):
        out = lax.conv_general_dilated(h[None], W, (1, 1), "VALID",
                                       dimension_numbers=("NCHW", "OIHW",
                                                          "NCHW"))[0]
        return out + b[:, None, None]

    def avg_pool(h):
        C, H, Wd = h.shape
        return h.reshape(C, H // 2, 2, Wd // 2, 2).mean(axis=(2, 4))

    h = jax.nn.relu(conv(x, p["W1"], p["b1"]))
    h = avg_pool(h)
    h = jax.nn.relu(conv(h, p["W3"], p["b3"]))
    h = avg_pool(h)
    h = jax.nn.relu(conv(h, p["W5"], p["b5"]))
    v = h.reshape(1, 120)
    v = jax.nn.relu(v @ p["W6"].T + p["b6"][None, :])
    logits = v @ p["W7"].T + p["b7"][None, :]
    return jax.nn.softmax(logits, axis=1) * 100.0


if __name__ == "__main__":
    key = jax.random.PRNGKey(0)
    pkey, xkey = jax.random.split(key)
    raw = init_params(pkey)
    packed = pack_params(raw)          # one-time weight preprocessing

    B = 2                              # batch of independent 1x32x32 CHW images
    x = jax.random.normal(xkey, (B, 1, 32, 32), jnp.float32)

    fwd = jax.jit(lenet5_forward)
    out = jax.block_until_ready(fwd(x, packed))

    assert out.shape == (B, 54)
    assert bool(jnp.all(jnp.isfinite(out)))
    # softmax * 100: every row sums to ~100.
    assert bool(jnp.all(jnp.abs(jnp.sum(out, axis=1) - 100.0) < 0.05))
    # Matches the f32 pure-JAX module reference (loose tol: bf16 MXU operands).
    ref = jnp.stack([lenet5_reference(x[i], raw)[0] for i in range(B)], axis=0)
    assert bool(jnp.max(jnp.abs(out - ref)) < 0.5)

    print("KERNEL_OK")
</pallas_src>

<mosaic_0001>
module attributes {stable_mosaic.version = 11 : i64} {
  func.func @_lenet5_kernel(%arg0: i32, %arg1: memref<1x32x32xf32, #tpu.memory_space<vmem>>, %arg2: memref<168x161xbf16, #tpu.memory_space<vmem>>, %arg3: memref<28x14xbf16, #tpu.memory_space<vmem>>, %arg4: memref<160x841xbf16, #tpu.memory_space<vmem>>, %arg5: memref<10x5xbf16, #tpu.memory_space<vmem>>, %arg6: memref<120x801xbf16, #tpu.memory_space<vmem>>, %arg7: memref<384x121xbf16, #tpu.memory_space<vmem>>, %arg8: memref<54x385xbf16, #tpu.memory_space<vmem>>, %arg9: memref<1x1x54xf32, #tpu.memory_space<vmem>>) attributes {dimension_semantics = [#tpu.dimension_semantics<parallel>], iteration_bounds = array<i64: 2>, scalar_prefetch = 0 : i64, scratch_operands = 0 : i64, tpu.core_type = #tpu.core_type<tc>, window_params = [{transform_indices = @transform_0, window_bounds = array<i64: 1, 32, 32>}, {pipeline_mode = #tpu.pipeline_mode<synchronous>, transform_indices = @transform_1, window_bounds = array<i64: 168, 161>}, {pipeline_mode = #tpu.pipeline_mode<synchronous>, transform_indices = @transform_2, window_bounds = array<i64: 28, 14>}, {pipeline_mode = #tpu.pipeline_mode<synchronous>, transform_indices = @transform_3, window_bounds = array<i64: 160, 841>}, {pipeline_mode = #tpu.pipeline_mode<synchronous>, transform_indices = @transform_4, window_bounds = array<i64: 10, 5>}, {pipeline_mode = #tpu.pipeline_mode<synchronous>, transform_indices = @transform_5, window_bounds = array<i64: 120, 801>}, {pipeline_mode = #tpu.pipeline_mode<synchronous>, transform_indices = @transform_6, window_bounds = array<i64: 384, 121>}, {pipeline_mode = #tpu.pipeline_mode<synchronous>, transform_indices = @transform_7, window_bounds = array<i64: 54, 385>}, {transform_indices = @transform_8, window_bounds = array<i64: 1, 1, 54>}]} {
    %c0 = arith.constant 0 : index
    %c0_0 = arith.constant 0 : index
    %c0_1 = arith.constant 0 : index
    %0 = vector.load %arg1[%c0, %c0_0, %c0_1] : memref<1x32x32xf32, #tpu.memory_space<vmem>>, vector<1x32x32xf32>
    %1 = vector.shape_cast %0 : vector<1x32x32xf32> to vector<32x32xf32>
    %2 = vector.extract_strided_slice %1 {offsets = [0, 0], sizes = [32, 28], strides = [1, 1]} : vector<32x32xf32> to vector<32x28xf32>
    %3 = vector.extract_strided_slice %1 {offsets = [0, 1], sizes = [32, 28], strides = [1, 1]} : vector<32x32xf32> to vector<32x28xf32>
    %4 = vector.extract_strided_slice %1 {offsets = [0, 2], sizes = [32, 28], strides = [1, 1]} : vector<32x32xf32> to vector<32x28xf32>
    %5 = vector.extract_strided_slice %1 {offsets = [0, 3], sizes = [32, 28], strides = [1, 1]} : vector<32x32xf32> to vector<32x28xf32>
    %6 = vector.extract_strided_slice %1 {offsets = [0, 4], sizes = [32, 28], strides = [1, 1]} : vector<32x32xf32> to vector<32x28xf32>
    %cst = arith.constant 1.000000e+00 : f32
    %7 = vector.broadcast %cst : f32 to vector<1x28xf32>
    %8 = tpu.concatenate %2, %3, %4, %5, %6, %7 in 0 : vector<32x28xf32>, vector<32x28xf32>, vector<32x28xf32>, vector<32x28xf32>, vector<32x28xf32>, vector<1x28xf32> -> vector<161x28xf32>
    %9 = arith.truncf %8 : vector<161x28xf32> to vector<161x28xbf16>
    %c0_2 = arith.constant 0 : index
    %c0_3 = arith.constant 0 : index
    %10 = vector.load %arg2[%c0_2, %c0_3] : memref<168x161xbf16, #tpu.memory_space<vmem>>, vector<168x161xbf16>
    %cst_4 = arith.constant dense<0.000000e+00> : vector<168x28xf32>
    %11 = tpu.matmul %10, %9, %cst_4 {dimension_numbers = #tpu.dot_dimension_numbers<[1], [0], [0], [1], [0, 0, 1, 1], [], []>} : vector<168x161xbf16>, vector<161x28xbf16>, vector<168x28xf32> -> vector<168x28xf32>
    %cst_5 = arith.constant 0.000000e+00 : f32
    %12 = vector.broadcast %cst_5 : f32 to vector<168x28xf32>
    %13 = arith.maximumf %11, %12 : vector<168x28xf32>
    %14 = arith.truncf %13 : vector<168x28xf32> to vector<168x28xbf16>
    %c0_6 = arith.constant 0 : index
    %c0_7 = arith.constant 0 : index
    %15 = vector.load %arg3[%c0_6, %c0_7] : memref<28x14xbf16, #tpu.memory_space<vmem>>, vector<28x14xbf16>
    %cst_8 = arith.constant dense<0.000000e+00> : vector<168x14xf32>
    %16 = tpu.matmul %14, %15, %cst_8 {dimension_numbers = #tpu.dot_dimension_numbers<[1], [0], [0], [1], [0, 0, 1, 1], [], []>} : vector<168x28xbf16>, vector<28x14xbf16>, vector<168x14xf32> -> vector<168x14xf32>
    %17 = vector.extract_strided_slice %16 {offsets = [0, 0], sizes = [168, 10], strides = [1, 1]} : vector<168x14xf32> to vector<168x10xf32>
    %18 = vector.extract_strided_slice %16 {offsets = [0, 1], sizes = [168, 10], strides = [1, 1]} : vector<168x14xf32> to vector<168x10xf32>
    %19 = vector.extract_strided_slice %16 {offsets = [0, 2], sizes = [168, 10], strides = [1, 1]} : vector<168x14xf32> to vector<168x10xf32>
    %20 = vector.extract_strided_slice %16 {offsets = [0, 3], sizes = [168, 10], strides = [1, 1]} : vector<168x14xf32> to vector<168x10xf32>
    %21 = vector.extract_strided_slice %16 {offsets = [0, 4], sizes = [168, 10], strides = [1, 1]} : vector<168x14xf32> to vector<168x10xf32>
    %cst_9 = arith.constant 1.000000e+00 : f32
    %22 = vector.broadcast %cst_9 : f32 to vector<1x10xf32>
    %23 = tpu.concatenate %17, %18, %19, %20, %21, %22 in 0 : vector<168x10xf32>, vector<168x10xf32>, vector<168x10xf32>, vector<168x10xf32>, vector<168x10xf32>, vector<1x10xf32> -> vector<841x10xf32>
    %24 = arith.truncf %23 : vector<841x10xf32> to vector<841x10xbf16>
    %c0_10 = arith.constant 0 : index
    %c0_11 = arith.constant 0 : index
    %25 = vector.load %arg4[%c0_10, %c0_11] : memref<160x841xbf16, #tpu.memory_space<vmem>>, vector<160x841xbf16>
    %cst_12 = arith.constant dense<0.000000e+00> : vector<160x10xf32>
    %26 = tpu.matmul %25, %24, %cst_12 {dimension_numbers = #tpu.dot_dimension_numbers<[1], [0], [0], [1], [0, 0, 1, 1], [], []>} : vector<160x841xbf16>, vector<841x10xbf16>, vector<160x10xf32> -> vector<160x10xf32>
    %cst_13 = arith.constant 0.000000e+00 : f32
    %27 = vector.broadcast %cst_13 : f32 to vector<160x10xf32>
    %28 = arith.maximumf %26, %27 : vector<160x10xf32>
    %29 = arith.truncf %28 : vector<160x10xf32> to vector<160x10xbf16>
    %c0_14 = arith.constant 0 : index
    %c0_15 = arith.constant 0 : index
    %30 = vector.load %arg5[%c0_14, %c0_15] : memref<10x5xbf16, #tpu.memory_space<vmem>>, vector<10x5xbf16>
    %cst_16 = arith.constant dense<0.000000e+00> : vector<160x5xf32>
    %31 = tpu.matmul %29, %30, %cst_16 {dimension_numbers = #tpu.dot_dimension_numbers<[1], [0], [0], [1], [0, 0, 1, 1], [], []>} : vector<160x10xbf16>, vector<10x5xbf16>, vector<160x5xf32> -> vector<160x5xf32>
    %32 = vector.extract_strided_slice %31 {offsets = [0, 0], sizes = [160, 1], strides = [1, 1]} : vector<160x5xf32> to vector<160x1xf32>
    %33 = vector.extract_strided_slice %31 {offsets = [0, 1], sizes = [160, 1], strides = [1, 1]} : vector<160x5xf32> to vector<160x1xf32>
    %34 = vector.extract_strided_slice %31 {offsets = [0, 2], sizes = [160, 1], strides = [1, 1]} : vector<160x5xf32> to vector<160x1xf32>
    %35 = vector.extract_strided_slice %31 {offsets = [0, 3], sizes = [160, 1], strides = [1, 1]} : vector<160x5xf32> to vector<160x1xf32>
    %36 = vector.extract_strided_slice %31 {offsets = [0, 4], sizes = [160, 1], strides = [1, 1]} : vector<160x5xf32> to vector<160x1xf32>
    %cst_17 = arith.constant 1.000000e+00 : f32
    %37 = vector.broadcast %cst_17 : f32 to vector<1x1xf32>
    %38 = tpu.concatenate %32, %33, %34, %35, %36, %37 in 0 : vector<160x1xf32>, vector<160x1xf32>, vector<160x1xf32>, vector<160x1xf32>, vector<160x1xf32>, vector<1x1xf32> -> vector<801x1xf32>
    %39 = arith.truncf %38 : vector<801x1xf32> to vector<801x1xbf16>
    %c0_18 = arith.constant 0 : index
    %c0_19 = arith.constant 0 : index
    %40 = vector.load %arg6[%c0_18, %c0_19] : memref<120x801xbf16, #tpu.memory_space<vmem>>, vector<120x801xbf16>
    %cst_20 = arith.constant dense<0.000000e+00> : vector<120x1xf32>
    %41 = tpu.matmul %40, %39, %cst_20 {dimension_numbers = #tpu.dot_dimension_numbers<[1], [0], [0], [1], [0, 0, 1, 1], [], []>} : vector<120x801xbf16>, vector<801x1xbf16>, vector<120x1xf32> -> vector<120x1xf32>
    %cst_21 = arith.constant 0.000000e+00 : f32
    %42 = vector.broadcast %cst_21 : f32 to vector<120x1xf32>
    %43 = arith.maximumf %41, %42 : vector<120x1xf32>
    %cst_22 = arith.constant 1.000000e+00 : f32
    %44 = vector.broadcast %cst_22 : f32 to vector<1x1xf32>
    %45 = tpu.concatenate %43, %44 in 0 : vector<120x1xf32>, vector<1x1xf32> -> vector<121x1xf32>
    %46 = arith.truncf %45 : vector<121x1xf32> to vector<121x1xbf16>
    %c0_23 = arith.constant 0 : index
    %c0_24 = arith.constant 0 : index
    %47 = vector.load %arg7[%c0_23, %c0_24] : memref<384x121xbf16, #tpu.memory_space<vmem>>, vector<384x121xbf16>
    %cst_25 = arith.constant dense<0.000000e+00> : vector<384x1xf32>
    %48 = tpu.matmul %47, %46, %cst_25 {dimension_numbers = #tpu.dot_dimension_numbers<[1], [0], [0], [1], [0, 0, 1, 1], [], []>} : vector<384x121xbf16>, vector<121x1xbf16>, vector<384x1xf32> -> vector<384x1xf32>
    %cst_26 = arith.constant 0.000000e+00 : f32
    %49 = vector.broadcast %cst_26 : f32 to vector<384x1xf32>
    %50 = arith.maximumf %48, %49 : vector<384x1xf32>
    %cst_27 = arith.constant 1.000000e+00 : f32
    %51 = vector.broadcast %cst_27 : f32 to vector<1x1xf32>
    %52 = tpu.concatenate %50, %51 in 0 : vector<384x1xf32>, vector<1x1xf32> -> vector<385x1xf32>
    %53 = arith.truncf %52 : vector<385x1xf32> to vector<385x1xbf16>
    %c0_28 = arith.constant 0 : index
    %c0_29 = arith.constant 0 : index
    %54 = vector.load %arg8[%c0_28, %c0_29] : memref<54x385xbf16, #tpu.memory_space<vmem>>, vector<54x385xbf16>
    %cst_30 = arith.constant dense<0.000000e+00> : vector<54x1xf32>
    %55 = tpu.matmul %54, %53, %cst_30 {dimension_numbers = #tpu.dot_dimension_numbers<[1], [0], [0], [1], [0, 0, 1, 1], [], []>} : vector<54x385xbf16>, vector<385x1xbf16>, vector<54x1xf32> -> vector<54x1xf32>
    %56 = tpu.transpose %55, [1, 0] : vector<54x1xf32> -> vector<1x54xf32>
    %cst_31 = arith.constant dense<0xFF800000> : vector<1xf32>
    %57 = vector.multi_reduction <maximumf>, %56, %cst_31 [1] : vector<1x54xf32> to vector<1xf32>
    %58 = vector.shape_cast %57 : vector<1xf32> to vector<1x1xf32>
    %59 = vector.broadcast %58 : vector<1x1xf32> to vector<1x54xf32>
    %60 = arith.subf %56, %59 : vector<1x54xf32>
    %61 = math.exp %60 : vector<1x54xf32>
    %cst_32 = arith.constant dense<0.000000e+00> : vector<1xf32>
    %62 = vector.multi_reduction <add>, %61, %cst_32 [1] : vector<1x54xf32> to vector<1xf32>
    %63 = vector.shape_cast %62 : vector<1xf32> to vector<1x1xf32>
    %64 = vector.broadcast %63 : vector<1x1xf32> to vector<1x54xf32>
    %65 = arith.divf %61, %64 : vector<1x54xf32>
    %cst_33 = arith.constant 1.000000e+02 : f32
    %66 = vector.broadcast %cst_33 : f32 to vector<1x54xf32>
    %67 = arith.mulf %65, %66 : vector<1x54xf32>
    %c0_34 = arith.constant 0 : index
    %c0_35 = arith.constant 0 : index
    %c0_36 = arith.constant 0 : index
    %68 = vector.load %arg9[%c0_34, %c0_35, %c0_36] : memref<1x1x54xf32, #tpu.memory_space<vmem>>, vector<1x1x54xf32>
    %69 = vector.shape_cast %68 : vector<1x1x54xf32> to vector<1x54xf32>
    %70 = vector.shape_cast %67 : vector<1x54xf32> to vector<1x1x54xf32>
    tpu.vector_store %arg9[%c0_34, %c0_35, %c0_36], %70 {strides = array<i32>} : memref<1x1x54xf32, #tpu.memory_space<vmem>>, vector<1x1x54xf32>,
    return
  }
  func.func @transform_0(%arg0: i32) -> (i32, i32, i32) {
    %c0_i32 = arith.constant 0 : i32
    %c0_i32_0 = arith.constant 0 : i32
    %c0_i32_1 = arith.constant 0 : i32
    return %arg0, %c0_i32, %c0_i32_0 : i32, i32, i32
  }
  func.func @transform_1(%arg0: i32) -> (i32, i32) {
    %c0_i32 = arith.constant 0 : i32
    %c0_i32_0 = arith.constant 0 : i32
    %c0_i32_1 = arith.constant 0 : i32
    return %c0_i32, %c0_i32_0 : i32, i32
  }
  func.func @transform_2(%arg0: i32) -> (i32, i32) {
    %c0_i32 = arith.constant 0 : i32
    %c0_i32_0 = arith.constant 0 : i32
    %c0_i32_1 = arith.constant 0 : i32
    return %c0_i32, %c0_i32_0 : i32, i32
  }
  func.func @transform_3(%arg0: i32) -> (i32, i32) {
    %c0_i32 = arith.constant 0 : i32
    %c0_i32_0 = arith.constant 0 : i32
    %c0_i32_1 = arith.constant 0 : i32
    return %c0_i32, %c0_i32_0 : i32, i32
  }
  func.func @transform_4(%arg0: i32) -> (i32, i32) {
    %c0_i32 = arith.constant 0 : i32
    %c0_i32_0 = arith.constant 0 : i32
    %c0_i32_1 = arith.constant 0 : i32
    return %c0_i32, %c0_i32_0 : i32, i32
  }
  func.func @transform_5(%arg0: i32) -> (i32, i32) {
    %c0_i32 = arith.constant 0 : i32
    %c0_i32_0 = arith.constant 0 : i32
    %c0_i32_1 = arith.constant 0 : i32
    return %c0_i32, %c0_i32_0 : i32, i32
  }
  func.func @transform_6(%arg0: i32) -> (i32, i32) {
    %c0_i32 = arith.constant 0 : i32
    %c0_i32_0 = arith.constant 0 : i32
    %c0_i32_1 = arith.constant 0 : i32
    return %c0_i32, %c0_i32_0 : i32, i32
  }
  func.func @transform_7(%arg0: i32) -> (i32, i32) {
    %c0_i32 = arith.constant 0 : i32
    %c0_i32_0 = arith.constant 0 : i32
    %c0_i32_1 = arith.constant 0 : i32
    return %c0_i32, %c0_i32_0 : i32, i32
  }
  func.func @transform_8(%arg0: i32) -> (i32, i32, i32) {
    %c0_i32 = arith.constant 0 : i32
    %c0_i32_0 = arith.constant 0 : i32
    %c0_i32_1 = arith.constant 0 : i32
    return %arg0, %c0_i32, %c0_i32_0 : i32, i32, i32
  }
}

</mosaic_0001>

<bundles_post_ra>
// kernel: lenet5_forward.1
= control target key start
LH: loop header
LB: loop body
LE: loop exit
PB: predicated region body
PF: predicated region fallthrough
CT: control target
= control target key end

     0   :  { %13 = vsyncpa [#allocation3], 0  ;;  %s7579_s0 = inlined_call_operand.hbm [shape: f32[2,32,32], index: 0, kind: input, shape index: {}]   ;;  %s7580_s1 = inlined_call_operand.hbm [shape: bf16[168,161], index: 1, kind: input, shape index: {}]   ;;  %s7581_s2 = inlined_call_operand.vmem [shape: bf16[28,14], index: 2, kind: input, shape index: {}]   ;;  %s7582_s3 = inlined_call_operand.vmem [shape: bf16[160,841], index: 3, kind: input, shape index: {}]   ;;  %s7583_s4 = inlined_call_operand.vmem [shape: bf16[10,5], index: 4, kind: input, shape index: {}]   ;;  %s7584_s5 = inlined_call_operand.vmem [shape: bf16[120,801], index: 5, kind: input, shape index: {}]   ;;  %s7585_s6 = inlined_call_operand.vmem [shape: bf16[384,121], index: 6, kind: input, shape index: {}]   ;;  %s7586_s7 = inlined_call_operand.vmem [shape: bf16[54,385], index: 7, kind: input, shape index: {}]   ;;  %s7587_s8 = inlined_call_operand.hbm [shape: f32[2,1,54], index: 8, kind: output, shape index: {}]  }
   0x1   :  { %15 = vsyncpa [#allocation3 + $0x1], 0 }
   0x2   :  { %16 = vsyncpa [#allocation6], 0 }
   0x3   :  { %17 = vsyncpa [#allocation4], 0 }
   0x4   :  { %19 = vsyncpa [#allocation4 + $0x1], 0  ;;  %s6276_s27 = smov 0   ;;  %s6278_s28 = smov 0  }
   0x5   :  { %s6280_s29 = smov 0   ;;  %s6282_s30 = smov 0  }
   0x6 LB: > { %s6297_s9 = sadd.s32 4294967295, %s6215_s30   ;;  %s4289_s10 = sadd.s32 4294967294, %s6215_s30   ;;  %s6215_s30 = sphi %s6282_s30, %s7612_s30   ;;  %s6211_s29 = sphi %s6280_s29, %s7615_s29   ;;  %s6207_s28 = sphi %s6278_s28, %s7614_s28   ;;  %s6203_s27 = sphi %s6276_s27, %s7613_s27  }
   0x7   : > { %p45_p0 = scmp.ne.s32.totalorder %s6207_s28, %s6203_s27  ;;  %p7588_p1 = scmp.eq.s32.totalorder %s6297_s9, 0 }
   0x8   : > { %p222_p3 = scmp.eq.s32.totalorder %s4289_s10, 1  ;;  %p4290_p5 = scmp.ge.s32.totalorder %s6215_s30, 1 }
   0x9   : > { %p6306_p4 = por %p7588_p1, %p45_p0  ;;  %p229_p7 = scmp.lt.s32.totalorder %s6215_s30, 3 }
   0xa   : > { %p6311_p6 = por %p222_p3, %p45_p0  ;;  %s6217_s14 = smov [#allocation5]  }
   0xb   : > { %s7596_s11 = scalar_select %p6306_p4, 1, 0 }
   0xc   : > { %s7597_s12 = scalar_select %p6311_p6, 1, 0 }
   0xd   : > { %p6316_p8 = pnand %p4290_p5, %p229_p7  ;;  %s241_s15 = sshll.u32 %s6217_s14, 4  ;;  %s6320_s15 = int_to_ptr.vmem [resolvable:$true] %s241_s15 }
   0xe   : > { %s6332_s17 = sadd.s32 1, %s6215_s30   ;;  %s32_s18 = sadd.s32 1, %s6211_s29 }
   0xf   : > { %s7598_s13 = scalar_select %p6316_p8, 1, 0 }
  0x10   : > { %p5325_p9 = pneg %p6316_p8  ;;  %7600 = sst [smem:[#allocation11_spill]] %s6332_s17 }
  0x11   : > { %s29_s19 = ssub.s32 %s6215_s30, %s6332_s17  ;;  %s6087_s22 = scalar_lea.hbm %s7580_s1, 2688 }
  0x12   : > { %p6327_p11 = pnand %p5325_p9, %p7588_p1  ;;  %p6088_p12 = scmp.ne.s32.totalorder %s7580_s1, %s6087_s22 }
  0x13   : > { %p6094_p5 = scmp.lt.u32.totalorder %s6087_s22, %s7580_s1 }
  0x14   : > { %p6089_p13 = pneg %p6327_p11 }
  0x16   : > { %p6090_p0 = pnand %p6089_p13, %p6088_p12 }
  0x18   : > { %p6091_p3 = pneg %p6090_p0 }
  0x1a   : > { %p6096_p7 = pnand %p6094_p5, %p6091_p3 }
  0x1c   : > { %6099 = shalt.err (!%p6096_p7)
}
  0x1d   : > { %s6100_s10 = scalar_lea.vmem %s6320_s15, 2688  ;;  %p6108_p2 = scmp.lt.s32.totalorder %s6320_s15, %s6320_s15 }
  0x1e   : > { %p6101_p9 = scmp.ne.s32.totalorder %s6320_s15, %s6100_s10  ;;  %p6109_p6 = scmp.lt.s32.totalorder %s6100_s10, %s6100_s10 }
  0x20   : > { %p6103_p10 = pnand %p6101_p9, %p6089_p13  ;;  %p6110_p4 = por %p6109_p6, %p6108_p2 }
  0x22   : > { %p6104_p1 = pneg %p6103_p10 }
  0x24   : > { %p6111_p8 = pnand %p6110_p4, %p6104_p1 }
  0x26   : > { %6114 = shalt.err (!%p6111_p8)
}
  0x27   : > { %s7593_s14 = smov 128   ;;  %s6219_s20 = smov 8  }
  0x28   : > { %5328 = dma.hbm_to_vmem [thread:$0]  (!%p6327_p11), %s7580_s1, 2688, %s6320_s15, [#allocation6], %s7593_s14, %s7593_s14, %s6219_s20  }
  0x29   : > { %p30_p1 = scmp.eq.s32.totalorder %s29_s19, 0  ;;  %p39_p2 = scmp.ne.s32.totalorder %s6211_s29, %s6207_s28 }
  0x2a   : > { %p40_p4 = scmp.eq.s32.totalorder %s6215_s30, 0  ;;  %p5338_p6 = scmp.lt.s32.totalorder %s6215_s30, 2 }
  0x2b   : > { %s6366_s23 = scalar_select %p30_p1, %s6211_s29, %s32_s18  }
  0x2c   : > { %p41_p8 = por %p40_p4, %p39_p2  ;;  %p7601_p10 = scmp.eq.s32.totalorder %s6297_s9, 1 }
  0x2d   : > { %s273_s16 = sand.u32 1, %s6211_s29   ;;  %s4571_s25 = sshll.u32 %s6215_s30, 9 }
  0x2e   : > { %p6370_p12 = por %p7601_p10, %p39_p2  ;;  %s4293_s26 = sshll.u32 %s273_s16, 5 }
  0x2f   : > { %s6379_s21 = scalar_lea.hbm %s7579_s0, %s4571_s25  ;;  %s277_s15 = scalar_lea.vmem [#allocation2], %s4293_s26 }
  0x30   : > { %s284_s18 = sshll.u32 %s277_s15, 4  ;;  %p6381_p11 = pnand %p5338_p6, %p41_p8  ;;  %s6385_s18 = int_to_ptr.vmem [resolvable:$true] %s284_s18 }
  0x31   : > { %s6387_s22 = scalar_lea.sflag [#allocation3], %s273_s16  ;;  %s6115_s14 = scalar_lea.hbm %s6379_s21, 512 }
  0x32   : > { %p6116_p13 = scmp.ne.s32.totalorder %s6379_s21, %s6115_s14  ;;  %p6117_p0 = pneg %p6381_p11 }
  0x33   : > { %s6120_s26 = scalar_lea.hbm %s7579_s0, 1024  ;;  %p6121_p7 = scmp.lt.u32.totalorder %s6379_s21, %s7579_s0 }
  0x34   : > { %p6118_p3 = pnand %p6117_p0, %p6116_p13  ;;  %p6122_p9 = scmp.lt.u32.totalorder %s6120_s26, %s6115_s14 }
  0x35   : > { %p6124_p2 = scmp.lt.u32.totalorder %s6115_s14, %s6379_s21 }
  0x36   : > { %p6119_p5 = pneg %p6118_p3  ;;  %p6123_p1 = por %p6122_p9, %p6121_p7 }
  0x38   : > { %p6125_p4 = por %p6124_p2, %p6123_p1 }
  0x3a   : > { %p6126_p6 = pnand %p6125_p4, %p6119_p5 }
  0x3c   : > { %6129 = shalt.err (!%p6126_p6)
}
  0x3d   : > { %s6130_s16 = scalar_lea.vmem %s6385_s18, 512  ;;  %s6220_s17 = smov [#allocation2]  }
  0x3e   : > { %p6131_p8 = scmp.ne.s32.totalorder %s6385_s18, %s6130_s16  ;;  %s6135_s25 = sshll.u32 %s6220_s17, 4  ;;  %s6136_s25 = int_to_ptr.vmem [resolvable:$false] %s6135_s25 }
  0x3f   : > { %s6137_s10 = scalar_lea.vmem %s6136_s25, 1024  ;;  %p6138_p3 = scmp.lt.s32.totalorder %s6385_s18, %s6136_s25 }
  0x40   : > { %p6133_p10 = pnand %p6131_p8, %p6117_p0  ;;  %p6139_p7 = scmp.lt.s32.totalorder %s6137_s10, %s6130_s16 }
  0x42   : > { %p6134_p13 = pneg %p6133_p10  ;;  %p6140_p9 = por %p6139_p7, %p6138_p3 }
  0x44   : > { %p6141_p1 = pnand %p6140_p9, %p6134_p13 }
  0x46   : > { %6144 = shalt.err (!%p6141_p1)
}
  0x47   : > { %s7604_s14 = smov 128   ;;  %p7605_p0 = scmp.ne.s32.totalorder %s7598_s13, 0 }
  0x48   : > { %5332 = dma.hbm_to_vmem [thread:$0]  (!%p6381_p11), %s6379_s21, 512, %s6385_s18, %s6387_s22, %s7604_s14, %s7604_s14, %s6219_s20  }
  0x49   : > { %296 = sbr.rel (%p7605_p0) target bundleno = 2900 (0xb54), region = 52  ;;  %s6421_s26 = sand.u32 (!%p7605_p0), 1, %s6207_s28  }
  0x4a   : > { %s4297_s15 = sshll.u32 (!%p7605_p0), %s6421_s26, 5  ;;  %s299_s16 = scalar_lea.sflag (!%p7605_p0), [#allocation3], %s6421_s26 }
  0x4b   : > { %s302_s17 = scalar_lea.vmem (!%p7605_p0), [#allocation2], %s4297_s15  ;;  %p7606_p5 = scmp.ne.s32.totalorder (!%p7605_p0), %s7596_s11, 0 }
  0x50   : > { %6190 = dma.done.wait (%p7606_p5), %s299_s16, 512  }
  0x51   : > { %6192 = vsyncadd (%p7606_p5), %s299_s16, 4294966784  ;;  %p7607_p2 = scmp.eq.s32.totalorder %s6297_s9, 0 }
  0x53   : > { %6194 = dma.done.wait (%p7607_p2), [#allocation6], 2688   ;;  %p7608_p11 = pmov %p7607_p2 }
  0x54   : > { %v6221_v0 = vmov 0   ;;  %v339_v1 = vld [vmem:[%s302_s17] sm:$0xff]  ;;  %v340_v2 = vld [vmem:[%s302_s17 + $0x8] sm:$0xff]  ;;  %v341_v3 = vld [vmem:[%s302_s17 + $0x10] sm:$0xff]  ;;  %s6222_s13 = smov 127   ;;  %s6223_s11 = smov 126  }
  0x55   : > { %6196 = vsyncadd (%p7608_p11), [#allocation6], 4294964608  ;;  %563 = vmatprep.subr.bf16.mxu0 %v6221_v0  ;;  %v5385_v4 = vpack.i.bf16 %v340_v2, %v339_v1  ;;  %v342_v5 = vld [vmem:[%s302_s17 + $0x18] sm:$0xff]  ;;  %v395_v7 = vpack.c.bf16 %v340_v2, %v339_v1  ;;  %s6224_s20 = smov 125   ;;  %s7594_s21 = smov 124   ;;  %vm523_vm0 = vcmask 269312  }
  0x56   : > { %v5390_v6 = vpack.i.bf16 %v342_v5, %v341_v3  ;;  %v396_v8 = vpack.c.bf16 %v342_v5, %v341_v3  ;;  %v5827_v9 = vld [vmem:[#allocation5 + $0x4] ss:$8 sps:$4 sm:$0xff]   ;;  %v6226_v10 = vmov 0.0   ;;  %vm557_vm1 = vcmask 1040384   ;;  %v5825_v45 = vld [vmem:[#allocation5] ss:$8 sps:$4 sm:$0xff]  }
  0x57   : > { %5386 = vrot.lane.b32.xlu0 %v5385_v4, %s6222_s13  ;;  %5396 = vrot.lane.b32.xlu1 %v5385_v4, %s6223_s11  ;;  %v559_v43 = vsel %vm557_vm1, 65535, %v6221_v0  ;;  %v5828_v46 = vld [vmem:[#allocation5 + $0x14] ss:$8 sps:$4 sm:$0xff]   ;;  %v5830_v47 = vld [vmem:[#allocation5 + $0x10] ss:$8 sps:$4 sm:$0xff]   ;;  %v426_v63 = vld [vmem:[#allocation5 + $0xa0] sm:$0xff] }
  0x58   : > { %564 = vmatpush1.bf16.msra.mxu0 %v395_v7  ;;  %4321 = vmatprep.mubr.msk.bf16.mxu0 %vm523_vm0, %v5827_v9  ;;  %v6454_v44 = vand.u32 1.0|1.0, %v559_v43  ;;  %v5831_v48 = vld [vmem:[#allocation5 + $0x24] ss:$8 sps:$4 sm:$0xff]   ;;  %v5833_v49 = vld [vmem:[#allocation5 + $0x20] ss:$8 sps:$4 sm:$0xff]   ;;  %v4320_v2 = vcombine.high %v426_v63, %v426_v63  ;;  %v4319_v3 = vcombine.low %v426_v63, %v426_v63 }
  0x59   : > { %565 = vmatprep.subr.bf16.mxu0 %v6221_v0  ;;  %5114 = vmatprep.subr.bf16.mxu1 %v6226_v10  ;;  %v5834_v50 = vld [vmem:[#allocation5 + $0x34] ss:$8 sps:$4 sm:$0xff]   ;;  %v5836_v51 = vld [vmem:[#allocation5 + $0x30] ss:$8 sps:$4 sm:$0xff]   ;;  %v5837_v52 = vld [vmem:[#allocation5 + $0x44] ss:$8 sps:$4 sm:$0xff]  }
  0x5a   : > { %v5839_v53 = vld [vmem:[#allocation5 + $0x40] ss:$8 sps:$4 sm:$0xff]   ;;  %v5840_v54 = vld [vmem:[#allocation5 + $0x54] ss:$8 sps:$4 sm:$0xff]   ;;  %v5842_v55 = vld [vmem:[#allocation5 + $0x50] ss:$8 sps:$4 sm:$0xff]  }
  0x5b   : > { %5391 = vrot.lane.b32.xlu0 %v5390_v6, %s6222_s13  ;;  %5401 = vrot.lane.b32.xlu1 %v5390_v6, %s6223_s11  ;;  %v5843_v56 = vld [vmem:[#allocation5 + $0x64] ss:$8 sps:$4 sm:$0xff]   ;;  %v5845_v57 = vld [vmem:[#allocation5 + $0x60] ss:$8 sps:$4 sm:$0xff]   ;;  %v5846_v58 = vld [vmem:[#allocation5 + $0x74] ss:$8 sps:$4 sm:$0xff]  }
  0x5c   : > { %566 = vmatpush1.bf16.msra.mxu0 %v396_v8  ;;  %v5848_v59 = vld [vmem:[#allocation5 + $0x70] ss:$8 sps:$4 sm:$0xff]   ;;  %v5849_v60 = vld [vmem:[#allocation5 + $0x84] ss:$8 sps:$4 sm:$0xff]   ;;  %v5851_v61 = vld [vmem:[#allocation5 + $0x80] ss:$8 sps:$4 sm:$0xff]  }
  0x5d   : > { %567 = vmatprep.subr.bf16.mxu0 %v6221_v0  ;;  %v5852_v62 = vld [vmem:[#allocation5 + $0x94] ss:$8 sps:$4 sm:$0xff]   ;;  %v5854_v1 = vld [vmem:[#allocation5 + $0x90] ss:$8 sps:$4 sm:$0xff]   ;;  %v5858_v5 = vld [vmem:[%s7581_s2 + $0x8] sm:$0x3f]  }
  0x5e   : > { %vm764_vm2 = vcmask 1045504   ;;  %vm6227_vm3 = vmmov 0   ;;  %vm730_vm4 = vcmask 228352   ;;  %vm1675_vm5 = vcmask 1043456   ;;  %s4568_s15 = sshll.u32 %s6297_s9, 4  ;;  %s337_s16 = scalar_lea.vmem [#allocation7], %s6421_s26 }
  0x5f   : > { %5406 = vrot.lane.b32.xlu0 %v5385_v4, %s6224_s20  ;;  %5411 = vrot.lane.b32.xlu1 %v5390_v6, %s6224_s20  ;;  %vm1676_vm6 = vcmask 1044480   ;;  %vm1644_vm7 = vcmask 596992   ;;  %vm2171_vm8 = vcmask 80896   ;;  %vm3556_vm9 = vcmask 990208   ;;  %s4213_s17 = sshll.u32 %s337_s16, 4  ;;  %s4201_s18 = scalar_lea.sflag [#allocation4], %s6421_s26  ;;  %s7536_s17 = int_to_ptr.vmem [resolvable:$true] %s4213_s17 }
  0x60   : > { %5118 = vmatprep.mubr.msk.bf16.mxu1 %vm6227_vm3, %v6226_v10  ;;  %vm4013_vm10 = vcmask 7168   ;;  %vm4186_vm11 = vcmask 434176   ;;  %s6145_s19 = scalar_lea.vmem %s7536_s17, 16  ;;  %s6230_s9 = smov [#allocation7]  }
  0x61   : > { %p6146_p4 = scmp.ne.s32.totalorder %s7536_s17, %s6145_s19  ;;  %s6149_s22 = sshll.u32 %s6230_s9, 4  ;;  %s6150_s22 = int_to_ptr.vmem [resolvable:$false] %s6149_s22 }
  0x62   : > { %s6151_s25 = scalar_lea.vmem %s6150_s22, 32  ;;  %p6152_p10 = scmp.lt.s32.totalorder %s7536_s17, %s6150_s22 }
  0x63   : > { %5416 = vrot.lane.b32.xlu0 %v5385_v4, %s7594_s21  ;;  %5421 = vrot.lane.b32.xlu1 %v5390_v6, %s7594_s21  ;;  %v5857_v4 = vld [vmem:[%s7581_s2] sm:$0xff]   ;;  %v766_v6 = vsel %vm764_vm2, %v5858_v5, 0  ;;  %p6147_p6 = pnand %p6146_p4, %p6370_p12  ;;  %p6153_p13 = scmp.lt.s32.totalorder %s6151_s25, %s6145_s19 }
  0x64   : > { %5115 = vmatpush3.bf16.msra.mxu1 %v5857_v4 }
  0x65   : > { %5116 = vmatprep.subr.bf16.mxu1 %v6226_v10  ;;  %p6148_p8 = pneg %p6147_p6  ;;  %p6154_p3 = por %p6153_p13, %p6152_p10 }
  0x67   : > { %p6155_p7 = pnand %p6154_p3, %p6148_p8 }
  0x68   : > { %5117 = vmatpush3.bf16.msra.mxu1 %v766_v6 }
  0xc9   : > { %v5387_v11 = vpop.permute.xlu0 %5386  ;;  %v5397_v12 = vpop.permute.xlu1 %5396 }
  0xca   : > { %v5389_v13 = vunpack.i.h.bf16 %v5387_v11  ;;  %v5388_v14 = vunpack.i.l.bf16 %v5387_v11  ;;  %v5399_v19 = vunpack.i.h.bf16 %v5397_v12  ;;  %v5398_v20 = vunpack.i.l.bf16 %v5397_v12 }
  0xcc   : > { %v397_v15 = vpack.c.bf16 %v5389_v13, %v5388_v14  ;;  %v399_v23 = vpack.c.bf16 %v5399_v19, %v5398_v20 }
  0xcd   : > { %v5392_v16 = vpop.permute.xlu0 %5391  ;;  %v5402_v21 = vpop.permute.xlu1 %5401 }
  0xce   : > { %v5394_v17 = vunpack.i.h.bf16 %v5392_v16  ;;  %v5393_v18 = vunpack.i.l.bf16 %v5392_v16  ;;  %568 = vmatpush1.bf16.msra.mxu0 %v397_v15  ;;  %v5404_v24 = vunpack.i.h.bf16 %v5402_v21  ;;  %v5403_v25 = vunpack.i.l.bf16 %v5402_v21 }
  0xcf   : > { %569 = vmatprep.subr.bf16.mxu0 %v6221_v0 }
  0xd0   : > { %v398_v22 = vpack.c.bf16 %v5394_v17, %v5393_v18  ;;  %v400_v27 = vpack.c.bf16 %v5404_v24, %v5403_v25 }
  0xd1   : > { %v5407_v26 = vpop.permute.xlu0 %5406  ;;  %v5412_v30 = vpop.permute.xlu1 %5411 }
  0xd2   : > { %570 = vmatpush1.bf16.msra.mxu0 %v398_v22  ;;  %v5409_v28 = vunpack.i.h.bf16 %v5407_v26  ;;  %v5408_v29 = vunpack.i.l.bf16 %v5407_v26  ;;  %v5414_v32 = vunpack.i.h.bf16 %v5412_v30  ;;  %v5413_v33 = vunpack.i.l.bf16 %v5412_v30 }
  0xd3   : > { %571 = vmatprep.subr.bf16.mxu0 %v6221_v0 }
  0xd4   : > { %v401_v31 = vpack.c.bf16 %v5409_v28, %v5408_v29  ;;  %v402_v35 = vpack.c.bf16 %v5414_v32, %v5413_v33 }
  0xd5   : > { %v5417_v34 = vpop.permute.xlu0 %5416  ;;  %v5422_v38 = vpop.permute.xlu1 %5421 }
  0xd6   : > { %572 = vmatpush1.bf16.msra.mxu0 %v399_v23  ;;  %v5419_v36 = vunpack.i.h.bf16 %v5417_v34  ;;  %v5418_v37 = vunpack.i.l.bf16 %v5417_v34  ;;  %v5424_v40 = vunpack.i.h.bf16 %v5422_v38  ;;  %v5423_v41 = vunpack.i.l.bf16 %v5422_v38 }
  0xd7   : > { %573 = vmatprep.subr.bf16.mxu0 %v6221_v0 }
  0xd8   : > { %v403_v39 = vpack.c.bf16 %v5419_v36, %v5418_v37  ;;  %v404_v42 = vpack.c.bf16 %v5424_v40, %v5423_v41 }
  0xda   : > { %574 = vmatpush1.bf16.msra.mxu0 %v400_v27 }
  0xdb   : > { %575 = vmatprep.subr.bf16.mxu0 %v6221_v0 }
  0xde   : > { %576 = vmatpush1.bf16.msra.mxu0 %v401_v31 }
  0xdf   : > { %577 = vmatprep.subr.bf16.mxu0 %v6221_v0 }
  0xe2   : > { %578 = vmatpush1.bf16.msra.mxu0 %v402_v35 }
  0xe3   : > { %579 = vmatprep.subr.bf16.mxu0 %v6221_v0 }
  0xe6   : > { %580 = vmatpush1.bf16.msra.mxu0 %v403_v39 }
  0xe7   : > { %581 = vmatprep.subr.bf16.mxu0 %v6221_v0 }
  0xea   : > { %582 = vmatpush1.bf16.msra.mxu0 %v404_v42 }
  0xeb   : > { %583 = vmatprep.subr.bf16.mxu0 %v6221_v0 }
  0xee   : > { %584 = vmatpush1.bf16.msra.mxu0 %v6454_v44 }
  0xf1   : > { %596 = vmatmul.mubr.bf16.vlgmr.msra.gmra.mrb[0].mxu0 %v5825_v45 }
  0xf2   : > { %4322 = vmatprep.mubr.msk.bf16.mxu0 %vm523_vm0, %v5828_v46 }
  0xf9   : > { %604 = vmatmul.mubr.bf16.gmra.mrb[4].mxu0 %v5830_v47 }
  0xfa   : > { %4323 = vmatprep.mubr.msk.bf16.mxu0 %vm523_vm0, %v5831_v48 }
 0x101   : > { %612 = vmatmul.mubr.bf16.gmra.mrb[8].mxu0 %v5833_v49 }
 0x102   : > { %4324 = vmatprep.mubr.msk.bf16.mxu0 %vm523_vm0, %v5834_v50 }
 0x109   : > { %620 = vmatmul.mubr.bf16.gmra.mrb[12].mxu0 %v5836_v51 }
 0x10a   : > { %4325 = vmatprep.mubr.msk.bf16.mxu0 %vm523_vm0, %v5837_v52 }
 0x111   : > { %628 = vmatmul.mubr.bf16.gmra.mrb[16].mxu0 %v5839_v53 }
 0x112   : > { %4326 = vmatprep.mubr.msk.bf16.mxu0 %vm523_vm0, %v5840_v54 }
 0x119   : > { %636 = vmatmul.mubr.bf16.gmra.mrb[20].mxu0 %v5842_v55 }
 0x11a   : > { %4327 = vmatprep.mubr.msk.bf16.mxu0 %vm523_vm0, %v5843_v56 }
 0x121   : > { %644 = vmatmul.mubr.bf16.gmra.mrb[24].mxu0 %v5845_v57 }
 0x122   : > { %4328 = vmatprep.mubr.msk.bf16.mxu0 %vm523_vm0, %v5846_v58 }
 0x129   : > { %652 = vmatmul.mubr.bf16.gmra.mrb[28].mxu0 %v5848_v59 }
 0x12a   : > { %4329 = vmatprep.mubr.msk.bf16.mxu0 %vm523_vm0, %v5849_v60 }
 0x131   : > { %660 = vmatmul.mubr.bf16.gmra.mrb[32].mxu0 %v5851_v61 }
 0x132   : > { %4330 = vmatprep.mubr.msk.bf16.mxu0 %vm523_vm0, %v5852_v62 }
 0x139   : > { %668 = vmatmul.mubr.bf16.gmra.mrb[36].mxu0 %v5854_v1 }
 0x13a   : > { %4331 = vmatprep.mubr.msk.bf16.mxu0 %vm523_vm0, %v4320_v2 }
 0x141   : > { %676 = vmatmul.mubr.bf16.gmra.mrb[40].mxu0 %v4319_v3 }
 0x1c4   : > { %v597_v7 = vpop.f32.mrb[0].mxu0 }
 0x1c5   : > { %v599_v8 = vpop.f32.mrb[1].mxu0  ;;  %v683_v11 = vmax.f32 %v597_v7, 0.0 }
 0x1c6   : > { %v600_v9 = vpop.f32.mrb[2].mxu0 }
 0x1c7   : > { %v684_v12 = vmax.f32 %v600_v9, 0.0  ;;  %v602_v13 = vpop.f32.mrb[3].mxu0 }
 0x1c9   : > { %v704_v14 = vpack.c.bf16 %v684_v12, %v683_v11 }
 0x1cb   : > { %5119 = vmatmul.mubr.msk.bf16.vlgmr.msra.gmra.mrb[0].mxu1 %vm730_vm4, %v704_v14 }
 0x1cc   : > { %v605_v15 = vpop.f32.mrb[4].mxu0  ;;  %5122 = vmatprep.mubr.msk.bf16.mxu1 %vm6227_vm3, %v6226_v10 }
 0x1cd   : > { %v607_v16 = vpop.f32.mrb[5].mxu0  ;;  %v685_v18 = vmax.f32 %v605_v15, 0.0 }
 0x1ce   : > { %v608_v17 = vpop.f32.mrb[6].mxu0 }
 0x1cf   : > { %v686_v19 = vmax.f32 %v608_v17, 0.0  ;;  %v610_v20 = vpop.f32.mrb[7].mxu0 }
 0x1d1   : > { %v705_v21 = vpack.c.bf16 %v686_v19, %v685_v18 }
 0x1d3   : > { %5123 = vmatmul.mubr.msk.bf16.gmra.mrb[4].mxu1 %vm730_vm4, %v705_v21 }
 0x1d4   : > { %v613_v22 = vpop.f32.mrb[8].mxu0  ;;  %5126 = vmatprep.mubr.msk.bf16.mxu1 %vm6227_vm3, %v6226_v10 }
 0x1d5   : > { %v615_v23 = vpop.f32.mrb[9].mxu0  ;;  %v687_v25 = vmax.f32 %v613_v22, 0.0 }
 0x1d6   : > { %v616_v24 = vpop.f32.mrb[10].mxu0 }
 0x1d7   : > { %v688_v26 = vmax.f32 %v616_v24, 0.0  ;;  %v618_v27 = vpop.f32.mrb[11].mxu0 }
 0x1d9   : > { %v706_v28 = vpack.c.bf16 %v688_v26, %v687_v25 }
 0x1db   : > { %5127 = vmatmul.mubr.msk.bf16.gmra.mrb[8].mxu1 %vm730_vm4, %v706_v28 }
 0x1dc   : > { %v621_v29 = vpop.f32.mrb[12].mxu0  ;;  %5130 = vmatprep.mubr.msk.bf16.mxu1 %vm6227_vm3, %v6226_v10 }
 0x1dd   : > { %v623_v30 = vpop.f32.mrb[13].mxu0  ;;  %v689_v32 = vmax.f32 %v621_v29, 0.0 }
 0x1de   : > { %v624_v31 = vpop.f32.mrb[14].mxu0 }
 0x1df   : > { %v690_v33 = vmax.f32 %v624_v31, 0.0  ;;  %v626_v34 = vpop.f32.mrb[15].mxu0 }
 0x1e1   : > { %v707_v35 = vpack.c.bf16 %v690_v33, %v689_v32 }
 0x1e3   : > { %5131 = vmatmul.mubr.msk.bf16.gmra.mrb[12].mxu1 %vm730_vm4, %v707_v35 }
 0x1e4   : > { %v629_v36 = vpop.f32.mrb[16].mxu0  ;;  %5134 = vmatprep.mubr.msk.bf16.mxu1 %vm6227_vm3, %v6226_v10 }
 0x1e5   : > { %v631_v37 = vpop.f32.mrb[17].mxu0  ;;  %v691_v39 = vmax.f32 %v629_v36, 0.0 }
 0x1e6   : > { %v632_v38 = vpop.f32.mrb[18].mxu0 }
 0x1e7   : > { %v692_v40 = vmax.f32 %v632_v38, 0.0  ;;  %v634_v41 = vpop.f32.mrb[19].mxu0 }
 0x1e9   : > { %v708_v42 = vpack.c.bf16 %v692_v40, %v691_v39 }
 0x1eb   : > { %5135 = vmatmul.mubr.msk.bf16.gmra.mrb[16].mxu1 %vm730_vm4, %v708_v42 }
 0x1ec   : > { %v637_v43 = vpop.f32.mrb[20].mxu0  ;;  %5138 = vmatprep.mubr.msk.bf16.mxu1 %vm6227_vm3, %v6226_v10 }
 0x1ed   : > { %v639_v45 = vpop.f32.mrb[21].mxu0  ;;  %v693_v47 = vmax.f32 %v637_v43, 0.0 }
 0x1ee   : > { %v640_v46 = vpop.f32.mrb[22].mxu0 }
 0x1ef   : > { %v694_v48 = vmax.f32 %v640_v46, 0.0  ;;  %v642_v49 = vpop.f32.mrb[23].mxu0 }
 0x1f1   : > { %v709_v50 = vpack.c.bf16 %v694_v48, %v693_v47 }
 0x1f3   : > { %5139 = vmatmul.mubr.msk.bf16.gmra.mrb[20].mxu1 %vm730_vm4, %v709_v50 }
 0x1f4   : > { %v645_v51 = vpop.f32.mrb[24].mxu0  ;;  %5142 = vmatprep.mubr.msk.bf16.mxu1 %vm6227_vm3, %v6226_v10 }
 0x1f5   : > { %v647_v52 = vpop.f32.mrb[25].mxu0  ;;  %v695_v54 = vmax.f32 %v645_v51, 0.0 }
 0x1f6   : > { %v648_v53 = vpop.f32.mrb[26].mxu0 }
 0x1f7   : > { %v696_v55 = vmax.f32 %v648_v53, 0.0  ;;  %v650_v56 = vpop.f32.mrb[27].mxu0  ;;  %v5861_v53 = vld [vmem:[%s7582_s3 + $0x4] ss:$28 sps:$4 sm:$0xff]  }
 0x1f9   : > { %v710_v57 = vpack.c.bf16 %v696_v55, %v695_v54 }
 0x1fb   : > { %5143 = vmatmul.mubr.msk.bf16.gmra.mrb[24].mxu1 %vm730_vm4, %v710_v57 }
 0x1fc   : > { %v653_v58 = vpop.f32.mrb[28].mxu0  ;;  %5146 = vmatprep.mubr.msk.bf16.mxu1 %vm6227_vm3, %v6226_v10 }
 0x1fd   : > { %v655_v59 = vpop.f32.mrb[29].mxu0  ;;  %v697_v61 = vmax.f32 %v653_v58, 0.0 }
 0x1fe   : > { %v656_v60 = vpop.f32.mrb[30].mxu0 }
 0x1ff   : > { %v698_v62 = vmax.f32 %v656_v60, 0.0  ;;  %v658_v63 = vpop.f32.mrb[31].mxu0 }
 0x201   : > { %v711_v1 = vpack.c.bf16 %v698_v62, %v697_v61 }
 0x203   : > { %5147 = vmatmul.mubr.msk.bf16.gmra.mrb[28].mxu1 %vm730_vm4, %v711_v1 }
 0x204   : > { %v661_v2 = vpop.f32.mrb[32].mxu0  ;;  %5150 = vmatprep.mubr.msk.bf16.mxu1 %vm6227_vm3, %v6226_v10 }
 0x205   : > { %v663_v3 = vpop.f32.mrb[33].mxu0  ;;  %v699_v5 = vmax.f32 %v661_v2, 0.0 }
 0x206   : > { %v664_v4 = vpop.f32.mrb[34].mxu0 }
 0x207   : > { %v700_v6 = vmax.f32 %v664_v4, 0.0  ;;  %v666_v7 = vpop.f32.mrb[35].mxu0 }
 0x209   : > { %v712_v8 = vpack.c.bf16 %v700_v6, %v699_v5 }
 0x20b   : > { %5151 = vmatmul.mubr.msk.bf16.gmra.mrb[32].mxu1 %vm730_vm4, %v712_v8 }
 0x20c   : > { %v669_v9 = vpop.f32.mrb[36].mxu0  ;;  %5154 = vmatprep.mubr.msk.bf16.mxu1 %vm6227_vm3, %v6226_v10 }
 0x20d   : > { %v671_v11 = vpop.f32.mrb[37].mxu0  ;;  %v701_v13 = vmax.f32 %v669_v9, 0.0 }
 0x20e   : > { %v672_v12 = vpop.f32.mrb[38].mxu0 }
 0x20f   : > { %v702_v14 = vmax.f32 %v672_v12, 0.0  ;;  %v674_v15 = vpop.f32.mrb[39].mxu0 }
 0x211   : > { %v713_v16 = vpack.c.bf16 %v702_v14, %v701_v13 }
 0x213   : > { %5155 = vmatmul.mubr.msk.bf16.gmra.mrb[36].mxu1 %vm730_vm4, %v713_v16 }
 0x214   : > { %v677_v17 = vpop.f32.mrb[40].mxu0  ;;  %5158 = vmatprep.mubr.msk.bf16.mxu1 %vm6227_vm3, %v6226_v10 }
 0x215   : > { %v703_v18 = vmax.f32 %v677_v17, 0.0  ;;  %v679_v19 = vpop.f32.mrb[41].mxu0 }
 0x216   : > { %v680_v20 = vpop.f32.mrb[42].mxu0 }
 0x217   : > { %v714_v21 = vpack.c.bf16 %v703_v18, %v703_v18  ;;  %v681_v22 = vpop.f32.mrb[43].mxu0 }
 0x21b   : > { %5159 = vmatmul.mubr.msk.bf16.gmra.mrb[40].mxu1 %vm730_vm4, %v714_v21 }
 0x21c   : > { %1714 = vmatprep.mubr.bf16.mxu1 %v5861_v53 }
 0x29e   : > { %v6508_v23 = vpop.f32.mrb[0].mxu1 }
 0x29f   : > { %v5120_v24 = vpop.f32.mrb[1].mxu1 }
 0x2a0   : > { %v6510_v25 = vpop.f32.mrb[2].mxu1 }
 0x2a1   : > { %v5121_v26 = vpop.f32.mrb[3].mxu1  ;;  %v6514_v27 = vpack.i.bf16 %v6510_v25, %v6508_v23  ;;  %v1161_v10 = vpack.c.bf16 %v6510_v25, %v6508_v23 }
 0x2a3   : > { %5426 = vrot.lane.b32.xlu0 %v6514_v27, %s6222_s13 }
 0x2a6   : > { %v6520_v28 = vpop.f32.mrb[4].mxu1 }
 0x2a7   : > { %v5124_v29 = vpop.f32.mrb[5].mxu1 }
 0x2a8   : > { %v6522_v30 = vpop.f32.mrb[6].mxu1 }
 0x2a9   : > { %v5125_v31 = vpop.f32.mrb[7].mxu1  ;;  %v6526_v32 = vpack.i.bf16 %v6522_v30, %v6520_v28  ;;  %v1162_v33 = vpack.c.bf16 %v6522_v30, %v6520_v28 }
 0x2ab   : > { %5431 = vrot.lane.b32.xlu1 %v6526_v32, %s6222_s13 }
 0x2ae   : > { %v6532_v34 = vpop.f32.mrb[8].mxu1 }
 0x2af   : > { %v5128_v35 = vpop.f32.mrb[9].mxu1 }
 0x2b0   : > { %v6534_v36 = vpop.f32.mrb[10].mxu1 }
 0x2b1   : > { %v5129_v37 = vpop.f32.mrb[11].mxu1  ;;  %v6538_v38 = vpack.i.bf16 %v6534_v36, %v6532_v34  ;;  %v1163_v39 = vpack.c.bf16 %v6534_v36, %v6532_v34 }
 0x2b3   : > { %5436 = vrot.lane.b32.xlu0 %v6538_v38, %s6222_s13 }
 0x2b6   : > { %v6544_v40 = vpop.f32.mrb[12].mxu1 }
 0x2b7   : > { %v5132_v41 = vpop.f32.mrb[13].mxu1 }
 0x2b8   : > { %v6546_v42 = vpop.f32.mrb[14].mxu1 }
 0x2b9   : > { %v5133_v43 = vpop.f32.mrb[15].mxu1  ;;  %v6550_v45 = vpack.i.bf16 %v6546_v42, %v6544_v40  ;;  %v1164_v46 = vpack.c.bf16 %v6546_v42, %v6544_v40 }
 0x2bb   : > { %5441 = vrot.lane.b32.xlu1 %v6550_v45, %s6222_s13 }
 0x2be   : > { %v6556_v47 = vpop.f32.mrb[16].mxu1 }
 0x2bf   : > { %v5136_v48 = vpop.f32.mrb[17].mxu1 }
 0x2c0   : > { %v6558_v49 = vpop.f32.mrb[18].mxu1 }
 0x2c1   : > { %v5137_v50 = vpop.f32.mrb[19].mxu1  ;;  %v6562_v51 = vpack.i.bf16 %v6558_v49, %v6556_v47  ;;  %v1165_v52 = vpack.c.bf16 %v6558_v49, %v6556_v47 }
 0x2c3   : > { %5446 = vrot.lane.b32.xlu0 %v6562_v51, %s6222_s13 }
 0x2c6   : > { %v6571_v54 = vpop.f32.mrb[20].mxu1 }
 0x2c7   : > { %5456 = vrot.lane.b32.xlu0 %v6550_v45, %s6223_s11  ;;  %v5140_v55 = vpop.f32.mrb[21].mxu1 }
 0x2c8   : > { %v6575_v56 = vpop.f32.mrb[22].mxu1 }
 0x2c9   : > { %v5141_v57 = vpop.f32.mrb[23].mxu1  ;;  %v6579_v58 = vpack.i.bf16 %v6575_v56, %v6571_v54  ;;  %v1166_v59 = vpack.c.bf16 %v6575_v56, %v6571_v54  ;;  %v5859_v56 = vld [vmem:[%s7582_s3] ss:$28 sps:$4 sm:$0xff]  }
 0x2cb   : > { %5461 = vrot.lane.b32.xlu0 %v6562_v51, %s6223_s11  ;;  %5451 = vrot.lane.b32.xlu1 %v6579_v58, %s6222_s13 }
 0x2ce   : > { %v6587_v60 = vpop.f32.mrb[24].mxu1 }
 0x2cf   : > { %5466 = vrot.lane.b32.xlu0 %v6579_v58, %s6223_s11  ;;  %v5144_v61 = vpop.f32.mrb[25].mxu1 }
 0x2d0   : > { %v6591_v62 = vpop.f32.mrb[26].mxu1 }
 0x2d1   : > { %v5145_v63 = vpop.f32.mrb[27].mxu1  ;;  %v6595_v1 = vpack.i.bf16 %v6591_v62, %v6587_v60  ;;  %v1167_v2 = vpack.c.bf16 %v6591_v62, %v6587_v60 }
 0x2d3   : > { %5476 = vrot.lane.b32.xlu0 %v6595_v1, %s6223_s11  ;;  %5471 = vrot.lane.b32.xlu1 %v6595_v1, %s6222_s13 }
 0x2d6   : > { %v6603_v3 = vpop.f32.mrb[28].mxu1 }
 0x2d7   : > { %v5148_v4 = vpop.f32.mrb[29].mxu1 }
 0x2d8   : > { %v6605_v5 = vpop.f32.mrb[30].mxu1 }
 0x2d9   : > { %v5149_v6 = vpop.f32.mrb[31].mxu1  ;;  %v5485_v7 = vpack.i.bf16 %v6605_v5, %v6603_v3  ;;  %v1168_v8 = vpack.c.bf16 %v6605_v5, %v6603_v3 }
 0x2db   : > { %5486 = vrot.lane.b32.xlu0 %v5485_v7, %s6223_s11  ;;  %5481 = vrot.lane.b32.xlu1 %v5485_v7, %s6222_s13 }
 0x2de   : > { %v866_v9 = vpop.f32.mrb[32].mxu1 }
 0x2df   : > { %v5152_v11 = vpop.f32.mrb[33].mxu1  ;;  %v5600_v12 = vpack.i.bf16 %v866_v9, %v6605_v5  ;;  %v5865_v5 = vld [vmem:[%s7582_s3 + $0x74] ss:$28 sps:$4 sm:$0xff]  }
 0x2e0   : > { %v869_v13 = vpop.f32.mrb[34].mxu1 }
 0x2e1   : > { %v5153_v14 = vpop.f32.mrb[35].mxu1  ;;  %v5495_v15 = vpack.i.bf16 %v869_v13, %v866_v9  ;;  %v1169_v16 = vpack.c.bf16 %v869_v13, %v866_v9  ;;  %v5520_v17 = vpack.i.bf16 %v869_v13, %v6508_v23 }
 0x2e3   : > { %5496 = vrot.lane.b32.xlu0 %v5495_v15, %s6223_s11  ;;  %5491 = vrot.lane.b32.xlu1 %v5495_v15, %s6222_s13 }
 0x2e4   : > { %4585 = vmatprep.subr.bf16.mxu1 %v1169_v16 }
 0x2e5   : > { %4586 = vmatpush3.bf16.msra.mxu1 %v1161_v10 }
 0x2e6   : > { %v874_v18 = vpop.f32.mrb[36].mxu1 }
 0x2e7   : > { %v5156_v19 = vpop.f32.mrb[37].mxu1  ;;  %v5530_v20 = vpack.i.bf16 %v6510_v25, %v874_v18 }
 0x2e8   : > { %v877_v21 = vpop.f32.mrb[38].mxu1  ;;  %v5867_v19 = vld [vmem:[%s7582_s3 + $0x70] ss:$28 sps:$4 sm:$0xff]  }
 0x2e9   : > { %v5157_v22 = vpop.f32.mrb[39].mxu1  ;;  %v5510_v24 = vpack.i.bf16 %v877_v21, %v874_v18  ;;  %v1170_v26 = vpack.c.bf16 %v877_v21, %v874_v18  ;;  %v5535_v29 = vpack.i.bf16 %v877_v21, %v6520_v28  ;;  %v5879_v28 = vld [vmem:[%s7582_s3 + $0xc] ss:$28 sps:$4 sm:$0xff]  }
 0x2ea   : > { %1827 = vmatprep.mubr.bf16.mxu0 %v5879_v28 }
 0x2eb   : > { %5511 = vrot.lane.b32.xlu0 %v5510_v24, %s6223_s11  ;;  %5501 = vrot.lane.b32.xlu1 %v5510_v24, %s6222_s13 }
 0x2ec   : > { %4587 = vmatprep.subr.bf16.mxu1 %v1170_v26 }
 0x2ed   : > { %4588 = vmatpush3.bf16.msra.mxu1 %v1162_v33 }
 0x2ee   : > { %v882_v23 = vpop.f32.mrb[40].mxu1 }
 0x2ef   : > { %949 = vrot.lane.b32.xlu1 %v882_v23, %s6222_s13  ;;  %v5160_v10 = vpop.f32.mrb[41].mxu1  ;;  %v5525_v25 = vpack.i.bf16 %v6532_v34, %v882_v23  ;;  %v5545_v31 = vpack.i.bf16 %v6522_v30, %v882_v23 }
 0x2f0   : > { %v885_v35 = vpop.f32.mrb[42].mxu1 }
 0x2f1   : > { %5526 = vrot.lane.b32.xlu0 %v5525_v25, %s6223_s11  ;;  %v5161_v37 = vpop.f32.mrb[43].mxu1 }
 0x2f2   : > { %v5871_v37 = vld [vmem:[%s7582_s3 + $0xe4] ss:$28 sps:$4 sm:$0xff]  }
 0x2f3   : > { %5506 = vrot.lane.b32.xlu1 %v6514_v27, %s6223_s11 }
 0x2f5   : > { %982 = vrot.lane.b32.xlu0 %v6534_v36, %s6223_s11 }
 0x2f7   : > { %5516 = vrot.lane.b32.xlu1 %v6526_v32, %s6223_s11 }
 0x2f9   : > { %5536 = vrot.lane.b32.xlu0 %v5535_v29, %s6224_s20 }
 0x2fb   : > { %5521 = vrot.lane.b32.xlu1 %v5520_v17, %s6224_s20 }
 0x2fd   : > { %5541 = vrot.lane.b32.xlu0 %v6538_v38, %s6224_s20 }
 0x2ff   : > { %5531 = vrot.lane.b32.xlu1 %v5530_v20, %s6224_s20  ;;  %v5868_v20 = vld [vmem:[%s7582_s3 + $0xac] ss:$28 sps:$4 sm:$0xff]  }
 0x301   : > { %5556 = vrot.lane.b32.xlu0 %v6550_v45, %s6224_s20 }
 0x303   : > { %5546 = vrot.lane.b32.xlu1 %v5545_v31, %s6224_s20  ;;  %v5870_v31 = vld [vmem:[%s7582_s3 + $0xa8] ss:$28 sps:$4 sm:$0xff]  }
 0x305   : > { %5566 = vrot.lane.b32.xlu0 %v6562_v51, %s6224_s20 }
 0x307   : > { %5551 = vrot.lane.b32.xlu1 %v6514_v27, %s7594_s21 }
 0x309   : > { %5576 = vrot.lane.b32.xlu0 %v6579_v58, %s6224_s20 }
 0x30b   : > { %5561 = vrot.lane.b32.xlu1 %v6526_v32, %s7594_s21 }
 0x30d   : > { %5586 = vrot.lane.b32.xlu0 %v6595_v1, %s6224_s20 }
 0x30f   : > { %5571 = vrot.lane.b32.xlu1 %v6538_v38, %s7594_s21 }
 0x311   : > { %1063 = vrot.lane.b32.xlu0 %v6603_v3, %s6224_s20  ;;  %v5864_v3 = vld [vmem:[%s7582_s3 + $0x38] ss:$28 sps:$4 sm:$0xff]  }
 0x313   : > { %5581 = vrot.lane.b32.xlu1 %v6550_v45, %s7594_s21 }
 0x315   : > { %v5427_v30 = vpop.permute.xlu0 %5426  ;;  %5601 = vrot.lane.b32.xlu0 %v5600_v12, %s6224_s20 }
 0x316   : > { %v5428_v27 = vunpack.i.l.bf16 %v5427_v30  ;;  %v5429_v38 = vunpack.i.h.bf16 %v5427_v30 }
 0x317   : > { %5591 = vrot.lane.b32.xlu1 %v6562_v51, %s7594_s21 }
 0x318   : > { %v1171_v32 = vpack.c.bf16 %v5428_v27, %v882_v23 }
 0x319   : > { %5611 = vrot.lane.b32.xlu0 %v5485_v7, %s7594_s21 }
 0x31a   : > { %4589 = vmatprep.subr.bf16.mxu1 %v1171_v32 }
 0x31b   : > { %5596 = vrot.lane.b32.xlu1 %v6579_v58, %s7594_s21  ;;  %4590 = vmatpush3.bf16.msra.mxu1 %v1163_v39 }
 0x31d   : > { %v5432_v33 = vpop.permute.xlu1 %5431  ;;  %5621 = vrot.lane.b32.xlu0 %v5510_v24, %s7594_s21 }
 0x31e   : > { %v5433_v41 = vunpack.i.l.bf16 %v5432_v33  ;;  %v5434_v48 = vunpack.i.h.bf16 %v5432_v33 }
 0x31f   : > { %5606 = vrot.lane.b32.xlu1 %v6595_v1, %s7594_s21 }
 0x320   : > { %v1172_v43 = vpack.c.bf16 %v5433_v41, %v5429_v38 }
 0x322   : > { %4591 = vmatprep.subr.bf16.mxu1 %v1172_v43 }
 0x323   : > { %5616 = vrot.lane.b32.xlu1 %v5495_v15, %s7594_s21  ;;  %4592 = vmatpush3.bf16.msra.mxu1 %v1164_v46 }
 0x325   : > { %v5437_v45 = vpop.permute.xlu0 %5436 }
 0x326   : > { %v5438_v34 = vunpack.i.l.bf16 %v5437_v45  ;;  %v5439_v50 = vunpack.i.h.bf16 %v5437_v45 }
 0x327   : > { %1138 = vrot.lane.b32.xlu1 %v882_v23, %s7594_s21 }
 0x328   : > { %v1173_v36 = vpack.c.bf16 %v5438_v34, %v5434_v48 }
 0x32a   : > { %4593 = vmatprep.subr.bf16.mxu1 %v1173_v36 }
 0x32b   : > { %4594 = vmatpush3.bf16.msra.mxu1 %v1165_v52 }
 0x32d   : > { %v5442_v39 = vpop.permute.xlu1 %5441 }
 0x32e   : > { %v5443_v51 = vunpack.i.l.bf16 %v5442_v39  ;;  %v5444_v42 = vunpack.i.h.bf16 %v5442_v39  ;;  %v5873_v39 = vld [vmem:[%s7582_s3 + $0xe0] ss:$28 sps:$4 sm:$0xff]  }
 0x330   : > { %v1174_v53 = vpack.c.bf16 %v5443_v51, %v5439_v50  ;;  %v5874_v51 = vld [vmem:[%s7582_s3 + $0x11c] ss:$28 sps:$4 sm:$0xff]  }
 0x332   : > { %4595 = vmatprep.subr.bf16.mxu1 %v1174_v53 }
 0x333   : > { %4596 = vmatpush3.bf16.msra.mxu1 %v1166_v59  ;;  %v5862_v59 = vld [vmem:[%s7582_s3 + $0x3c] ss:$28 sps:$4 sm:$0xff]  }
 0x335   : > { %v5447_v40 = vpop.permute.xlu0 %5446 }
 0x336   : > { %v5448_v46 = vunpack.i.l.bf16 %v5447_v40  ;;  %v5449_v52 = vunpack.i.h.bf16 %v5447_v40 }
 0x338   : > { %v1175_v55 = vpack.c.bf16 %v5448_v46, %v5444_v42 }
 0x339   : > { %v5457_v57 = vpop.permute.xlu0 %5456 }
 0x33a   : > { %v5459_v58 = vunpack.i.h.bf16 %v5457_v57  ;;  %v5458_v61 = vunpack.i.l.bf16 %v5457_v57  ;;  %4597 = vmatprep.subr.bf16.mxu1 %v1175_v55 }
 0x33b   : > { %4598 = vmatpush3.bf16.msra.mxu1 %v1167_v2 }
 0x33c   : > { %v1185_v47 = vpack.c.bf16 %v5459_v58, %v5458_v61 }
 0x33d   : > { %v5452_v49 = vpop.permute.xlu1 %5451  ;;  %v5462_v54 = vpop.permute.xlu0 %5461 }
 0x33e   : > { %v5453_v63 = vunpack.i.l.bf16 %v5452_v49  ;;  %4661 = vmatprep.subr.bf16.mxu0 %v1185_v47  ;;  %v5464_v60 = vunpack.i.h.bf16 %v5462_v54  ;;  %v5463_v62 = vunpack.i.l.bf16 %v5462_v54  ;;  %v5454_v4 = vunpack.i.h.bf16 %v5452_v49  ;;  %v5876_v54 = vld [vmem:[%s7582_s3 + $0x118] ss:$28 sps:$4 sm:$0xff]  }
 0x340   : > { %v1176_v1 = vpack.c.bf16 %v5453_v63, %v5449_v52  ;;  %v1186_v9 = vpack.c.bf16 %v5464_v60, %v5463_v62 }
 0x341   : > { %v5467_v11 = vpop.permute.xlu0 %5466 }
 0x342   : > { %4599 = vmatprep.subr.bf16.mxu1 %v1176_v1  ;;  %v5468_v12 = vunpack.i.l.bf16 %v5467_v11 }
 0x343   : > { %4600 = vmatpush3.bf16.msra.mxu1 %v1168_v8  ;;  %v5469_v8 = vunpack.i.h.bf16 %v5467_v11 }
 0x345   : > { %v5472_v2 = vpop.permute.xlu1 %5471  ;;  %v1187_v17 = vpack.c.bf16 %v5469_v8, %v5468_v12  ;;  %v5477_v18 = vpop.permute.xlu0 %5476 }
 0x346   : > { %v5473_v6 = vunpack.i.l.bf16 %v5472_v2  ;;  %1715 = vmatmul.mubr.bf16.vlgmr.msra.gmra.mrb[44].mxu1 %v5859_v56  ;;  %v5474_v14 = vunpack.i.h.bf16 %v5472_v2  ;;  %v5479_v21 = vunpack.i.h.bf16 %v5477_v18  ;;  %v5478_v22 = vunpack.i.l.bf16 %v5477_v18 }
 0x347   : > { %1722 = vmatprep.mubr.bf16.mxu1 %v5862_v59  ;;  %v5880_v59 = vld [vmem:[%s7582_s3 + $0x154] ss:$28 sps:$4 sm:$0xff]  }
 0x348   : > { %v1177_v7 = vpack.c.bf16 %v5473_v6, %v5454_v4  ;;  %v1188_v25 = vpack.c.bf16 %v5479_v21, %v5478_v22 }
 0x34a   : > { %4662 = vmatpush3.bf16.msra.mxu0 %v1177_v7 }
 0x34b   : > { %4663 = vmatprep.subr.bf16.mxu0 %v1186_v9 }
 0x34d   : > { %v5482_v13 = vpop.permute.xlu1 %5481  ;;  %v5487_v23 = vpop.permute.xlu0 %5486 }
 0x34e   : > { %v5483_v15 = vunpack.i.l.bf16 %v5482_v13  ;;  %1723 = vmatmul.mubr.bf16.gmra.mrb[48].mxu1 %v5864_v3  ;;  %v5484_v26 = vunpack.i.h.bf16 %v5482_v13  ;;  %v5489_v28 = vunpack.i.h.bf16 %v5487_v23  ;;  %v5488_v30 = vunpack.i.l.bf16 %v5487_v23 }
 0x34f   : > { %1730 = vmatprep.mubr.bf16.mxu1 %v5865_v5 }
 0x350   : > { %v1178_v16 = vpack.c.bf16 %v5483_v15, %v5474_v14  ;;  %v1189_v43 = vpack.c.bf16 %v5489_v28, %v5488_v30  ;;  %v5877_v14 = vld [vmem:[%s7582_s3 + $0x8] ss:$28 sps:$4 sm:$0xff]   ;;  %v5882_v15 = vld [vmem:[%s7582_s3 + $0x150] ss:$28 sps:$4 sm:$0xff]  }
 0x351   : > { %v5887_v30 = vld [vmem:[%s7582_s3 + $0x188] ss:$28 sps:$4 sm:$0xff]  }
 0x352   : > { %4664 = vmatpush3.bf16.msra.mxu0 %v1178_v16 }
 0x353   : > { %4665 = vmatprep.subr.bf16.mxu0 %v1187_v17  ;;  %v5883_v17 = vld [vmem:[%s7582_s3 + $0x18c] ss:$28 sps:$4 sm:$0xff]  }
 0x355   : > { %v5492_v24 = vpop.permute.xlu1 %5491  ;;  %v5497_v35 = vpop.permute.xlu0 %5496 }
 0x356   : > { %v5493_v29 = vunpack.i.l.bf16 %v5492_v24  ;;  %1731 = vmatmul.mubr.bf16.gmra.mrb[52].mxu1 %v5867_v19  ;;  %v5494_v32 = vunpack.i.h.bf16 %v5492_v24  ;;  %v5499_v45 = vunpack.i.h.bf16 %v5497_v35  ;;  %v5498_v48 = vunpack.i.l.bf16 %v5497_v35 }
 0x357   : > { %1738 = vmatprep.mubr.bf16.mxu1 %v5868_v20  ;;  %v5885_v20 = vld [vmem:[%s7582_s3 + $0x44] ss:$28 sps:$4 sm:$0xff]  }
 0x358   : > { %v1179_v10 = vpack.c.bf16 %v5493_v29, %v5484_v26  ;;  %v1190_v40 = vpack.c.bf16 %v5499_v45, %v5498_v48 }
 0x35a   : > { %4666 = vmatpush3.bf16.msra.mxu0 %v1179_v10 }
 0x35b   : > { %4667 = vmatprep.subr.bf16.mxu0 %v1188_v25 }
 0x35d   : > { %v5502_v27 = vpop.permute.xlu1 %5501  ;;  %v5512_v38 = vpop.permute.xlu0 %5511 }
 0x35e   : > { %v5503_v33 = vunpack.i.l.bf16 %v5502_v27  ;;  %1739 = vmatmul.mubr.bf16.gmra.mrb[56].mxu1 %v5870_v31  ;;  %v5504_v36 = vunpack.i.h.bf16 %v5502_v27  ;;  %v5514_v42 = vunpack.i.h.bf16 %v5512_v38  ;;  %v5513_v46 = vunpack.i.l.bf16 %v5512_v38  ;;  %v5888_v27 = vld [vmem:[%s7582_s3 + $0x40] ss:$28 sps:$4 sm:$0xff]  }
 0x35f   : > { %1746 = vmatprep.mubr.bf16.mxu1 %v5871_v37 }
 0x360   : > { %v1180_v41 = vpack.c.bf16 %v5503_v33, %v5494_v32  ;;  %v1191_v49 = vpack.c.bf16 %v5514_v42, %v5513_v46  ;;  %v5889_v33 = vld [vmem:[%s7582_s3 + $0x1c4] ss:$28 sps:$4 sm:$0xff]  }
 0x361   : > { %v950_v34 = vpop.permute.xlu1 %949 }
 0x362   : > { %4668 = vmatpush3.bf16.msra.mxu0 %v1180_v41  ;;  %v1181_v53 = vpack.c.bf16 %v950_v34, %v5504_v36 }
 0x363   : > { %4669 = vmatprep.subr.bf16.mxu0 %v1189_v43  ;;  %v5527_v50 = vpop.permute.xlu0 %5526  ;;  %v5891_v43 = vld [vmem:[%s7582_s3 + $0x7c] ss:$28 sps:$4 sm:$0xff]  }
 0x364   : > { %v5528_v2 = vunpack.i.l.bf16 %v5527_v50  ;;  %v5529_v6 = vunpack.i.h.bf16 %v5527_v50 }
 0x365   : > { %v5507_v55 = vpop.permute.xlu1 %5506 }
 0x366   : > { %v5509_v57 = vunpack.i.h.bf16 %v5507_v55  ;;  %v5508_v58 = vunpack.i.l.bf16 %v5507_v55  ;;  %1747 = vmatmul.mubr.bf16.gmra.mrb[60].mxu1 %v5873_v39  ;;  %4670 = vmatpush3.bf16.msra.mxu0 %v1181_v53 }
 0x367   : > { %v983_v61 = vpop.permute.xlu0 %982  ;;  %4671 = vmatprep.subr.bf16.mxu0 %v1190_v40  ;;  %1754 = vmatprep.mubr.bf16.mxu1 %v5874_v51 }
 0x368   : > { %v1182_v47 = vpack.c.bf16 %v5509_v57, %v5508_v58  ;;  %v1184_v11 = vpack.c.bf16 %v983_v61, %v5529_v6  ;;  %v5893_v58 = vld [vmem:[%s7582_s3 + $0x1c0] ss:$28 sps:$4 sm:$0xff]   ;;  %v5894_v61 = vld [vmem:[%s7582_s3 + $0x78] ss:$28 sps:$4 sm:$0xff]  }
 0x369   : > { %v5517_v52 = vpop.permute.xlu1 %5516 }
 0x36a   : > { %v5519_v63 = vunpack.i.h.bf16 %v5517_v52  ;;  %v5518_v1 = vunpack.i.l.bf16 %v5517_v52  ;;  %4672 = vmatpush3.bf16.msra.mxu0 %v1182_v47 }
 0x36b   : > { %v5537_v56 = vpop.permute.xlu0 %5536  ;;  %4673 = vmatprep.subr.bf16.mxu0 %v1191_v49  ;;  %v5895_v49 = vld [vmem:[%s7582_s3 + $0x1fc] ss:$28 sps:$4 sm:$0xff]  }
 0x36c   : > { %v1183_v60 = vpack.c.bf16 %v5519_v63, %v5518_v1  ;;  %v5538_v5 = vunpack.i.l.bf16 %v5537_v56  ;;  %v5539_v22 = vunpack.i.h.bf16 %v5537_v56  ;;  %v5897_v1 = vld [vmem:[%s7582_s3 + $0xb4] ss:$28 sps:$4 sm:$0xff]  }
 0x36d   : > { %v5522_v62 = vpop.permute.xlu1 %5521 }
 0x36e   : > { %v5523_v4 = vunpack.i.l.bf16 %v5522_v62  ;;  %1755 = vmatmul.mubr.bf16.gmra.mrb[64].mxu1 %v5876_v54  ;;  %4674 = vmatpush3.bf16.msra.mxu0 %v1183_v60  ;;  %v5524_v8 = vunpack.i.h.bf16 %v5522_v62 }
 0x36f   : > { %v5542_v7 = vpop.permute.xlu0 %5541  ;;  %1762 = vmatprep.mubr.bf16.mxu1 %v5880_v59 }
 0x370   : > { %v1192_v9 = vpack.c.bf16 %v5523_v4, %v5528_v2  ;;  %v5543_v24 = vunpack.i.l.bf16 %v5542_v7  ;;  %v5544_v38 = vunpack.i.h.bf16 %v5542_v7 }
 0x371   : > { %v5532_v3 = vpop.permute.xlu1 %5531 }
 0x372   : > { %v5534_v12 = vunpack.i.h.bf16 %v5532_v3  ;;  %v5533_v13 = vunpack.i.l.bf16 %v5532_v3  ;;  %4675 = vmatprep.subr.bf16.mxu0 %v1192_v9 }
 0x373   : > { %v5557_v16 = vpop.permute.xlu0 %5556  ;;  %4676 = vmatpush3.bf16.msra.mxu0 %v1184_v11 }
 0x374   : > { %v1193_v18 = vpack.c.bf16 %v5538_v5, %v5534_v12  ;;  %v1201_v19 = vpack.c.bf16 %v5533_v13, %v5524_v8  ;;  %v5558_v35 = vunpack.i.l.bf16 %v5557_v16  ;;  %v5559_v51 = vunpack.i.h.bf16 %v5557_v16  ;;  %v5899_v5 = vld [vmem:[%s7582_s3 + $0x1f8] ss:$28 sps:$4 sm:$0xff]   ;;  %v5900_v8 = vld [vmem:[%s7582_s3 + $0xb0] ss:$28 sps:$4 sm:$0xff]  }
 0x375   : > { %v5547_v21 = vpop.permute.xlu1 %5546  ;;  %v5901_v12 = vld [vmem:[%s7582_s3 + $0xec] ss:$28 sps:$4 sm:$0xff]  }
 0x376   : > { %v5549_v26 = vunpack.i.h.bf16 %v5547_v21  ;;  %v5548_v29 = vunpack.i.l.bf16 %v5547_v21  ;;  %1763 = vmatmul.mubr.bf16.gmra.mrb[68].mxu1 %v5882_v15  ;;  %1828 = vmatmul.mubr.bf16.vlgmr.msra.gmra.mrb[44].mxu0 %v5877_v14  ;;  %v1195_v48 = vpack.c.bf16 %v5558_v35, %v5544_v38  ;;  %v5905_v15 = vld [vmem:[%s7582_s3 + $0x14] ss:$28 sps:$4 sm:$0xff]   ;;  %v5906_v35 = vld [vmem:[%s7582_s3 + $0xe8] ss:$28 sps:$4 sm:$0xff]  }
 0x377   : > { %4737 = vmatprep.subr.bf16.mxu1 %v1201_v19  ;;  %v5567_v23 = vpop.permute.xlu0 %5566  ;;  %1770 = vmatprep.mubr.bf16.mxu1 %v5883_v17 }
 0x378   : > { %v1194_v10 = vpack.c.bf16 %v5543_v24, %v5549_v26  ;;  %v1202_v25 = vpack.c.bf16 %v5548_v29, %v5539_v22  ;;  %4738 = vmatpush3.bf16.msra.mxu1 %v1193_v18  ;;  %1835 = vmatprep.mubr.bf16.mxu0 %v5885_v20  ;;  %v5568_v34 = vunpack.i.l.bf16 %v5567_v23  ;;  %v5569_v52 = vunpack.i.h.bf16 %v5567_v23 }
 0x379   : > { %v5552_v31 = vpop.permute.xlu1 %5551 }
 0x37a   : > { %v5554_v37 = vunpack.i.h.bf16 %v5552_v31  ;;  %v5553_v28 = vunpack.i.l.bf16 %v5552_v31  ;;  %4739 = vmatprep.subr.bf16.mxu1 %v1202_v25  ;;  %v1196_v42 = vpack.c.bf16 %v5568_v34, %v5559_v51  ;;  %v6228_v51 = vmov 65535  }
 0x37b   : > { %v5577_v32 = vpop.permute.xlu0 %5576 }
 0x37c   : > { %v1203_v41 = vpack.c.bf16 %v5554_v37, %v5553_v28  ;;  %4740 = vmatpush3.bf16.msra.mxu1 %v1194_v10  ;;  %v5578_v46 = vunpack.i.l.bf16 %v5577_v32  ;;  %v5579_v2 = vunpack.i.h.bf16 %v5577_v32  ;;  %v5903_v37 = vld [vmem:[%s7582_s3 + $0x10] ss:$28 sps:$4 sm:$0xff]  }
 0x37d   : > { %v5562_v45 = vpop.permute.xlu1 %5561  ;;  %v5909_v32 = vld [vmem:[%s7582_s3 + $0x4c] ss:$28 sps:$4 sm:$0xff]  }
 0x37e   : > { %v5564_v36 = vunpack.i.h.bf16 %v5562_v45  ;;  %v5563_v39 = vunpack.i.l.bf16 %v5562_v45  ;;  %1771 = vmatmul.mubr.bf16.gmra.mrb[72].mxu1 %v5887_v30  ;;  %1836 = vmatmul.mubr.bf16.gmra.mrb[48].mxu0 %v5888_v27  ;;  %v1197_v56 = vpack.c.bf16 %v5578_v46, %v5569_v52  ;;  %v5907_v30 = vld [vmem:[%s7582_s3 + $0x124] ss:$28 sps:$4 sm:$0xff]   ;;  %v5919_v52 = vld [vmem:[%s7582_s3 + $0x194] ss:$28 sps:$4 sm:$0xff]  }
 0x37f   : > { %4741 = vmatprep.subr.bf16.mxu1 %v1203_v41  ;;  %v5587_v50 = vpop.permute.xlu0 %5586  ;;  %1778 = vmatprep.mubr.bf16.mxu1 %v5889_v33 }
 0x380   : > { %v1204_v53 = vpack.c.bf16 %v5564_v36, %v5563_v39  ;;  %4742 = vmatpush3.bf16.msra.mxu1 %v1195_v48  ;;  %1843 = vmatprep.mubr.bf16.mxu0 %v5891_v43  ;;  %v5588_v59 = vunpack.i.l.bf16 %v5587_v50  ;;  %v5589_v13 = vunpack.i.h.bf16 %v5587_v50  ;;  %v5911_v36 = vld [vmem:[%s7582_s3 + $0x120] ss:$28 sps:$4 sm:$0xff]   ;;  %v5912_v50 = vld [vmem:[%s7582_s3 + $0x48] ss:$28 sps:$4 sm:$0xff]  }
 0x381   : > { %v5572_v40 = vpop.permute.xlu1 %5571 }
 0x382   : > { %v5574_v55 = vunpack.i.h.bf16 %v5572_v40  ;;  %v5573_v57 = vunpack.i.l.bf16 %v5572_v40  ;;  %4743 = vmatprep.subr.bf16.mxu1 %v1204_v53  ;;  %v1198_v9 = vpack.c.bf16 %v5588_v59, %v5579_v2  ;;  %v1677_v53 = vsel %vm1675_vm5, 4294967295, %v6228_v51  ;;  %v5913_v40 = vld [vmem:[%s7582_s3 + $0x15c] ss:$28 sps:$4 sm:$0xff]   ;;  %v5927_v59 = vld [vmem:[%s7582_s3 + $0xf4] ss:$28 sps:$4 sm:$0xff]  }
 0x383   : > { %v1064_v47 = vpop.permute.xlu0 %1063  ;;  %v5931_v2 = vld [vmem:[%s7582_s3 + $0x204] ss:$28 sps:$4 sm:$0xff]  }
 0x384   : > { %v1205_v63 = vpack.c.bf16 %v5574_v55, %v5573_v57  ;;  %4744 = vmatpush3.bf16.msra.mxu1 %v1196_v42  ;;  %v1199_v19 = vpack.c.bf16 %v1064_v47, %v5589_v13  ;;  %v5915_v42 = vld [vmem:[%s7582_s3 + $0x84] ss:$28 sps:$4 sm:$0xff]   ;;  %v6229_v55 = vmov 1.0   ;;  %v5917_v47 = vld [vmem:[%s7582_s3 + $0x158] ss:$28 sps:$4 sm:$0xff]  }
 0x385   : > { %v5582_v54 = vpop.permute.xlu1 %5581  ;;  %v5946_v13 = vld [vmem:[%s7582_s3 + $0xc0] ss:$28 sps:$4 sm:$0xff]  }
 0x386   : > { %v5584_v60 = vunpack.i.h.bf16 %v5582_v54  ;;  %v5583_v62 = vunpack.i.l.bf16 %v5582_v54  ;;  %1779 = vmatmul.mubr.bf16.gmra.mrb[76].mxu1 %v5893_v58  ;;  %1844 = vmatmul.mubr.bf16.gmra.mrb[52].mxu0 %v5894_v61  ;;  %v6803_v58 = vsel %vm1676_vm6, %v1677_v53, 0  ;;  %v5924_v54 = vld [vmem:[%s7582_s3 + $0xb8] ss:$28 sps:$4 sm:$0xff]  }
 0x387   : > { %4745 = vmatprep.subr.bf16.mxu1 %v1205_v63  ;;  %1786 = vmatprep.mubr.bf16.mxu1 %v5895_v49  ;;  %v5602_v6 = vpop.permute.xlu0 %5601  ;;  %v5918_v49 = vld [vmem:[%s7582_s3 + $0x80] ss:$28 sps:$4 sm:$0xff]  }
 0x388   : > { %v1206_v4 = vpack.c.bf16 %v5584_v60, %v5583_v62  ;;  %4746 = vmatpush3.bf16.msra.mxu1 %v1197_v56  ;;  %1851 = vmatprep.mubr.bf16.mxu0 %v5897_v1  ;;  %v5604_v16 = vunpack.i.h.bf16 %v5602_v6  ;;  %v5603_v17 = vunpack.i.l.bf16 %v5602_v6  ;;  %v5921_v63 = vld [vmem:[%s7582_s3 + $0xbc] ss:$28 sps:$4 sm:$0xff]   ;;  %v5923_v1 = vld [vmem:[%s7582_s3 + $0x190] ss:$28 sps:$4 sm:$0xff]   ;;  %v5929_v60 = vld [vmem:[%s7582_s3 + $0x1c8] ss:$28 sps:$4 sm:$0xff]  }
 0x389   : > { %v5592_v7 = vpop.permute.xlu1 %5591  ;;  %v5925_v56 = vld [vmem:[%s7582_s3 + $0x1cc] ss:$28 sps:$4 sm:$0xff]   ;;  %v5935_v6 = vld [vmem:[%s7582_s3 + $0x200] ss:$28 sps:$4 sm:$0xff]  }
 0x38a   : > { %v5594_v11 = vunpack.i.h.bf16 %v5592_v7  ;;  %v5593_v3 = vunpack.i.l.bf16 %v5592_v7  ;;  %4747 = vmatprep.subr.bf16.mxu1 %v1206_v4  ;;  %v1200_v26 = vpack.c.bf16 %v5604_v16, %v5603_v17  ;;  %v5930_v62 = vld [vmem:[%s7582_s3 + $0xf0] ss:$28 sps:$4 sm:$0xff]   ;;  %v5936_v7 = vld [vmem:[%s7582_s3 + $0x128] ss:$28 sps:$4 sm:$0xff]  }
 0x38b   : > { %v5612_v22 = vpop.permute.xlu0 %5611  ;;  %v5933_v4 = vld [vmem:[%s7582_s3 + $0x12c] ss:$28 sps:$4 sm:$0xff]   ;;  %v5947_v16 = vld [vmem:[%s7582_s3 + $0x1d4] ss:$28 sps:$4 sm:$0xff]  }
 0x38c   : > { %v1207_v14 = vpack.c.bf16 %v5594_v11, %v5593_v3  ;;  %4748 = vmatpush3.bf16.msra.mxu1 %v1198_v9  ;;  %v5614_v23 = vunpack.i.h.bf16 %v5612_v22  ;;  %v5613_v10 = vunpack.i.l.bf16 %v5612_v22  ;;  %v5939_v9 = vld [vmem:[%s7582_s3 + $0x18] ss:$28 sps:$4 sm:$0xff]   ;;  %v5937_v11 = vld [vmem:[%s7582_s3 + $0x164] ss:$28 sps:$4 sm:$0xff]   ;;  %v5941_v3 = vld [vmem:[%s7582_s3 + $0x50] ss:$28 sps:$4 sm:$0xff]  }
 0x38d   : > { %v5597_v18 = vpop.permute.xlu1 %5596  ;;  %v5951_v17 = vld [vmem:[%s7582_s3 + $0x130] ss:$28 sps:$4 sm:$0xff]   ;;  %v5955_v22 = vld [vmem:[%s7582_s3 + $0x208] ss:$28 sps:$4 sm:$0xff]  }
 0x38e   : > { %v5599_v20 = vunpack.i.h.bf16 %v5597_v18  ;;  %v5598_v21 = vunpack.i.l.bf16 %v5597_v18  ;;  %1787 = vmatmul.mubr.bf16.gmra.mrb[80].mxu1 %v5899_v5  ;;  %1852 = vmatmul.mubr.bf16.gmra.mrb[56].mxu0 %v5900_v8  ;;  %v1210_v33 = vpack.c.bf16 %v5614_v23, %v5613_v10  ;;  %v5940_v5 = vld [vmem:[%s7582_s3 + $0x160] ss:$28 sps:$4 sm:$0xff]   ;;  %v5944_v8 = vld [vmem:[%s7582_s3 + $0x88] ss:$28 sps:$4 sm:$0xff]   ;;  %v5950_v18 = vld [vmem:[%s7582_s3 + $0x1d0] ss:$28 sps:$4 sm:$0xff]  }
 0x38f   : > { %4749 = vmatprep.subr.bf16.mxu1 %v1207_v14  ;;  %1859 = vmatprep.mubr.bf16.mxu0 %v5901_v12  ;;  %v5622_v43 = vpop.permute.xlu0 %5621  ;;  %v5942_v12 = vld [vmem:[%s7582_s3 + $0x19c] ss:$28 sps:$4 sm:$0xff]  }
 0x390   : > { %v1208_v24 = vpack.c.bf16 %v5599_v20, %v5598_v21  ;;  %4750 = vmatpush3.bf16.msra.mxu1 %v1199_v19  ;;  %1940 = vmatprep.mubr.bf16.mxu1 %v5905_v15  ;;  %v5624_v45 = vunpack.i.h.bf16 %v5622_v43  ;;  %v5623_v48 = vunpack.i.l.bf16 %v5622_v43  ;;  %v5945_v14 = vld [vmem:[%s7582_s3 + $0x198] ss:$28 sps:$4 sm:$0xff]   ;;  %v5954_v19 = vld [vmem:[%s7582_s3 + $0x168] ss:$28 sps:$4 sm:$0xff]   ;;  %v5956_v21 = vld [vmem:[%s7582_s3 + $0x1a0] ss:$28 sps:$4 sm:$0xff]  }
 0x391   : > { %v5607_v29 = vpop.permute.xlu1 %5606  ;;  %v5949_v15 = vld [vmem:[%s7582_s3 + $0xf8] ss:$28 sps:$4 sm:$0xff]   ;;  %v5952_v20 = vld [vmem:[%s7582_s3 + $0x20c] ss:$28 sps:$4 sm:$0xff]  }
 0x392   : > { %v5609_v25 = vunpack.i.h.bf16 %v5607_v29  ;;  %v5608_v31 = vunpack.i.l.bf16 %v5607_v29  ;;  %4751 = vmatprep.subr.bf16.mxu1 %v1208_v24  ;;  %v1212_v46 = vpack.c.bf16 %v5624_v45, %v5623_v48  ;;  %v5957_v24 = vld [vmem:[%s7582_s3 + $0x1d8] ss:$28 sps:$4 sm:$0xff]  }
 0x394   : > { %v1209_v28 = vpack.c.bf16 %v5609_v25, %v5608_v31  ;;  %4752 = vmatpush3.bf16.msra.mxu1 %v1200_v26  ;;  %v5958_v26 = vld [vmem:[%s7582_s3 + $0x210] ss:$28 sps:$4 sm:$0xff]  }
 0x395   : > { %v5617_v27 = vpop.permute.xlu1 %5616 }
 0x396   : > { %v5619_v38 = vunpack.i.h.bf16 %v5617_v27  ;;  %v5618_v41 = vunpack.i.l.bf16 %v5617_v27  ;;  %1860 = vmatmul.mubr.bf16.gmra.mrb[60].mxu0 %v5906_v35  ;;  %5162 = vmatprep.subr.bf16.mxu0 %v1209_v28 }
 0x397   : > { %1941 = vmatmul.mubr.bf16.vlgmr.msra.gmra.mrb[84].mxu1 %v5903_v37  ;;  %5163 = vmatpush3.bf16.msra.mxu0 %v1209_v28  ;;  %v5959_v37 = vld [vmem:[%s7583_s4] sm:$0x1f]  }
 0x398   : > { %5164 = vmatprep.subr.bf16.mxu0 %v1210_v33  ;;  %1867 = vmatprep.mubr.bf16.mxu0 %v5907_v30  ;;  %v1211_v34 = vpack.c.bf16 %v5619_v38, %v5618_v41  ;;  %v2203_v30 = vsel %vm1676_vm6, %v5959_v37, 0 }
 0x399   : > { %1948 = vmatprep.mubr.bf16.mxu1 %v5909_v32  ;;  %v1139_v39 = vpop.permute.xlu1 %1138 }
 0x39a   : > { %v1213_v57 = vpack.c.bf16 %v6229_v55, %v1139_v39 }
 0x39b   : > { %5165 = vmatpush3.bf16.msra.mxu0 %v1210_v33 }
 0x39c   : > { %5166 = vmatprep.subr.bf16.mxu0 %v1211_v34  ;;  %v1680_v61 = vand.u32 %v6803_v58, %v1213_v57 }
 0x39e   : > { %1868 = vmatmul.mubr.bf16.gmra.mrb[64].mxu0 %v5911_v36 }
 0x39f   : > { %1949 = vmatmul.mubr.bf16.gmra.mrb[88].mxu1 %v5912_v50  ;;  %5167 = vmatpush3.bf16.msra.mxu0 %v1211_v34 }
 0x3a0   : > { %5168 = vmatprep.subr.bf16.mxu0 %v1212_v46  ;;  %1875 = vmatprep.mubr.bf16.mxu0 %v5913_v40 }
 0x3a1   : > { %1956 = vmatprep.mubr.bf16.mxu1 %v5915_v42 }
 0x3a3   : > { %5169 = vmatpush3.bf16.msra.mxu0 %v1212_v46 }
 0x3a4   : > { %5170 = vmatprep.subr.bf16.mxu0 %v1680_v61 }
 0x3a6   : > { %1876 = vmatmul.mubr.bf16.gmra.mrb[68].mxu0 %v5917_v47 }
 0x3a7   : > { %1957 = vmatmul.mubr.bf16.gmra.mrb[92].mxu1 %v5918_v49  ;;  %5171 = vmatpush3.bf16.msra.mxu0 %v1680_v61 }
 0x3a8   : > { %1883 = vmatprep.mubr.bf16.mxu0 %v5919_v52  ;;  %1964 = vmatprep.mubr.bf16.mxu1 %v5921_v63 }
 0x3a9   : > { %5316 = vmatprep.subr.msk.bf16.mxu0 %vm1676_vm6, %v5959_v37 }
 0x3ae   : > { %1884 = vmatmul.mubr.bf16.gmra.mrb[72].mxu0 %v5923_v1 }
 0x3af   : > { %1965 = vmatmul.mubr.bf16.gmra.mrb[96].mxu1 %v5924_v54  ;;  %1891 = vmatprep.mubr.bf16.mxu0 %v5925_v56 }
 0x3b0   : > { %1972 = vmatprep.mubr.bf16.mxu1 %v5927_v59 }
 0x3b6   : > { %1892 = vmatmul.mubr.bf16.gmra.mrb[76].mxu0 %v5929_v60 }
 0x3b7   : > { %1973 = vmatmul.mubr.bf16.gmra.mrb[100].mxu1 %v5930_v62  ;;  %1899 = vmatprep.mubr.bf16.mxu0 %v5931_v2 }
 0x3b8   : > { %1980 = vmatprep.mubr.bf16.mxu1 %v5933_v4 }
 0x3be   : > { %1900 = vmatmul.mubr.bf16.gmra.mrb[80].mxu0 %v5935_v6 }
 0x3bf   : > { %1981 = vmatmul.mubr.bf16.gmra.mrb[104].mxu1 %v5936_v7  ;;  %5172 = vmatprep.mubr.msk.bf16.mxu0 %vm1644_vm7, %v5939_v9 }
 0x3c0   : > { %1988 = vmatprep.mubr.bf16.mxu1 %v5937_v11 }
 0x3c6   : > { %5173 = vmatmul.mubr.msk.bf16.vlgmr.msra.gmra.mrb[84].mxu0 %vm1644_vm7, %v5941_v3 }
 0x3c7   : > { %1989 = vmatmul.mubr.bf16.gmra.mrb[108].mxu1 %v5940_v5  ;;  %5176 = vmatprep.mubr.msk.bf16.mxu0 %vm1644_vm7, %v5944_v8 }
 0x3c8   : > { %1996 = vmatprep.mubr.bf16.mxu1 %v5942_v12  ;;  %5193 = vmatpush3.bf16.msra.mxu0 %v2203_v30 }
 0x3ce   : > { %5177 = vmatmul.mubr.msk.bf16.gmra.mrb[88].mxu0 %vm1644_vm7, %v5946_v13 }
 0x3cf   : > { %1997 = vmatmul.mubr.bf16.gmra.mrb[112].mxu1 %v5945_v14  ;;  %5180 = vmatprep.mubr.msk.bf16.mxu0 %vm1644_vm7, %v5949_v15 }
 0x3d0   : > { %2004 = vmatprep.mubr.bf16.mxu1 %v5947_v16 }
 0x3d6   : > { %5181 = vmatmul.mubr.msk.bf16.gmra.mrb[92].mxu0 %vm1644_vm7, %v5951_v17 }
 0x3d7   : > { %2005 = vmatmul.mubr.bf16.gmra.mrb[116].mxu1 %v5950_v18  ;;  %5184 = vmatprep.mubr.msk.bf16.mxu0 %vm1644_vm7, %v5954_v19 }
 0x3d8   : > { %2012 = vmatprep.mubr.bf16.mxu1 %v5952_v20 }
 0x3de   : > { %5185 = vmatmul.mubr.msk.bf16.gmra.mrb[96].mxu0 %vm1644_vm7, %v5956_v21 }
 0x3df   : > { %2013 = vmatmul.mubr.bf16.gmra.mrb[120].mxu1 %v5955_v22  ;;  %5188 = vmatprep.mubr.msk.bf16.mxu0 %vm1644_vm7, %v5957_v24 }
 0x3e6   : > { %5189 = vmatmul.mubr.msk.bf16.gmra.mrb[100].mxu0 %vm1644_vm7, %v5958_v26 }
 0x419   : > { %v4601_v29 = vpop.f32.mrb[44].mxu1 }
 0x41a   : > { %v4602_v23 = vpop.f32.mrb[45].mxu1 }
 0x41b   : > { %v4603_v10 = vadd.f32 %v4602_v23, %v4601_v29  ;;  %v4604_v25 = vpop.f32.mrb[46].mxu1 }
 0x41c   : > { %v4605_v31 = vpop.f32.mrb[47].mxu1 }
 0x41d   : > { %v4606_v35 = vadd.f32 %v4605_v31, %v4604_v25 }
 0x421   : > { %v4607_v28 = vpop.f32.mrb[48].mxu1 }
 0x422   : > { %v4608_v27 = vpop.f32.mrb[49].mxu1 }
 0x423   : > { %v4609_v32 = vadd.f32 %v4608_v27, %v4607_v28  ;;  %v4610_v33 = vpop.f32.mrb[50].mxu1 }
 0x424   : > { %v4611_v38 = vpop.f32.mrb[51].mxu1 }
 0x425   : > { %v4612_v41 = vadd.f32 %v4611_v38, %v4610_v33 }
 0x429   : > { %v4613_v43 = vpop.f32.mrb[52].mxu1 }
 0x42a   : > { %v4614_v45 = vpop.f32.mrb[53].mxu1 }
 0x42b   : > { %v4615_v48 = vadd.f32 %v4614_v45, %v4613_v43  ;;  %v4616_v34 = vpop.f32.mrb[54].mxu1 }
 0x42c   : > { %v4617_v36 = vpop.f32.mrb[55].mxu1 }
 0x42d   : > { %v4618_v39 = vadd.f32 %v4617_v36, %v4616_v34 }
 0x431   : > { %v4619_v50 = vpop.f32.mrb[56].mxu1 }
 0x432   : > { %v4620_v51 = vpop.f32.mrb[57].mxu1 }
 0x433   : > { %v6917_v53 = vadd.f32 %v4620_v51, %v4619_v50  ;;  %v4622_v40 = vpop.f32.mrb[58].mxu1 }
 0x434   : > { %v4623_v42 = vpop.f32.mrb[59].mxu1 }
 0x435   : > { %v6919_v46 = vadd.f32 %v4623_v42, %v4622_v40 }
 0x439   : > { %v4625_v57 = vpop.f32.mrb[60].mxu1 }
 0x43a   : > { %v4626_v61 = vpop.f32.mrb[61].mxu1 }
 0x43b   : > { %v6921_v47 = vadd.f32 %v4626_v61, %v4625_v57  ;;  %v4628_v49 = vpop.f32.mrb[62].mxu1 }
 0x43c   : > { %v4629_v52 = vpop.f32.mrb[63].mxu1 }
 0x43d   : > { %v6923_v63 = vadd.f32 %v4629_v52, %v4628_v49 }
 0x441   : > { %v4631_v1 = vpop.f32.mrb[64].mxu1 }
 0x442   : > { %v4632_v54 = vpop.f32.mrb[65].mxu1 }
 0x443   : > { %v6925_v56 = vadd.f32 %v4632_v54, %v4631_v1  ;;  %v4634_v59 = vpop.f32.mrb[66].mxu1 }
 0x444   : > { %v4635_v60 = vpop.f32.mrb[67].mxu1 }
 0x445   : > { %v6927_v62 = vadd.f32 %v4635_v60, %v4634_v59 }
 0x449   : > { %v4677_v2 = vpop.f32.mrb[44].mxu0  ;;  %v4637_v4 = vpop.f32.mrb[68].mxu1 }
 0x44a   : > { %v4678_v6 = vpop.f32.mrb[45].mxu0  ;;  %v4638_v7 = vpop.f32.mrb[69].mxu1 }
 0x44b   : > { %v4679_v9 = vadd.f32 %v4678_v6, %v4677_v2  ;;  %v4680_v11 = vpop.f32.mrb[46].mxu0  ;;  %v6929_v3 = vadd.f32 %v4638_v7, %v4637_v4  ;;  %v4640_v5 = vpop.f32.mrb[70].mxu1 }
 0x44c   : > { %v4681_v8 = vpop.f32.mrb[47].mxu0  ;;  %v4641_v12 = vpop.f32.mrb[71].mxu1 }
 0x44d   : > { %v1830_v13 = vadd.f32 %v4679_v9, %v4603_v10  ;;  %v4682_v14 = vadd.f32 %v4681_v8, %v4680_v11  ;;  %v6931_v15 = vadd.f32 %v4641_v12, %v4640_v5 }
 0x44f   : > { %v1833_v16 = vadd.f32 %v4682_v14, %v4606_v35 }
 0x451   : > { %v4683_v17 = vpop.f32.mrb[48].mxu0  ;;  %v4643_v18 = vpop.f32.mrb[72].mxu1 }
 0x452   : > { %v4684_v19 = vpop.f32.mrb[49].mxu0  ;;  %v4644_v20 = vpop.f32.mrb[73].mxu1 }
 0x453   : > { %v4685_v21 = vadd.f32 %v4684_v19, %v4683_v17  ;;  %v4686_v22 = vpop.f32.mrb[50].mxu0  ;;  %v6933_v24 = vadd.f32 %v4644_v20, %v4643_v18  ;;  %v4646_v26 = vpop.f32.mrb[74].mxu1 }
 0x454   : > { %v4687_v29 = vpop.f32.mrb[51].mxu0  ;;  %v4647_v23 = vpop.f32.mrb[75].mxu1 }
 0x455   : > { %v1838_v25 = vadd.f32 %v4685_v21, %v4609_v32  ;;  %v4688_v31 = vadd.f32 %v4687_v29, %v4686_v22  ;;  %v6935_v37 = vadd.f32 %v4647_v23, %v4646_v26 }
 0x457   : > { %v1841_v10 = vadd.f32 %v4688_v31, %v4612_v41 }
 0x459   : > { %v4689_v28 = vpop.f32.mrb[52].mxu0  ;;  %v4649_v30 = vpop.f32.mrb[76].mxu1 }
 0x45a   : > { %v4690_v27 = vpop.f32.mrb[53].mxu0  ;;  %v4650_v35 = vpop.f32.mrb[77].mxu1 }
 0x45b   : > { %v4691_v33 = vadd.f32 %v4690_v27, %v4689_v28  ;;  %v4692_v38 = vpop.f32.mrb[54].mxu0  ;;  %v6937_v43 = vadd.f32 %v4650_v35, %v4649_v30  ;;  %v4652_v45 = vpop.f32.mrb[78].mxu1 }
 0x45c   : > { %v4693_v34 = vpop.f32.mrb[55].mxu0  ;;  %v4653_v36 = vpop.f32.mrb[79].mxu1 }
 0x45d   : > { %v6939_v50 = vadd.f32 %v4691_v33, %v4615_v48  ;;  %v4694_v51 = vadd.f32 %v4693_v34, %v4692_v38  ;;  %v6941_v40 = vadd.f32 %v4653_v36, %v4652_v45 }
 0x45f   : > { %v1849_v32 = vadd.f32 %v4694_v51, %v4618_v39 }
 0x461   : > { %v4695_v42 = vpop.f32.mrb[56].mxu0  ;;  %v4655_v57 = vpop.f32.mrb[80].mxu1 }
 0x462   : > { %v4696_v41 = vpop.f32.mrb[57].mxu0  ;;  %v4656_v61 = vpop.f32.mrb[81].mxu1 }
 0x463   : > { %v4697_v49 = vadd.f32 %v4696_v41, %v4695_v42  ;;  %v4698_v52 = vpop.f32.mrb[58].mxu0  ;;  %v6943_v1 = vadd.f32 %v4656_v61, %v4655_v57  ;;  %v4658_v54 = vpop.f32.mrb[82].mxu1 }
 0x464   : > { %v4699_v59 = vpop.f32.mrb[59].mxu0  ;;  %v4659_v60 = vpop.f32.mrb[83].mxu1 }
 0x465   : > { %v6946_v2 = vadd.f32 %v4697_v49, %v6917_v53  ;;  %v4700_v48 = vadd.f32 %v4699_v59, %v4698_v52  ;;  %v6948_v4 = vadd.f32 %v4659_v60, %v4658_v54 }
 0x467   : > { %v6951_v6 = vadd.f32 %v4700_v48, %v6919_v46 }
 0x469   : > { %v4701_v39 = vpop.f32.mrb[60].mxu0 }
 0x46a   : > { %v4753_v7 = vpop.f32.mrb[84].mxu1  ;;  %v4702_v9 = vpop.f32.mrb[61].mxu0 }
 0x46b   : > { %v4703_v11 = vadd.f32 %v4702_v9, %v4701_v39  ;;  %v4754_v5 = vpop.f32.mrb[85].mxu1  ;;  %v4704_v8 = vpop.f32.mrb[62].mxu0 }
 0x46c   : > { %v4755_v12 = vadd.f32 %v4754_v5, %v4753_v7  ;;  %v4756_v14 = vpop.f32.mrb[86].mxu1  ;;  %v4705_v17 = vpop.f32.mrb[63].mxu0 }
 0x46d   : > { %v6954_v18 = vadd.f32 %v4703_v11, %v6921_v47  ;;  %v4706_v53 = vadd.f32 %v4705_v17, %v4704_v8  ;;  %v4757_v19 = vpop.f32.mrb[87].mxu1 }
 0x46e   : > { %v4758_v20 = vadd.f32 %v4757_v19, %v4756_v14  ;;  %v6956_v21 = vadd.f32 %v4755_v12, %v1830_v13 }
 0x46f   : > { %v6959_v46 = vadd.f32 %v4706_v53, %v6923_v63 }
 0x470   : > { %v6961_v22 = vadd.f32 %v4758_v20, %v1833_v16 }
 0x471   : > { %v4707_v26 = vpop.f32.mrb[64].mxu0 }
 0x472   : > { %v4759_v29 = vpop.f32.mrb[88].mxu1  ;;  %v4708_v23 = vpop.f32.mrb[65].mxu0 }
 0x473   : > { %v4709_v31 = vadd.f32 %v4708_v23, %v4707_v26  ;;  %v4760_v28 = vpop.f32.mrb[89].mxu1  ;;  %v4710_v30 = vpop.f32.mrb[66].mxu0 }
 0x474   : > { %v4761_v27 = vadd.f32 %v4760_v28, %v4759_v29  ;;  %v4762_v35 = vpop.f32.mrb[90].mxu1  ;;  %v4711_v47 = vpop.f32.mrb[67].mxu0 }
 0x475   : > { %v6964_v33 = vadd.f32 %v4709_v31, %v6925_v56  ;;  %v4712_v38 = vadd.f32 %v4711_v47, %v4710_v30  ;;  %v4763_v13 = vpop.f32.mrb[91].mxu1 }
 0x476   : > { %v4764_v45 = vadd.f32 %v4763_v13, %v4762_v35  ;;  %v6966_v34 = vadd.f32 %v4761_v27, %v1838_v25 }
 0x477   : > { %v6969_v63 = vadd.f32 %v4712_v38, %v6927_v62 }
 0x478   : > { %v6971_v16 = vadd.f32 %v4764_v45, %v1841_v10 }
 0x479   : > { %v4713_v36 = vpop.f32.mrb[68].mxu0 }
 0x47a   : > { %v4765_v51 = vpop.f32.mrb[92].mxu1  ;;  %v4714_v42 = vpop.f32.mrb[69].mxu0 }
 0x47b   : > { %v4715_v57 = vadd.f32 %v4714_v42, %v4713_v36  ;;  %v4766_v41 = vpop.f32.mrb[93].mxu1  ;;  %v4716_v61 = vpop.f32.mrb[70].mxu0 }
 0x47c   : > { %v4767_v49 = vadd.f32 %v4766_v41, %v4765_v51  ;;  %v4768_v52 = vpop.f32.mrb[94].mxu1  ;;  %v4717_v56 = vpop.f32.mrb[71].mxu0 }
 0x47d   : > { %v6974_v54 = vadd.f32 %v4715_v57, %v6929_v3  ;;  %v4718_v59 = vadd.f32 %v4717_v56, %v4716_v61  ;;  %v4769_v25 = vpop.f32.mrb[95].mxu1 }
 0x47e   : > { %v4770_v60 = vadd.f32 %v4769_v25, %v4768_v52  ;;  %v6977_v62 = vadd.f32 %v4767_v49, %v6939_v50 }
 0x47f   : > { %v6980_v10 = vadd.f32 %v4718_v59, %v6931_v15 }
 0x480   : > { %v6982_v48 = vadd.f32 %v4770_v60, %v1849_v32 }
 0x481   : > { %v4719_v39 = vpop.f32.mrb[72].mxu0 }
 0x482   : > { %v4771_v7 = vpop.f32.mrb[96].mxu1  ;;  %v4720_v9 = vpop.f32.mrb[73].mxu0 }
 0x483   : > { %v4721_v11 = vadd.f32 %v4720_v9, %v4719_v39  ;;  %v4772_v5 = vpop.f32.mrb[97].mxu1  ;;  %v4722_v8 = vpop.f32.mrb[74].mxu0 }
 0x484   : > { %v4773_v12 = vadd.f32 %v4772_v5, %v4771_v7  ;;  %v4774_v3 = vpop.f32.mrb[98].mxu1  ;;  %v4723_v14 = vpop.f32.mrb[75].mxu0 }
 0x485   : > { %v6985_v17 = vadd.f32 %v4721_v11, %v6933_v24  ;;  %v4724_v53 = vadd.f32 %v4723_v14, %v4722_v8  ;;  %v4775_v50 = vpop.f32.mrb[99].mxu1 }
 0x486   : > { %v4776_v19 = vadd.f32 %v4775_v50, %v4774_v3  ;;  %v1967_v15 = vadd.f32 %v4773_v12, %v6946_v2 }
 0x487   : > { %v6989_v32 = vadd.f32 %v4724_v53, %v6935_v37 }
 0x488   : > { %v6992_v20 = vadd.f32 %v4776_v19, %v6951_v6 }
 0x489   : > { %v4725_v26 = vpop.f32.mrb[76].mxu0 }
 0x48a   : > { %v4777_v29 = vpop.f32.mrb[100].mxu1  ;;  %v4726_v23 = vpop.f32.mrb[77].mxu0 }
 0x48b   : > { %v4727_v31 = vadd.f32 %v4726_v23, %v4725_v26  ;;  %v4778_v28 = vpop.f32.mrb[101].mxu1  ;;  %v4728_v30 = vpop.f32.mrb[78].mxu0 }
 0x48c   : > { %v4779_v27 = vadd.f32 %v4778_v28, %v4777_v29  ;;  %v4780_v24 = vpop.f32.mrb[102].mxu1  ;;  %v4729_v35 = vpop.f32.mrb[79].mxu0 }
 0x48d   : > { %v6995_v47 = vadd.f32 %v4727_v31, %v6937_v43  ;;  %v4730_v38 = vadd.f32 %v4729_v35, %v4728_v30  ;;  %v4781_v2 = vpop.f32.mrb[103].mxu1 }
 0x48e   : > { %v4782_v13 = vadd.f32 %v4781_v2, %v4780_v24  ;;  %v6998_v37 = vadd.f32 %v4779_v27, %v6954_v18 }
 0x48f   : > { %v7001_v6 = vadd.f32 %v4730_v38, %v6941_v40 }
 0x490   : > { %v7004_v45 = vadd.f32 %v4782_v13, %v6959_v46 }
 0x491   : > { %v4731_v36 = vpop.f32.mrb[80].mxu0 }
 0x492   : > { %v4783_v51 = vpop.f32.mrb[104].mxu1  ;;  %v4732_v42 = vpop.f32.mrb[81].mxu0 }
 0x493   : > { %v4733_v57 = vadd.f32 %v4732_v42, %v4731_v36  ;;  %v4784_v41 = vpop.f32.mrb[105].mxu1  ;;  %v4734_v61 = vpop.f32.mrb[82].mxu0 }
 0x494   : > { %v4785_v43 = vadd.f32 %v4784_v41, %v4783_v51  ;;  %v4786_v49 = vpop.f32.mrb[106].mxu1  ;;  %v4735_v52 = vpop.f32.mrb[83].mxu0 }
 0x495   : > { %v7007_v56 = vadd.f32 %v4733_v57, %v6943_v1  ;;  %v4736_v18 = vadd.f32 %v4735_v52, %v4734_v61  ;;  %v4787_v59 = vpop.f32.mrb[107].mxu1 }
 0x496   : > { %v4788_v25 = vadd.f32 %v4787_v59, %v4786_v49  ;;  %v1983_v40 = vadd.f32 %v4785_v43, %v6964_v33 }
 0x497   : > { %v7011_v46 = vadd.f32 %v4736_v18, %v6948_v4 }
 0x498   : > { %v1986_v60 = vadd.f32 %v4788_v25, %v6969_v63 }
 0x499   : > { %v5174_v39 = vpop.f32.mrb[84].mxu0 }
 0x49a   : > { %v4789_v7 = vpop.f32.mrb[108].mxu1  ;;  %v2064_v9 = vadd.f32 %v5174_v39, %v6966_v34  ;;  %v2055_v11 = vpop.f32.mrb[85].mxu0 }
 0x49b   : > { %v4790_v5 = vpop.f32.mrb[109].mxu1  ;;  %v2056_v8 = vadd.f32 %v2055_v11, %v6956_v21  ;;  %v5175_v1 = vpop.f32.mrb[86].mxu0 }
 0x49c   : > { %v4791_v12 = vadd.f32 %v4790_v5, %v4789_v7  ;;  %v4792_v3 = vpop.f32.mrb[110].mxu1  ;;  %v2067_v14 = vadd.f32 %v5175_v1, %v6971_v16  ;;  %v2058_v53 = vpop.f32.mrb[87].mxu0  ;;  %v2136_v50 = vmax.f32 %v2064_v9, 0.0 }
 0x49d   : > { %v4793_v33 = vpop.f32.mrb[111].mxu1  ;;  %v2059_v4 = vadd.f32 %v2058_v53, %v6961_v22  ;;  %v2134_v29 = vmax.f32 %v2056_v8, 0.0 }
 0x49e   : > { %v2137_v19 = vmax.f32 %v2067_v14, 0.0  ;;  %v4794_v63 = vadd.f32 %v4793_v33, %v4792_v3  ;;  %v1991_v26 = vadd.f32 %v4791_v12, %v6974_v54 }
 0x49f   : > { %v2135_v34 = vmax.f32 %v2059_v4, 0.0 }
 0x4a0   : > { %v2155_v23 = vpack.c.bf16 %v2137_v19, %v2136_v50  ;;  %v7020_v21 = vadd.f32 %v4794_v63, %v6980_v10 }
 0x4a1   : > { %v2154_v31 = vpack.c.bf16 %v2135_v34, %v2134_v29  ;;  %v5178_v28 = vpop.f32.mrb[88].mxu0 }
 0x4a2   : > { %v4795_v30 = vpop.f32.mrb[112].mxu1  ;;  %v2080_v16 = vadd.f32 %v5178_v28, %v1967_v15  ;;  %v2071_v27 = vpop.f32.mrb[89].mxu0 }
 0x4a3   : > { %v4796_v24 = vpop.f32.mrb[113].mxu1  ;;  %v2072_v22 = vadd.f32 %v2071_v27, %v6977_v62  ;;  %v5179_v35 = vpop.f32.mrb[90].mxu0  ;;  %5194 = vmatprep.mubr.msk.bf16.mxu0 %vm2171_vm8, %v2154_v31 }
 0x4a4   : > { %v4797_v38 = vadd.f32 %v4796_v24, %v4795_v30  ;;  %v4798_v54 = vpop.f32.mrb[114].mxu1  ;;  %v2083_v2 = vadd.f32 %v5179_v35, %v6992_v20  ;;  %v2074_v13 = vpop.f32.mrb[91].mxu0  ;;  %5195 = vmatmul.mubr.msk.bf16.vlgmr.msra.gmra.mrb[104].mxu0 %vm2171_vm8, %v2155_v23  ;;  %v2140_v51 = vmax.f32 %v2080_v16, 0.0 }
 0x4a5   : > { %v4799_v10 = vpop.f32.mrb[115].mxu1  ;;  %v2075_v36 = vadd.f32 %v2074_v13, %v6982_v48  ;;  %v2138_v41 = vmax.f32 %v2072_v22, 0.0 }
 0x4a6   : > { %v2141_v42 = vmax.f32 %v2083_v2, 0.0  ;;  %v4800_v15 = vadd.f32 %v4799_v10, %v4798_v54  ;;  %v1999_v57 = vadd.f32 %v4797_v38, %v6985_v17 }
 0x4a7   : > { %v2139_v62 = vmax.f32 %v2075_v36, 0.0 }
 0x4a8   : > { %v2157_v61 = vpack.c.bf16 %v2141_v42, %v2140_v51  ;;  %v2002_v43 = vadd.f32 %v4800_v15, %v6989_v32 }
 0x4a9   : > { %v2156_v49 = vpack.c.bf16 %v2139_v62, %v2138_v41  ;;  %v5182_v52 = vpop.f32.mrb[92].mxu0 }
 0x4aa   : > { %v4801_v18 = vpop.f32.mrb[116].mxu1  ;;  %v2096_v20 = vadd.f32 %v5182_v52, %v1983_v40  ;;  %v2087_v59 = vpop.f32.mrb[93].mxu0 }
 0x4ab   : > { %v4802_v25 = vpop.f32.mrb[117].mxu1  ;;  %v2088_v39 = vadd.f32 %v2087_v59, %v6998_v37  ;;  %v5183_v7 = vpop.f32.mrb[94].mxu0  ;;  %5198 = vmatprep.mubr.msk.bf16.mxu0 %vm2171_vm8, %v2156_v49 }
 0x4ac   : > { %v4803_v48 = vadd.f32 %v4802_v25, %v4801_v18  ;;  %v4804_v9 = vpop.f32.mrb[118].mxu1  ;;  %v2099_v11 = vadd.f32 %v5183_v7, %v1986_v60  ;;  %v2090_v17 = vpop.f32.mrb[95].mxu0  ;;  %5199 = vmatmul.mubr.msk.bf16.gmra.mrb[108].mxu0 %vm2171_vm8, %v2157_v61  ;;  %v2144_v8 = vmax.f32 %v2096_v20, 0.0 }
 0x4ad   : > { %v4805_v5 = vpop.f32.mrb[119].mxu1  ;;  %v2091_v32 = vadd.f32 %v2090_v17, %v7004_v45  ;;  %v2142_v3 = vmax.f32 %v2088_v39, 0.0 }
 0x4ae   : > { %v2145_v1 = vmax.f32 %v2099_v11, 0.0  ;;  %v4806_v12 = vadd.f32 %v4805_v5, %v4804_v9  ;;  %v2007_v40 = vadd.f32 %v4803_v48, %v6995_v47 }
 0x4af   : > { %v2143_v14 = vmax.f32 %v2091_v32, 0.0 }
 0x4b0   : > { %v2159_v37 = vpack.c.bf16 %v2145_v1, %v2144_v8  ;;  %v2010_v53 = vadd.f32 %v4806_v12, %v7001_v6 }
 0x4b1   : > { %v2158_v33 = vpack.c.bf16 %v2143_v14, %v2142_v3  ;;  %v5186_v4 = vpop.f32.mrb[96].mxu0 }
 0x4b2   : > { %v4807_v50 = vpop.f32.mrb[120].mxu1  ;;  %v2112_v60 = vadd.f32 %v5186_v4, %v1999_v57  ;;  %v2103_v19 = vpop.f32.mrb[97].mxu0 }
 0x4b3   : > { %v4808_v63 = vpop.f32.mrb[121].mxu1  ;;  %v2104_v29 = vadd.f32 %v2103_v19, %v1991_v26  ;;  %v5187_v34 = vpop.f32.mrb[98].mxu0  ;;  %5202 = vmatprep.mubr.msk.bf16.mxu0 %vm2171_vm8, %v2158_v33 }
 0x4b4   : > { %v4809_v45 = vadd.f32 %v4808_v63, %v4807_v50  ;;  %v4810_v23 = vpop.f32.mrb[122].mxu1  ;;  %v2115_v31 = vadd.f32 %v5187_v34, %v2002_v43  ;;  %v2106_v28 = vpop.f32.mrb[99].mxu0  ;;  %5203 = vmatmul.mubr.msk.bf16.gmra.mrb[112].mxu0 %vm2171_vm8, %v2159_v37  ;;  %v2148_v6 = vmax.f32 %v2112_v60, 0.0 }
 0x4b5   : > { %v4811_v47 = vpop.f32.mrb[123].mxu1  ;;  %v2107_v30 = vadd.f32 %v2106_v28, %v7020_v21  ;;  %v2146_v22 = vmax.f32 %v2104_v29, 0.0 }
 0x4b6   : > { %v2149_v16 = vmax.f32 %v2115_v31, 0.0  ;;  %v4812_v27 = vadd.f32 %v4811_v47, %v4810_v23  ;;  %v2015_v24 = vadd.f32 %v4809_v45, %v7007_v56 }
 0x4b7   : > { %v2147_v35 = vmax.f32 %v2107_v30, 0.0 }
 0x4b8   : > { %v2161_v26 = vpack.c.bf16 %v2149_v16, %v2148_v6  ;;  %v2018_v38 = vadd.f32 %v4812_v27, %v7011_v46  ;;  %v5962_v16 = vld [vmem:[%s7584_s5 + $0x4] ss:$28 sps:$4 sm:$0xff]  }
 0x4b9   : > { %v2160_v54 = vpack.c.bf16 %v2147_v35, %v2146_v22  ;;  %v5190_v2 = vpop.f32.mrb[100].mxu0  ;;  %3013 = vmatprep.mubr.bf16.mxu1 %v5962_v16  ;;  %v5968_v22 = vld [vmem:[%s7584_s5 + $0xc] ss:$28 sps:$4 sm:$0xff]  }
 0x4ba   : > { %v2128_v13 = vadd.f32 %v5190_v2, %v2015_v24  ;;  %v2119_v10 = vpop.f32.mrb[101].mxu0 }
 0x4bb   : > { %v2120_v36 = vadd.f32 %v2119_v10, %v2007_v40  ;;  %v5191_v51 = vpop.f32.mrb[102].mxu0  ;;  %5206 = vmatprep.mubr.msk.bf16.mxu0 %vm2171_vm8, %v2160_v54 }
 0x4bc   : > { %v2131_v42 = vadd.f32 %v5191_v51, %v2018_v38  ;;  %v2122_v21 = vpop.f32.mrb[103].mxu0  ;;  %5207 = vmatmul.mubr.msk.bf16.gmra.mrb[116].mxu0 %vm2171_vm8, %v2161_v26  ;;  %v2152_v57 = vmax.f32 %v2128_v13, 0.0 }
 0x4bd   : > { %v2123_v15 = vadd.f32 %v2122_v21, %v2010_v53  ;;  %v2150_v41 = vmax.f32 %v2120_v36, 0.0 }
 0x4be   : > { %v2153_v56 = vmax.f32 %v2131_v42, 0.0 }
 0x4bf   : > { %v2151_v62 = vmax.f32 %v2123_v15, 0.0 }
 0x4c0   : > { %v2163_v61 = vpack.c.bf16 %v2153_v56, %v2152_v57 }
 0x4c1   : > { %v2162_v43 = vpack.c.bf16 %v2151_v62, %v2150_v41 }
 0x4c3   : > { %5210 = vmatprep.mubr.msk.bf16.mxu0 %vm2171_vm8, %v2162_v43 }
 0x4c4   : > { %5211 = vmatmul.mubr.msk.bf16.gmra.mrb[120].mxu0 %vm2171_vm8, %v2163_v61 }
 0x4c5   : > { %3109 = vmatprep.mubr.bf16.mxu0 %v5968_v22 }
 0x577   : > { %v5196_v46 = vpop.f32.mrb[104].mxu0 }
 0x578   : > { %v2239_v49 = vpop.f32.mrb[105].mxu0 }
 0x579   : > { %v5197_v52 = vpop.f32.mrb[106].mxu0 }
 0x57a   : > { %v2242_v18 = vpop.f32.mrb[107].mxu0  ;;  %v7044_v20 = vpack.i.bf16 %v5197_v52, %v5196_v46  ;;  %v2579_v59 = vpack.c.bf16 %v5197_v52, %v5196_v46 }
 0x57b   : > { %v5630_v25 = vpack.i.bf16 %v2242_v18, %v2239_v49  ;;  %v2578_v39 = vpack.c.bf16 %v2242_v18, %v2239_v49 }
 0x57c   : > { %5626 = vrot.lane.b32.xlu1 %v7044_v20, %s6222_s13 }
 0x57d   : > { %5631 = vrot.lane.b32.xlu0 %v5630_v25, %s6222_s13 }
 0x57f   : > { %v7049_v7 = vpop.f32.mrb[108].mxu0 }
 0x580   : > { %v7051_v48 = vpop.f32.mrb[109].mxu0 }
 0x581   : > { %v7053_v9 = vpop.f32.mrb[110].mxu0 }
 0x582   : > { %v7055_v11 = vpop.f32.mrb[111].mxu0  ;;  %v5635_v17 = vpack.i.bf16 %v7053_v9, %v7049_v7  ;;  %v2581_v8 = vpack.c.bf16 %v7053_v9, %v7049_v7 }
 0x583   : > { %v5640_v5 = vpack.i.bf16 %v7055_v11, %v7051_v48  ;;  %v2580_v32 = vpack.c.bf16 %v7055_v11, %v7051_v48 }
 0x584   : > { %5636 = vrot.lane.b32.xlu1 %v5635_v17, %s6222_s13 }
 0x585   : > { %5641 = vrot.lane.b32.xlu0 %v5640_v5, %s6222_s13 }
 0x587   : > { %v7067_v1 = vpop.f32.mrb[112].mxu0 }
 0x588   : > { %v7069_v12 = vpop.f32.mrb[113].mxu0 }
 0x589   : > { %v7071_v40 = vpop.f32.mrb[114].mxu0 }
 0x58a   : > { %v7073_v3 = vpop.f32.mrb[115].mxu0  ;;  %v5645_v14 = vpack.i.bf16 %v7071_v40, %v7067_v1  ;;  %v2583_v33 = vpack.c.bf16 %v7071_v40, %v7067_v1 }
 0x58b   : > { %v5650_v37 = vpack.i.bf16 %v7073_v3, %v7069_v12  ;;  %v2582_v53 = vpack.c.bf16 %v7073_v3, %v7069_v12 }
 0x58c   : > { %5646 = vrot.lane.b32.xlu1 %v5645_v14, %s6223_s11 }
 0x58d   : > { %5651 = vrot.lane.b32.xlu0 %v5650_v37, %s6223_s11 }
 0x58f   : > { %v7085_v4 = vpop.f32.mrb[116].mxu0 }
 0x590   : > { %v7087_v50 = vpop.f32.mrb[117].mxu0 }
 0x591   : > { %5656 = vrot.lane.b32.xlu0 %v5650_v37, %s6222_s13  ;;  %v7090_v60 = vpop.f32.mrb[118].mxu0 }
 0x592   : > { %v7092_v19 = vpop.f32.mrb[119].mxu0  ;;  %v5660_v63 = vpack.i.bf16 %v7090_v60, %v7085_v4  ;;  %v2585_v45 = vpack.c.bf16 %v7090_v60, %v7085_v4 }
 0x593   : > { %v5665_v29 = vpack.i.bf16 %v7092_v19, %v7087_v50  ;;  %v2584_v34 = vpack.c.bf16 %v7092_v19, %v7087_v50 }
 0x595   : > { %5661 = vrot.lane.b32.xlu0 %v5660_v63, %s6222_s13  ;;  %5666 = vrot.lane.b32.xlu1 %v5665_v29, %s6222_s13 }
 0x597   : > { %v5212_v23 = vpop.f32.mrb[120].mxu0 }
 0x598   : > { %v2303_v31 = vpop.f32.mrb[121].mxu0 }
 0x599   : > { %5676 = vrot.lane.b32.xlu0 %v5665_v29, %s6223_s11  ;;  %5671 = vrot.lane.b32.xlu1 %v5660_v63, %s6223_s11  ;;  %v5213_v28 = vpop.f32.mrb[122].mxu0 }
 0x59a   : > { %v2306_v47 = vpop.f32.mrb[123].mxu0  ;;  %v5680_v30 = vpack.i.bf16 %v5213_v28, %v5212_v23  ;;  %v2587_v6 = vpack.c.bf16 %v5213_v28, %v5212_v23 }
 0x59b   : > { %v5685_v27 = vpack.i.bf16 %v2306_v47, %v2303_v31  ;;  %v2586_v24 = vpack.c.bf16 %v2306_v47, %v2303_v31 }
 0x59d   : > { %5681 = vrot.lane.b32.xlu0 %v5680_v30, %s6222_s13  ;;  %5686 = vrot.lane.b32.xlu1 %v5685_v27, %s6222_s13 }
 0x59e   : > { %4839 = vmatprep.subr.bf16.mxu1 %v2586_v24 }
 0x59f   : > { %4840 = vmatpush3.bf16.msra.mxu1 %v2578_v39 }
 0x5a0   : > { %4841 = vmatprep.subr.bf16.mxu1 %v2587_v6 }
 0x5a1   : > { %5701 = vrot.lane.b32.xlu0 %v5685_v27, %s6223_s11  ;;  %5691 = vrot.lane.b32.xlu1 %v5645_v14, %s6222_s13  ;;  %s7609_s13 = smov 124  }
 0x5a3   : > { %4842 = vmatpush3.bf16.msra.mxu1 %v2579_v59 }
 0x5a5   : > { %5706 = vrot.lane.b32.xlu0 %v5680_v30, %s6223_s11  ;;  %5696 = vrot.lane.b32.xlu1 %v5630_v25, %s6223_s11 }
 0x5a9   : > { %5716 = vrot.lane.b32.xlu0 %v5630_v25, %s6224_s20  ;;  %5711 = vrot.lane.b32.xlu1 %v7044_v20, %s6223_s11 }
 0x5ad   : > { %5726 = vrot.lane.b32.xlu0 %v7044_v20, %s6224_s20  ;;  %5721 = vrot.lane.b32.xlu1 %v5640_v5, %s6223_s11 }
 0x5b1   : > { %5736 = vrot.lane.b32.xlu0 %v5630_v25, %s7609_s13  ;;  %5731 = vrot.lane.b32.xlu1 %v5635_v17, %s6223_s11 }
 0x5b5   : > { %5746 = vrot.lane.b32.xlu0 %v7044_v20, %s7609_s13  ;;  %5741 = vrot.lane.b32.xlu1 %v5640_v5, %s6224_s20 }
 0x5b9   : > { %5756 = vrot.lane.b32.xlu0 %v5640_v5, %s7609_s13  ;;  %5751 = vrot.lane.b32.xlu1 %v5635_v17, %s6224_s20 }
 0x5bd   : > { %5766 = vrot.lane.b32.xlu0 %v5635_v17, %s7609_s13  ;;  %5761 = vrot.lane.b32.xlu1 %v5650_v37, %s6224_s20 }
 0x5c1   : > { %5776 = vrot.lane.b32.xlu0 %v5650_v37, %s7609_s13  ;;  %5771 = vrot.lane.b32.xlu1 %v5645_v14, %s6224_s20 }
 0x5c5   : > { %5786 = vrot.lane.b32.xlu0 %v5645_v14, %s7609_s13  ;;  %5781 = vrot.lane.b32.xlu1 %v5665_v29, %s6224_s20 }
 0x5c9   : > { %5796 = vrot.lane.b32.xlu0 %v5665_v29, %s7609_s13  ;;  %5791 = vrot.lane.b32.xlu1 %v5660_v63, %s6224_s20 }
 0x5cd   : > { %5801 = vrot.lane.b32.xlu0 %v5660_v63, %s7609_s13  ;;  %5806 = vrot.lane.b32.xlu1 %v5685_v27, %s6224_s20 }
 0x5d1   : > { %5816 = vrot.lane.b32.xlu0 %v5685_v27, %s7609_s13  ;;  %5811 = vrot.lane.b32.xlu1 %v5680_v30, %s6224_s20  ;;  %s7534_s20 = scalar_lea.hbm %s7587_s8, %s4568_s15 }
 0x5d5   : > { %5821 = vrot.lane.b32.xlu1 %v5680_v30, %s7609_s13 }
 0x5ee   : > { %v5627_v35 = vpop.permute.xlu1 %5626 }
 0x5ef   : > { %v5632_v26 = vpop.permute.xlu0 %5631  ;;  %v5629_v38 = vunpack.i.h.bf16 %v5627_v35  ;;  %v5628_v54 = vunpack.i.l.bf16 %v5627_v35 }
 0x5f0   : > { %v5634_v2 = vunpack.i.h.bf16 %v5632_v26  ;;  %v5633_v13 = vunpack.i.l.bf16 %v5632_v26 }
 0x5f1   : > { %v2589_v36 = vpack.c.bf16 %v5629_v38, %v5628_v54 }
 0x5f2   : > { %v2588_v10 = vpack.c.bf16 %v5634_v2, %v5633_v13 }
 0x5f4   : > { %4843 = vmatprep.subr.bf16.mxu1 %v2588_v10 }
 0x5f5   : > { %4844 = vmatpush3.bf16.msra.mxu1 %v2580_v32 }
 0x5f6   : > { %v5637_v51 = vpop.permute.xlu1 %5636  ;;  %4845 = vmatprep.subr.bf16.mxu1 %v2589_v36 }
 0x5f7   : > { %v5642_v42 = vpop.permute.xlu0 %5641  ;;  %v5639_v21 = vunpack.i.h.bf16 %v5637_v51  ;;  %v5638_v15 = vunpack.i.l.bf16 %v5637_v51 }
 0x5f8   : > { %v5644_v57 = vunpack.i.h.bf16 %v5642_v42  ;;  %v5643_v56 = vunpack.i.l.bf16 %v5642_v42  ;;  %v5960_v42 = vld [vmem:[%s7584_s5] ss:$28 sps:$4 sm:$0xff]  }
 0x5f9   : > { %4846 = vmatpush3.bf16.msra.mxu1 %v2581_v8  ;;  %v2591_v62 = vpack.c.bf16 %v5639_v21, %v5638_v15  ;;  %v5963_v21 = vld [vmem:[%s7584_s5 + $0x3c] ss:$28 sps:$4 sm:$0xff]  }
 0x5fa   : > { %v2590_v41 = vpack.c.bf16 %v5644_v57, %v5643_v56 }
 0x5fc   : > { %4847 = vmatprep.subr.bf16.mxu1 %v2590_v41 }
 0x5fd   : > { %4848 = vmatpush3.bf16.msra.mxu1 %v2582_v53 }
 0x5fe   : > { %4849 = vmatprep.subr.bf16.mxu1 %v2591_v62  ;;  %v5647_v52 = vpop.permute.xlu1 %5646 }
 0x5ff   : > { %v5652_v61 = vpop.permute.xlu0 %5651  ;;  %v5649_v39 = vunpack.i.h.bf16 %v5647_v52  ;;  %v5648_v7 = vunpack.i.l.bf16 %v5647_v52 }
 0x600   : > { %v5654_v43 = vunpack.i.h.bf16 %v5652_v61  ;;  %v5653_v46 = vunpack.i.l.bf16 %v5652_v61 }
 0x601   : > { %4850 = vmatpush3.bf16.msra.mxu1 %v2583_v33  ;;  %v2603_v1 = vpack.c.bf16 %v5649_v39, %v5648_v7  ;;  %v5969_v39 = vld [vmem:[%s7584_s5 + $0x74] ss:$28 sps:$4 sm:$0xff]  }
 0x602   : > { %v2602_v49 = vpack.c.bf16 %v5654_v43, %v5653_v46 }
 0x603   : > { %v5657_v18 = vpop.permute.xlu0 %5656 }
 0x604   : > { %v5659_v20 = vunpack.i.h.bf16 %v5657_v18  ;;  %v5658_v59 = vunpack.i.l.bf16 %v5657_v18  ;;  %4903 = vmatprep.subr.bf16.mxu0 %v2602_v49 }
 0x606   : > { %v2592_v25 = vpack.c.bf16 %v5659_v20, %v5658_v59 }
 0x607   : > { %v5662_v48 = vpop.permute.xlu0 %5661  ;;  %v5667_v9 = vpop.permute.xlu1 %5666 }
 0x608   : > { %v5669_v11 = vunpack.i.h.bf16 %v5667_v9  ;;  %v5668_v17 = vunpack.i.l.bf16 %v5667_v9  ;;  %4851 = vmatprep.subr.bf16.mxu1 %v2592_v25  ;;  %v5664_v5 = vunpack.i.h.bf16 %v5662_v48  ;;  %v5663_v32 = vunpack.i.l.bf16 %v5662_v48  ;;  %v5965_v25 = vld [vmem:[%s7584_s5 + $0x38] ss:$28 sps:$4 sm:$0xff]  }
 0x609   : > { %4852 = vmatpush3.bf16.msra.mxu1 %v2584_v34 }
 0x60a   : > { %v2594_v8 = vpack.c.bf16 %v5669_v11, %v5668_v17  ;;  %v2595_v37 = vpack.c.bf16 %v5664_v5, %v5663_v32 }
 0x60b   : > { %v5677_v12 = vpop.permute.xlu0 %5676  ;;  %v5672_v40 = vpop.permute.xlu1 %5671 }
 0x60c   : > { %v5679_v3 = vunpack.i.h.bf16 %v5677_v12  ;;  %v5678_v14 = vunpack.i.l.bf16 %v5677_v12  ;;  %4904 = vmatpush3.bf16.msra.mxu0 %v2594_v8  ;;  %v5674_v33 = vunpack.i.h.bf16 %v5672_v40  ;;  %v5673_v63 = vunpack.i.l.bf16 %v5672_v40 }
 0x60d   : > { %4905 = vmatprep.subr.bf16.mxu0 %v2603_v1 }
 0x60e   : > { %v2604_v53 = vpack.c.bf16 %v5679_v3, %v5678_v14  ;;  %v2605_v47 = vpack.c.bf16 %v5674_v33, %v5673_v63  ;;  %v5966_v14 = vld [vmem:[%s7584_s5 + $0x8] ss:$28 sps:$4 sm:$0xff]  }
 0x60f   : > { %v5682_v29 = vpop.permute.xlu0 %5681  ;;  %v5687_v23 = vpop.permute.xlu1 %5686 }
 0x610   : > { %v5689_v31 = vunpack.i.h.bf16 %v5687_v23  ;;  %v5688_v28 = vunpack.i.l.bf16 %v5687_v23  ;;  %4906 = vmatpush3.bf16.msra.mxu0 %v2595_v37  ;;  %v5684_v50 = vunpack.i.h.bf16 %v5682_v29  ;;  %v5683_v19 = vunpack.i.l.bf16 %v5682_v29  ;;  %v5971_v29 = vld [vmem:[%s7584_s5 + $0x70] ss:$28 sps:$4 sm:$0xff]  }
 0x611   : > { %4907 = vmatprep.subr.bf16.mxu0 %v2604_v53 }
 0x612   : > { %v2596_v34 = vpack.c.bf16 %v5689_v31, %v5688_v28  ;;  %v2597_v35 = vpack.c.bf16 %v5684_v50, %v5683_v19  ;;  %v5972_v28 = vld [vmem:[%s7584_s5 + $0x44] ss:$28 sps:$4 sm:$0xff]  }
 0x613   : > { %v5702_v30 = vpop.permute.xlu0 %5701  ;;  %v5692_v6 = vpop.permute.xlu1 %5691 }
 0x614   : > { %v5704_v16 = vunpack.i.h.bf16 %v5702_v30  ;;  %v5703_v27 = vunpack.i.l.bf16 %v5702_v30  ;;  %v5694_v24 = vunpack.i.h.bf16 %v5692_v6  ;;  %v5693_v22 = vunpack.i.l.bf16 %v5692_v6  ;;  %4908 = vmatpush3.bf16.msra.mxu0 %v2596_v34  ;;  %v5974_v34 = vld [vmem:[%s7584_s5 + $0xac] ss:$28 sps:$4 sm:$0xff]  }
 0x615   : > { %4909 = vmatprep.subr.bf16.mxu0 %v2605_v47 }
 0x616   : > { %v2606_v26 = vpack.c.bf16 %v5704_v16, %v5703_v27  ;;  %v2593_v38 = vpack.c.bf16 %v5694_v24, %v5693_v22 }
 0x617   : > { %v5707_v54 = vpop.permute.xlu0 %5706  ;;  %v5697_v2 = vpop.permute.xlu1 %5696 }
 0x618   : > { %v5709_v13 = vunpack.i.h.bf16 %v5707_v54  ;;  %v5708_v10 = vunpack.i.l.bf16 %v5707_v54  ;;  %v5699_v36 = vunpack.i.h.bf16 %v5697_v2  ;;  %v5698_v51 = vunpack.i.l.bf16 %v5697_v2  ;;  %4853 = vmatprep.subr.bf16.mxu1 %v2593_v38  ;;  %4910 = vmatpush3.bf16.msra.mxu0 %v2597_v35 }
 0x619   : > { %4854 = vmatpush3.bf16.msra.mxu1 %v2585_v45  ;;  %4911 = vmatprep.subr.bf16.mxu0 %v2606_v26  ;;  %v5976_v26 = vld [vmem:[%s7584_s5 + $0x40] ss:$28 sps:$4 sm:$0xff]  }
 0x61a   : > { %v2607_v15 = vpack.c.bf16 %v5709_v13, %v5708_v10  ;;  %v2598_v57 = vpack.c.bf16 %v5699_v36, %v5698_v51  ;;  %v5977_v10 = vld [vmem:[%s7584_s5 + $0xa8] ss:$28 sps:$4 sm:$0xff]  }
 0x61b   : > { %v5717_v56 = vpop.permute.xlu0 %5716  ;;  %v5712_v41 = vpop.permute.xlu1 %5711 }
 0x61c   : > { %v5719_v62 = vunpack.i.h.bf16 %v5717_v56  ;;  %v5718_v61 = vunpack.i.l.bf16 %v5717_v56  ;;  %v5714_v43 = vunpack.i.h.bf16 %v5712_v41  ;;  %v5713_v46 = vunpack.i.l.bf16 %v5712_v41  ;;  %3014 = vmatmul.mubr.bf16.vlgmr.msra.gmra.mrb[124].mxu1 %v5960_v42  ;;  %4912 = vmatpush3.bf16.msra.mxu0 %v2598_v57  ;;  %v5978_v42 = vld [vmem:[%s7584_s5 + $0x7c] ss:$28 sps:$4 sm:$0xff]   ;;  %v5980_v57 = vld [vmem:[%s7584_s5 + $0xe4] ss:$28 sps:$4 sm:$0xff]  }
 0x61d   : > { %4913 = vmatprep.subr.bf16.mxu0 %v2607_v15  ;;  %3021 = vmatprep.mubr.bf16.mxu1 %v5963_v21 }
 0x61e   : > { %v2608_v49 = vpack.c.bf16 %v5719_v62, %v5718_v61  ;;  %v2599_v4 = vpack.c.bf16 %v5714_v43, %v5713_v46 }
 0x61f   : > { %v5727_v60 = vpop.permute.xlu0 %5726  ;;  %v5722_v45 = vpop.permute.xlu1 %5721 }
 0x620   : > { %v5729_v52 = vunpack.i.h.bf16 %v5727_v60  ;;  %v5728_v18 = vunpack.i.l.bf16 %v5727_v60  ;;  %v5724_v20 = vunpack.i.h.bf16 %v5722_v45  ;;  %v5723_v59 = vunpack.i.l.bf16 %v5722_v45  ;;  %4914 = vmatpush3.bf16.msra.mxu0 %v2599_v4  ;;  %v5982_v60 = vld [vmem:[%s7584_s5 + $0x78] ss:$28 sps:$4 sm:$0xff]  }
 0x621   : > { %4915 = vmatprep.subr.bf16.mxu0 %v2608_v49 }
 0x622   : > { %v2609_v7 = vpack.c.bf16 %v5729_v52, %v5728_v18  ;;  %v2600_v48 = vpack.c.bf16 %v5724_v20, %v5723_v59  ;;  %v5983_v59 = vld [vmem:[%s7584_s5 + $0xe0] ss:$28 sps:$4 sm:$0xff]  }
 0x623   : > { %v5737_v9 = vpop.permute.xlu0 %5736  ;;  %v5732_v11 = vpop.permute.xlu1 %5731 }
 0x624   : > { %v5739_v17 = vunpack.i.h.bf16 %v5737_v9  ;;  %v5738_v5 = vunpack.i.l.bf16 %v5737_v9  ;;  %v5734_v32 = vunpack.i.h.bf16 %v5732_v11  ;;  %v5733_v8 = vunpack.i.l.bf16 %v5732_v11  ;;  %3022 = vmatmul.mubr.bf16.gmra.mrb[128].mxu1 %v5965_v25  ;;  %4916 = vmatpush3.bf16.msra.mxu0 %v2600_v48  ;;  %v5986_v11 = vld [vmem:[%s7584_s5 + $0x11c] ss:$28 sps:$4 sm:$0xff]  }
 0x625   : > { %4917 = vmatprep.subr.bf16.mxu0 %v2609_v7  ;;  %3029 = vmatprep.mubr.bf16.mxu1 %v5969_v39  ;;  %v5984_v7 = vld [vmem:[%s7584_s5 + $0xb4] ss:$28 sps:$4 sm:$0xff]  }
 0x626   : > { %v2618_v1 = vpack.c.bf16 %v5739_v17, %v5738_v5  ;;  %v2601_v12 = vpack.c.bf16 %v5734_v32, %v5733_v8 }
 0x627   : > { %v5747_v40 = vpop.permute.xlu0 %5746  ;;  %v5742_v3 = vpop.permute.xlu1 %5741 }
 0x628   : > { %v5749_v37 = vunpack.i.h.bf16 %v5747_v40  ;;  %v5748_v53 = vunpack.i.l.bf16 %v5747_v40  ;;  %v5744_v33 = vunpack.i.h.bf16 %v5742_v3  ;;  %v5743_v63 = vunpack.i.l.bf16 %v5742_v3  ;;  %4918 = vmatpush3.bf16.msra.mxu0 %v2601_v12  ;;  %5300 = vmatprep.subr.bf16.mxu1 %v2618_v1 }
 0x629   : > { %4967 = vmatprep.subr.bf16.mxu0 %v2618_v1 }
 0x62a   : > { %v2619_v23 = vpack.c.bf16 %v5749_v37, %v5748_v53  ;;  %v2610_v31 = vpack.c.bf16 %v5744_v33, %v5743_v63 }
 0x62b   : > { %v5757_v50 = vpop.permute.xlu0 %5756  ;;  %v5752_v19 = vpop.permute.xlu1 %5751  ;;  %3110 = vmatmul.mubr.bf16.vlgmr.msra.gmra.mrb[124].mxu0 %v5966_v14  ;;  %v5988_v14 = vld [vmem:[%s7584_s5 + $0xb0] ss:$28 sps:$4 sm:$0xff]  }
 0x62c   : > { %v5759_v47 = vunpack.i.h.bf16 %v5757_v50  ;;  %v5758_v30 = vunpack.i.l.bf16 %v5757_v50  ;;  %v5754_v6 = vunpack.i.h.bf16 %v5752_v19  ;;  %v5753_v16 = vunpack.i.l.bf16 %v5752_v19  ;;  %3030 = vmatmul.mubr.bf16.gmra.mrb[132].mxu1 %v5971_v29  ;;  %4968 = vmatpush3.bf16.msra.mxu0 %v2610_v31  ;;  %v5989_v29 = vld [vmem:[%s7584_s5 + $0x118] ss:$28 sps:$4 sm:$0xff]  }
 0x62d   : > { %5308 = vmatpush3.bf16.msra.mxu1 %v2610_v31  ;;  %4969 = vmatprep.subr.bf16.mxu0 %v2619_v23 }
 0x62e   : > { %v2620_v27 = vpack.c.bf16 %v5759_v47, %v5758_v30  ;;  %v2611_v24 = vpack.c.bf16 %v5754_v6, %v5753_v16  ;;  %5301 = vmatprep.subr.bf16.mxu1 %v2619_v23  ;;  %3117 = vmatprep.mubr.bf16.mxu0 %v5972_v28  ;;  %v5990_v28 = vld [vmem:[%s7584_s5 + $0xec] ss:$28 sps:$4 sm:$0xff]  }
 0x62f   : > { %v5767_v22 = vpop.permute.xlu0 %5766  ;;  %v5762_v35 = vpop.permute.xlu1 %5761  ;;  %3037 = vmatprep.mubr.bf16.mxu1 %v5974_v34  ;;  %v5992_v34 = vld [vmem:[%s7584_s5 + $0x154] ss:$28 sps:$4 sm:$0xff]  }
 0x630   : > { %v5769_v38 = vunpack.i.h.bf16 %v5767_v22  ;;  %v5768_v54 = vunpack.i.l.bf16 %v5767_v22  ;;  %v5764_v2 = vunpack.i.h.bf16 %v5762_v35  ;;  %v5763_v13 = vunpack.i.l.bf16 %v5762_v35  ;;  %4970 = vmatpush3.bf16.msra.mxu0 %v2611_v24  ;;  %v2684_v22 = vld [vmem:[%s7584_s5 + $0x188] sm:$0xff] }
 0x631   : > { %5309 = vmatpush3.bf16.msra.mxu1 %v2611_v24  ;;  %4971 = vmatprep.subr.bf16.mxu0 %v2620_v27  ;;  %v5994_v35 = vld [vmem:[%s7584_s5 + $0xe8] ss:$28 sps:$4 sm:$0xff]  }
 0x632   : > { %v2621_v36 = vpack.c.bf16 %v5769_v38, %v5768_v54  ;;  %v2612_v51 = vpack.c.bf16 %v5764_v2, %v5763_v13  ;;  %5302 = vmatprep.subr.bf16.mxu1 %v2620_v27  ;;  %v5996_v38 = vld [vmem:[%s7584_s5 + $0x124] ss:$28 sps:$4 sm:$0xff]   ;;  %v4486_v54 = vcombine.high %v2684_v22, %v2684_v22  ;;  %v4485_v13 = vcombine.low %v2684_v22, %v2684_v22 }
 0x633   : > { %v5777_v21 = vpop.permute.xlu0 %5776  ;;  %v5772_v15 = vpop.permute.xlu1 %5771  ;;  %3118 = vmatmul.mubr.bf16.gmra.mrb[128].mxu0 %v5976_v26  ;;  %v5995_v26 = vld [vmem:[%s7584_s5 + $0x150] ss:$28 sps:$4 sm:$0xff]   ;;  %v5999_v2 = vld [vmem:[%s7584_s5 + $0x120] ss:$28 sps:$4 sm:$0xff]  }
 0x634   : > { %v5779_v56 = vunpack.i.h.bf16 %v5777_v21  ;;  %v5778_v41 = vunpack.i.l.bf16 %v5777_v21  ;;  %v5774_v62 = vunpack.i.h.bf16 %v5772_v15  ;;  %v5773_v61 = vunpack.i.l.bf16 %v5772_v15  ;;  %3038 = vmatmul.mubr.bf16.gmra.mrb[136].mxu1 %v5977_v10  ;;  %4972 = vmatpush3.bf16.msra.mxu0 %v2612_v51  ;;  %v6001_v10 = vld [vmem:[%s7584_s5 + $0x15c] ss:$28 sps:$4 sm:$0xff]   ;;  %v6004_v21 = vld [vmem:[%s7584_s5 + $0x48] ss:$28 sps:$4 sm:$0xff]  }
 0x635   : > { %5310 = vmatpush3.bf16.msra.mxu1 %v2612_v51  ;;  %4973 = vmatprep.subr.bf16.mxu0 %v2621_v36  ;;  %v2685_v51 = vld [vmem:[%s7584_s5 + $0x190] sm:$0xff] }
 0x636   : > { %v2622_v43 = vpack.c.bf16 %v5779_v56, %v5778_v41  ;;  %v2613_v46 = vpack.c.bf16 %v5774_v62, %v5773_v61  ;;  %5303 = vmatprep.subr.bf16.mxu1 %v2621_v36  ;;  %3125 = vmatprep.mubr.bf16.mxu0 %v5978_v42  ;;  %v6006_v36 = vld [vmem:[%s7584_s5 + $0x4c] ss:$28 sps:$4 sm:$0xff]   ;;  %v6003_v42 = vld [vmem:[%s7584_s5 + $0x158] ss:$28 sps:$4 sm:$0xff]   ;;  %v4488_v15 = vcombine.high %v2685_v51, %v2685_v51  ;;  %v6011_v41 = vld [vmem:[%s7584_s5 + $0x80] ss:$28 sps:$4 sm:$0xff]  }
 0x637   : > { %v5787_v49 = vpop.permute.xlu0 %5786  ;;  %v5782_v4 = vpop.permute.xlu1 %5781  ;;  %3045 = vmatprep.mubr.bf16.mxu1 %v5980_v57  ;;  %v6009_v57 = vld [vmem:[%s7584_s5 + $0x84] ss:$28 sps:$4 sm:$0xff]   ;;  %v4487_v56 = vcombine.low %v2685_v51, %v2685_v51  ;;  %v6014_v62 = vld [vmem:[%s7584_s5 + $0x14] ss:$28 sps:$4 sm:$0xff]   ;;  %v6015_v61 = vld [vmem:[%s7584_s5 + $0xbc] ss:$28 sps:$4 sm:$0xff]  }
 0x638   : > { %v5789_v45 = vunpack.i.h.bf16 %v5787_v49  ;;  %v5788_v52 = vunpack.i.l.bf16 %v5787_v49  ;;  %v5784_v18 = vunpack.i.h.bf16 %v5782_v4  ;;  %v5783_v20 = vunpack.i.l.bf16 %v5782_v4  ;;  %4974 = vmatpush3.bf16.msra.mxu0 %v2613_v46  ;;  %v6012_v4 = vld [vmem:[%s7584_s5 + $0x10] ss:$28 sps:$4 sm:$0xff]  }
 0x639   : > { %5311 = vmatpush3.bf16.msra.mxu1 %v2613_v46  ;;  %4975 = vmatprep.subr.bf16.mxu0 %v2622_v43 }
 0x63a   : > { %v2623_v25 = vpack.c.bf16 %v5789_v45, %v5788_v52  ;;  %v2614_v39 = vpack.c.bf16 %v5784_v18, %v5783_v20  ;;  %5304 = vmatprep.subr.bf16.mxu1 %v2622_v43  ;;  %v6018_v45 = vld [vmem:[%s7584_s5 + $0xf4] ss:$28 sps:$4 sm:$0xff]  }
 0x63b   : > { %v5797_v48 = vpop.permute.xlu0 %5796  ;;  %v5792_v9 = vpop.permute.xlu1 %5791  ;;  %3126 = vmatmul.mubr.bf16.gmra.mrb[132].mxu0 %v5982_v60  ;;  %v6017_v60 = vld [vmem:[%s7584_s5 + $0xb8] ss:$28 sps:$4 sm:$0xff]   ;;  %v6020_v20 = vld [vmem:[%s7584_s5 + $0xf0] ss:$28 sps:$4 sm:$0xff]  }
 0x63c   : > { %v5799_v17 = vunpack.i.h.bf16 %v5797_v48  ;;  %v5798_v5 = vunpack.i.l.bf16 %v5797_v48  ;;  %v5794_v32 = vunpack.i.h.bf16 %v5792_v9  ;;  %v5793_v8 = vunpack.i.l.bf16 %v5792_v9  ;;  %3046 = vmatmul.mubr.bf16.gmra.mrb[140].mxu1 %v5983_v59  ;;  %4976 = vmatpush3.bf16.msra.mxu0 %v2614_v39  ;;  %v6021_v52 = vld [vmem:[%s7584_s5 + $0x18] ss:$28 sps:$4 sm:$0xff]   ;;  %v6023_v59 = vld [vmem:[%s7584_s5 + $0x12c] ss:$28 sps:$4 sm:$0xff]   ;;  %v6028_v48 = vld [vmem:[%s7584_s5 + $0x164] ss:$28 sps:$4 sm:$0xff]  }
 0x63d   : > { %5312 = vmatpush3.bf16.msra.mxu1 %v2614_v39  ;;  %4977 = vmatprep.subr.bf16.mxu0 %v2623_v25  ;;  %v6026_v39 = vld [vmem:[%s7584_s5 + $0x88] ss:$28 sps:$4 sm:$0xff]   ;;  %v6027_v9 = vld [vmem:[%s7584_s5 + $0xc0] ss:$28 sps:$4 sm:$0xff]  }
 0x63e   : > { %v2624_v1 = vpack.c.bf16 %v5799_v17, %v5798_v5  ;;  %v2615_v12 = vpack.c.bf16 %v5794_v32, %v5793_v8  ;;  %5305 = vmatprep.subr.bf16.mxu1 %v2623_v25  ;;  %3133 = vmatprep.mubr.bf16.mxu0 %v5984_v7  ;;  %v6022_v25 = vld [vmem:[%s7584_s5 + $0x50] ss:$28 sps:$4 sm:$0xff]   ;;  %v6025_v7 = vld [vmem:[%s7584_s5 + $0x128] ss:$28 sps:$4 sm:$0xff]   ;;  %v2686_v17 = vld [vmem:[%s7584_s5 + $0x198] sm:$0xff] }
 0x63f   : > { %v5802_v40 = vpop.permute.xlu0 %5801  ;;  %v5807_v3 = vpop.permute.xlu1 %5806  ;;  %3053 = vmatprep.mubr.bf16.mxu1 %v5986_v11  ;;  %v6031_v11 = vld [vmem:[%s7584_s5 + $0xf8] ss:$28 sps:$4 sm:$0xff]   ;;  %v6030_v5 = vld [vmem:[%s7584_s5 + $0x160] ss:$28 sps:$4 sm:$0xff]   ;;  %v4490_v32 = vcombine.high %v2686_v17, %v2686_v17  ;;  %v6032_v8 = vld [vmem:[%s7584_s5 + $0x130] ss:$28 sps:$4 sm:$0xff]  }
 0x640   : > { %v5804_v37 = vunpack.i.h.bf16 %v5802_v40  ;;  %v5803_v53 = vunpack.i.l.bf16 %v5802_v40  ;;  %v5809_v33 = vunpack.i.h.bf16 %v5807_v3  ;;  %v5808_v63 = vunpack.i.l.bf16 %v5807_v3  ;;  %4978 = vmatpush3.bf16.msra.mxu0 %v2615_v12  ;;  %v6036_v40 = vld [vmem:[%s7584_s5 + $0x1a0] ss:$0 sps:$4 sm:$0xff]  }
 0x641   : > { %5313 = vmatpush3.bf16.msra.mxu1 %v2615_v12  ;;  %4979 = vmatprep.subr.bf16.mxu0 %v2624_v1  ;;  %v4489_v12 = vcombine.low %v2686_v17, %v2686_v17 }
 0x642   : > { %v2625_v23 = vpack.c.bf16 %v5804_v37, %v5803_v53  ;;  %v2616_v31 = vpack.c.bf16 %v5809_v33, %v5808_v63  ;;  %5306 = vmatprep.subr.bf16.mxu1 %v2624_v1  ;;  %v6035_v1 = vld [vmem:[%s7584_s5 + $0x168] ss:$28 sps:$4 sm:$0xff]  }
 0x643   : > { %v5817_v50 = vpop.permute.xlu0 %5816  ;;  %v5812_v19 = vpop.permute.xlu1 %5811  ;;  %3134 = vmatmul.mubr.bf16.gmra.mrb[136].mxu0 %v5988_v14  ;;  %v6037_v33 = vld [vmem:[%s7585_s6] sm:$0xff]  }
 0x644   : > { %v5819_v47 = vunpack.i.h.bf16 %v5817_v50  ;;  %v5818_v30 = vunpack.i.l.bf16 %v5817_v50  ;;  %v5814_v6 = vunpack.i.h.bf16 %v5812_v19  ;;  %v5813_v16 = vunpack.i.l.bf16 %v5812_v19  ;;  %3054 = vmatmul.mubr.bf16.gmra.mrb[144].mxu1 %v5989_v29  ;;  %4980 = vmatpush3.bf16.msra.mxu0 %v2616_v31 }
 0x645   : > { %5314 = vmatpush3.bf16.msra.mxu1 %v2616_v31  ;;  %4981 = vmatprep.subr.bf16.mxu0 %v2625_v23 }
 0x646   : > { %v2626_v27 = vpack.c.bf16 %v5819_v47, %v5818_v30  ;;  %v2617_v24 = vpack.c.bf16 %v5814_v6, %v5813_v16  ;;  %5307 = vmatprep.subr.bf16.mxu1 %v2625_v23  ;;  %3141 = vmatprep.mubr.bf16.mxu0 %v5990_v28 }
 0x647   : > { %3061 = vmatprep.mubr.bf16.mxu1 %v5992_v34  ;;  %v5822_v43 = vpop.permute.xlu1 %5821 }
 0x648   : > { %4982 = vmatpush3.bf16.msra.mxu0 %v2617_v24  ;;  %v5824_v46 = vunpack.i.h.bf16 %v5822_v43  ;;  %v5823_v49 = vunpack.i.l.bf16 %v5822_v43 }
 0x649   : > { %5315 = vmatpush3.bf16.msra.mxu1 %v2617_v24  ;;  %5214 = vmatprep.subr.bf16.mxu0 %v2626_v27 }
 0x64a   : > { %v2627_v18 = vpack.c.bf16 %v5824_v46, %v5823_v49 }
 0x64b   : > { %3142 = vmatmul.mubr.bf16.gmra.mrb[140].mxu0 %v5994_v35 }
 0x64c   : > { %3062 = vmatmul.mubr.bf16.gmra.mrb[148].mxu1 %v5995_v26  ;;  %3149 = vmatprep.mubr.bf16.mxu0 %v5996_v38 }
 0x64d   : > { %3069 = vmatprep.mubr.bf16.mxu1 %v4486_v54 }
 0x653   : > { %3150 = vmatmul.mubr.bf16.gmra.mrb[144].mxu0 %v5999_v2 }
 0x654   : > { %3070 = vmatmul.mubr.bf16.gmra.mrb[152].mxu1 %v4485_v13  ;;  %3157 = vmatprep.mubr.bf16.mxu0 %v6001_v10 }
 0x655   : > { %3213 = vmatprep.mubr.bf16.mxu1 %v6006_v36 }
 0x65b   : > { %3158 = vmatmul.mubr.bf16.gmra.mrb[148].mxu0 %v6003_v42 }
 0x65c   : > { %3214 = vmatmul.mubr.bf16.vlgmr.msra.gmra.mrb[156].mxu1 %v6004_v21  ;;  %3165 = vmatprep.mubr.bf16.mxu0 %v4488_v15 }
 0x65d   : > { %3221 = vmatprep.mubr.bf16.mxu1 %v6009_v57 }
 0x663   : > { %3166 = vmatmul.mubr.bf16.gmra.mrb[152].mxu0 %v4487_v56 }
 0x664   : > { %3222 = vmatmul.mubr.bf16.gmra.mrb[160].mxu1 %v6011_v41  ;;  %3205 = vmatprep.mubr.bf16.mxu0 %v6014_v62 }
 0x665   : > { %3229 = vmatprep.mubr.bf16.mxu1 %v6015_v61 }
 0x66b   : > { %3206 = vmatmul.mubr.bf16.vlgmr.msra.gmra.mrb[156].mxu0 %v6012_v4 }
 0x66c   : > { %5215 = vmatpush3.bf16.msra.mxu0 %v2626_v27  ;;  %3230 = vmatmul.mubr.bf16.gmra.mrb[164].mxu1 %v6017_v60 }
 0x66d   : > { %5216 = vmatprep.subr.bf16.mxu0 %v2627_v18  ;;  %3237 = vmatprep.mubr.bf16.mxu1 %v6018_v45 }
 0x66e   : > { %5220 = vmatprep.mubr.msk.bf16.mxu0 %vm523_vm0, %v6021_v52 }
 0x670   : > { %5217 = vmatpush3.bf16.msra.mxu0 %v2627_v18 }
 0x671   : > { %5218 = vmatprep.subr.bf16.mxu0 %v6454_v44 }
 0x674   : > { %5219 = vmatpush3.bf16.msra.mxu0 %v6454_v44  ;;  %3238 = vmatmul.mubr.bf16.gmra.mrb[168].mxu1 %v6020_v20 }
 0x675   : > { %3245 = vmatprep.mubr.bf16.mxu1 %v6023_v59 }
 0x677   : > { %5221 = vmatmul.mubr.msk.bf16.vlgmr.msra.gmra.mrb[160].mxu0 %vm523_vm0, %v6022_v25 }
 0x678   : > { %5224 = vmatprep.mubr.msk.bf16.mxu0 %vm523_vm0, %v6026_v39 }
 0x67c   : > { %3246 = vmatmul.mubr.bf16.gmra.mrb[172].mxu1 %v6025_v7 }
 0x67d   : > { %3253 = vmatprep.mubr.bf16.mxu1 %v6028_v48 }
 0x67f   : > { %5225 = vmatmul.mubr.msk.bf16.gmra.mrb[164].mxu0 %vm523_vm0, %v6027_v9 }
 0x680   : > { %5228 = vmatprep.mubr.msk.bf16.mxu0 %vm523_vm0, %v6031_v11 }
 0x684   : > { %3254 = vmatmul.mubr.bf16.gmra.mrb[176].mxu1 %v6030_v5 }
 0x685   : > { %3261 = vmatprep.mubr.bf16.mxu1 %v4490_v32 }
 0x687   : > { %5229 = vmatmul.mubr.msk.bf16.gmra.mrb[168].mxu0 %vm523_vm0, %v6032_v8 }
 0x688   : > { %5232 = vmatprep.mubr.msk.bf16.mxu0 %vm523_vm0, %v6035_v1 }
 0x68c   : > { %3262 = vmatmul.mubr.bf16.gmra.mrb[180].mxu1 %v4489_v12 }
 0x68d   : > { %5252 = vmatprep.mubr.msk.bf16.mxu1 %vm3556_vm9, %v6037_v33 }
 0x68f   : > { %5233 = vmatmul.mubr.msk.bf16.gmra.mrb[172].mxu0 %vm523_vm0, %v6036_v40 }
 0x6ef   : > { %v4855_v3 = vpop.f32.mrb[124].mxu1 }
 0x6f0   : > { %v4856_v14 = vpop.f32.mrb[125].mxu1 }
 0x6f1   : > { %v4857_v37 = vadd.f32 %v4856_v14, %v4855_v3  ;;  %v4858_v53 = vpop.f32.mrb[126].mxu1 }
 0x6f2   : > { %v4859_v63 = vpop.f32.mrb[127].mxu1 }
 0x6f3   : > { %v4860_v29 = vadd.f32 %v4859_v63, %v4858_v53 }
 0x6f7   : > { %v4861_v23 = vpop.f32.mrb[128].mxu1 }
 0x6f8   : > { %v4862_v31 = vpop.f32.mrb[129].mxu1 }
 0x6f9   : > { %v4863_v28 = vadd.f32 %v4862_v31, %v4861_v23  ;;  %v4864_v50 = vpop.f32.mrb[130].mxu1 }
 0x6fa   : > { %v4865_v19 = vpop.f32.mrb[131].mxu1 }
 0x6fb   : > { %v4866_v34 = vadd.f32 %v4865_v19, %v4864_v50 }
 0x6fe   : > { %v4919_v47 = vpop.f32.mrb[124].mxu0 }
 0x6ff   : > { %v4920_v30 = vpop.f32.mrb[125].mxu0  ;;  %v4867_v6 = vpop.f32.mrb[132].mxu1 }
 0x700   : > { %v4921_v16 = vadd.f32 %v4920_v30, %v4919_v47  ;;  %v4922_v27 = vpop.f32.mrb[126].mxu0  ;;  %v4868_v24 = vpop.f32.mrb[133].mxu1 }
 0x701   : > { %v4923_v22 = vpop.f32.mrb[127].mxu0  ;;  %v4869_v35 = vadd.f32 %v4868_v24, %v4867_v6  ;;  %v4870_v26 = vpop.f32.mrb[134].mxu1 }
 0x702   : > { %v7329_v38 = vadd.f32 %v4921_v16, %v4857_v37  ;;  %v4924_v54 = vadd.f32 %v4923_v22, %v4922_v27  ;;  %v4871_v2 = vpop.f32.mrb[135].mxu1 }
 0x703   : > { %v4872_v13 = vadd.f32 %v4871_v2, %v4870_v26 }
 0x704   : > { %v7331_v10 = vadd.f32 %v4924_v54, %v4860_v29 }
 0x706   : > { %v4925_v36 = vpop.f32.mrb[128].mxu0 }
 0x707   : > { %v4926_v51 = vpop.f32.mrb[129].mxu0  ;;  %v4873_v42 = vpop.f32.mrb[136].mxu1 }
 0x708   : > { %v4927_v21 = vadd.f32 %v4926_v51, %v4925_v36  ;;  %v4928_v15 = vpop.f32.mrb[130].mxu0  ;;  %v4874_v57 = vpop.f32.mrb[137].mxu1 }
 0x709   : > { %v4929_v56 = vpop.f32.mrb[131].mxu0  ;;  %v4875_v41 = vadd.f32 %v4874_v57, %v4873_v42  ;;  %v4876_v62 = vpop.f32.mrb[138].mxu1 }
 0x70a   : > { %v7333_v61 = vadd.f32 %v4927_v21, %v4863_v28  ;;  %v4930_v43 = vadd.f32 %v4929_v56, %v4928_v15  ;;  %v4877_v46 = vpop.f32.mrb[139].mxu1 }
 0x70b   : > { %v4878_v49 = vadd.f32 %v4877_v46, %v4876_v62 }
 0x70c   : > { %v7335_v4 = vadd.f32 %v4930_v43, %v4866_v34 }
 0x70e   : > { %v4931_v60 = vpop.f32.mrb[132].mxu0 }
 0x70f   : > { %v4879_v45 = vpop.f32.mrb[140].mxu1  ;;  %v4932_v52 = vpop.f32.mrb[133].mxu0 }
 0x710   : > { %v4933_v18 = vadd.f32 %v4932_v52, %v4931_v60  ;;  %v4880_v20 = vpop.f32.mrb[141].mxu1  ;;  %v4934_v59 = vpop.f32.mrb[134].mxu0 }
 0x711   : > { %v4881_v25 = vadd.f32 %v4880_v20, %v4879_v45  ;;  %v4882_v39 = vpop.f32.mrb[142].mxu1  ;;  %v4935_v7 = vpop.f32.mrb[135].mxu0 }
 0x712   : > { %v7337_v48 = vadd.f32 %v4933_v18, %v4869_v35  ;;  %v4936_v9 = vadd.f32 %v4935_v7, %v4934_v59  ;;  %v4883_v11 = vpop.f32.mrb[143].mxu1 }
 0x713   : > { %v4884_v17 = vadd.f32 %v4883_v11, %v4882_v39 }
 0x714   : > { %v7339_v5 = vadd.f32 %v4936_v9, %v4872_v13 }
 0x716   : > { %v4937_v32 = vpop.f32.mrb[136].mxu0 }
 0x717   : > { %v4885_v8 = vpop.f32.mrb[144].mxu1  ;;  %v4938_v1 = vpop.f32.mrb[137].mxu0 }
 0x718   : > { %v4886_v12 = vpop.f32.mrb[145].mxu1  ;;  %v4939_v40 = vadd.f32 %v4938_v1, %v4937_v32  ;;  %v4940_v3 = vpop.f32.mrb[138].mxu0 }
 0x719   : > { %v4887_v14 = vadd.f32 %v4886_v12, %v4885_v8  ;;  %v4888_v37 = vpop.f32.mrb[146].mxu1  ;;  %v4941_v53 = vpop.f32.mrb[139].mxu0 }
 0x71a   : > { %v4889_v33 = vpop.f32.mrb[147].mxu1  ;;  %v7341_v63 = vadd.f32 %v4939_v40, %v4875_v41  ;;  %v4942_v29 = vadd.f32 %v4941_v53, %v4940_v3 }
 0x71b   : > { %v4890_v23 = vadd.f32 %v4889_v33, %v4888_v37 }
 0x71c   : > { %v7343_v31 = vadd.f32 %v4942_v29, %v4878_v49 }
 0x71e   : > { %v4943_v28 = vpop.f32.mrb[140].mxu0 }
 0x71f   : > { %v4891_v50 = vpop.f32.mrb[148].mxu1  ;;  %v4944_v19 = vpop.f32.mrb[141].mxu0 }
 0x720   : > { %v4892_v34 = vpop.f32.mrb[149].mxu1  ;;  %v4945_v47 = vadd.f32 %v4944_v19, %v4943_v28  ;;  %v4946_v30 = vpop.f32.mrb[142].mxu0 }
 0x721   : > { %v4893_v6 = vadd.f32 %v4892_v34, %v4891_v50  ;;  %v4894_v16 = vpop.f32.mrb[150].mxu1  ;;  %v4947_v27 = vpop.f32.mrb[143].mxu0 }
 0x722   : > { %v4895_v24 = vpop.f32.mrb[151].mxu1  ;;  %v7345_v22 = vadd.f32 %v4945_v47, %v4881_v25  ;;  %v4948_v35 = vadd.f32 %v4947_v27, %v4946_v30 }
 0x723   : > { %v4896_v26 = vadd.f32 %v4895_v24, %v4894_v16 }
 0x724   : > { %v7347_v54 = vadd.f32 %v4948_v35, %v4884_v17 }
 0x726   : > { %v4949_v2 = vpop.f32.mrb[144].mxu0 }
 0x727   : > { %v4897_v13 = vpop.f32.mrb[152].mxu1  ;;  %v4950_v36 = vpop.f32.mrb[145].mxu0 }
 0x728   : > { %v4898_v51 = vpop.f32.mrb[153].mxu1  ;;  %v4951_v42 = vadd.f32 %v4950_v36, %v4949_v2  ;;  %v4952_v21 = vpop.f32.mrb[146].mxu0 }
 0x729   : > { %v4899_v15 = vadd.f32 %v4898_v51, %v4897_v13  ;;  %v4900_v57 = vpop.f32.mrb[154].mxu1  ;;  %v4953_v56 = vpop.f32.mrb[147].mxu0 }
 0x72a   : > { %v4901_v41 = vpop.f32.mrb[155].mxu1  ;;  %v7349_v62 = vadd.f32 %v4951_v42, %v4887_v14  ;;  %v4954_v43 = vadd.f32 %v4953_v56, %v4952_v21 }
 0x72c   : > { %v7351_v46 = vadd.f32 %v4954_v43, %v4890_v23 }
 0x72e   : > { %v4955_v49 = vpop.f32.mrb[148].mxu0 }
 0x72f   : > { %v4989_v60 = vpop.f32.mrb[156].mxu1  ;;  %v4956_v45 = vpop.f32.mrb[149].mxu0 }
 0x730   : > { %v4990_v52 = vpop.f32.mrb[157].mxu1  ;;  %v4957_v18 = vadd.f32 %v4956_v45, %v4955_v49  ;;  %v4958_v20 = vpop.f32.mrb[150].mxu0 }
 0x731   : > { %v4991_v59 = vadd.f32 %v4990_v52, %v4989_v60  ;;  %v4992_v25 = vpop.f32.mrb[158].mxu1  ;;  %v4959_v39 = vpop.f32.mrb[151].mxu0 }
 0x732   : > { %v4993_v7 = vpop.f32.mrb[159].mxu1  ;;  %v7353_v9 = vadd.f32 %v4957_v18, %v4893_v6  ;;  %v4960_v11 = vadd.f32 %v4959_v39, %v4958_v20 }
 0x733   : > { %v4994_v17 = vadd.f32 %v4993_v7, %v4992_v25  ;;  %v3216_v32 = vadd.f32 %v4991_v59, %v7333_v61 }
 0x734   : > { %v7356_v8 = vadd.f32 %v4960_v11, %v4896_v26 }
 0x735   : > { %v3219_v1 = vadd.f32 %v4994_v17, %v7335_v4 }
 0x736   : > { %v4961_v12 = vpop.f32.mrb[152].mxu0 }
 0x737   : > { %v4995_v40 = vpop.f32.mrb[160].mxu1  ;;  %v4962_v3 = vpop.f32.mrb[153].mxu0 }
 0x738   : > { %v4996_v14 = vpop.f32.mrb[161].mxu1  ;;  %v4963_v37 = vadd.f32 %v4962_v3, %v4961_v12  ;;  %v4964_v53 = vpop.f32.mrb[154].mxu0 }
 0x739   : > { %v4997_v33 = vadd.f32 %v4996_v14, %v4995_v40  ;;  %v4998_v29 = vpop.f32.mrb[162].mxu1  ;;  %v4965_v23 = vpop.f32.mrb[155].mxu0 }
 0x73a   : > { %v4999_v28 = vpop.f32.mrb[163].mxu1  ;;  %v7359_v50 = vadd.f32 %v4963_v37, %v4899_v15 }
 0x73b   : > { %v5000_v19 = vadd.f32 %v4999_v28, %v4998_v29  ;;  %v3224_v34 = vadd.f32 %v4997_v33, %v7337_v48 }
 0x73d   : > { %v3227_v61 = vadd.f32 %v5000_v19, %v7339_v5 }
 0x73e   : > { %v4983_v47 = vpop.f32.mrb[156].mxu0 }
 0x73f   : > { %v4984_v30 = vpop.f32.mrb[157].mxu0  ;;  %v5001_v4 = vpop.f32.mrb[164].mxu1 }
 0x740   : > { %v4985_v6 = vadd.f32 %v4984_v30, %v4983_v47  ;;  %v4986_v16 = vpop.f32.mrb[158].mxu0  ;;  %v5002_v27 = vpop.f32.mrb[165].mxu1 }
 0x741   : > { %v5003_v24 = vadd.f32 %v5002_v27, %v5001_v4  ;;  %v4987_v35 = vpop.f32.mrb[159].mxu0  ;;  %v5004_v26 = vpop.f32.mrb[166].mxu1 }
 0x742   : > { %v4988_v2 = vadd.f32 %v4987_v35, %v4986_v16  ;;  %v5005_v13 = vpop.f32.mrb[167].mxu1  ;;  %v3208_v36 = vadd.f32 %v4985_v6, %v7329_v38 }
 0x743   : > { %v5006_v51 = vadd.f32 %v5005_v13, %v5004_v26  ;;  %v3232_v42 = vadd.f32 %v5003_v24, %v7341_v63 }
 0x744   : > { %v3211_v48 = vadd.f32 %v4988_v2, %v7331_v10 }
 0x745   : > { %v3235_v5 = vadd.f32 %v5006_v51, %v7343_v31 }
 0x747   : > { %v5007_v21 = vpop.f32.mrb[168].mxu1 }
 0x748   : > { %v5008_v15 = vpop.f32.mrb[169].mxu1 }
 0x749   : > { %v5009_v57 = vadd.f32 %v5008_v15, %v5007_v21  ;;  %v5010_v56 = vpop.f32.mrb[170].mxu1 }
 0x74a   : > { %v5222_v41 = vpop.f32.mrb[160].mxu0  ;;  %v5011_v43 = vpop.f32.mrb[171].mxu1 }
 0x74b   : > { %v3312_v49 = vadd.f32 %v5222_v41, %v3216_v32  ;;  %v5012_v60 = vadd.f32 %v5011_v43, %v5010_v56  ;;  %v3303_v45 = vpop.f32.mrb[161].mxu0  ;;  %v3240_v52 = vadd.f32 %v5009_v57, %v7345_v22 }
 0x74c   : > { %v3304_v18 = vadd.f32 %v3303_v45, %v3208_v36  ;;  %v5223_v38 = vpop.f32.mrb[162].mxu0 }
 0x74d   : > { %v3315_v20 = vadd.f32 %v5223_v38, %v3219_v1  ;;  %v3306_v59 = vpop.f32.mrb[163].mxu0  ;;  %v3243_v63 = vadd.f32 %v5012_v60, %v7347_v54  ;;  %v3367_v25 = vmax.f32 %v3312_v49, 0.0 }
 0x74e   : > { %v3307_v10 = vadd.f32 %v3306_v59, %v3211_v48  ;;  %v3365_v7 = vmax.f32 %v3304_v18, 0.0 }
 0x74f   : > { %v3368_v31 = vmax.f32 %v3315_v20, 0.0  ;;  %v5013_v39 = vpop.f32.mrb[172].mxu1 }
 0x750   : > { %v3366_v11 = vmax.f32 %v3307_v10, 0.0  ;;  %v5014_v17 = vpop.f32.mrb[173].mxu1 }
 0x751   : > { %v3381_v12 = vpack.c.bf16 %v3368_v31, %v3367_v25  ;;  %v5015_v40 = vadd.f32 %v5014_v17, %v5013_v39  ;;  %v5016_v32 = vpop.f32.mrb[174].mxu1 }
 0x752   : > { %v3380_v3 = vpack.c.bf16 %v3366_v11, %v3365_v7  ;;  %v5226_v14 = vpop.f32.mrb[164].mxu0  ;;  %v5017_v37 = vpop.f32.mrb[175].mxu1 }
 0x753   : > { %v3328_v22 = vadd.f32 %v5226_v14, %v3232_v42  ;;  %v5018_v53 = vadd.f32 %v5017_v37, %v5016_v32  ;;  %v3319_v33 = vpop.f32.mrb[165].mxu0  ;;  %v3248_v1 = vadd.f32 %v5015_v40, %v7349_v62  ;;  %v6039_v14 = vld [vmem:[%s7585_s6 + $0x10] sm:$0xff]   ;;  %v6042_v37 = vld [vmem:[%s7585_s6 + $0x28] sm:$0xff]  }
 0x754   : > { %v3320_v29 = vadd.f32 %v3319_v33, %v3224_v34  ;;  %v5227_v54 = vpop.f32.mrb[166].mxu0  ;;  %5236 = vmatprep.subr.bf16.mxu1 %v3380_v3  ;;  %v6045_v33 = vld [vmem:[%s7585_s6 + $0x40] sm:$0xff]  }
 0x755   : > { %v3331_v23 = vadd.f32 %v5227_v54, %v3235_v5  ;;  %v3322_v28 = vpop.f32.mrb[167].mxu0  ;;  %5237 = vmatpush3.bf16.msra.mxu1 %v3380_v3  ;;  %v3251_v19 = vadd.f32 %v5018_v53, %v7351_v46  ;;  %v3371_v30 = vmax.f32 %v3328_v22, 0.0  ;;  %v6043_v22 = vld [vmem:[%s7585_s6 + $0x30] sm:$0xff]   ;;  %v6044_v53 = vld [vmem:[%s7585_s6 + $0x38] sm:$0xff]  }
 0x756   : > { %v3323_v47 = vadd.f32 %v3322_v28, %v3227_v61  ;;  %5238 = vmatprep.subr.bf16.mxu1 %v3381_v12  ;;  %v3369_v16 = vmax.f32 %v3320_v29, 0.0  ;;  %v6047_v29 = vld [vmem:[%s7585_s6 + $0x50] sm:$0xff]   ;;  %v6048_v54 = vld [vmem:[%s7585_s6 + $0x58] sm:$0xff]   ;;  %v6050_v28 = vld [vmem:[%s7585_s6 + $0x68] sm:$0xff]  }
 0x757   : > { %v3372_v4 = vmax.f32 %v3331_v23, 0.0  ;;  %v5019_v6 = vpop.f32.mrb[176].mxu1  ;;  %v6049_v23 = vld [vmem:[%s7585_s6 + $0x60] sm:$0xff]  }
 0x758   : > { %v3370_v27 = vmax.f32 %v3323_v47, 0.0  ;;  %v5020_v24 = vpop.f32.mrb[177].mxu1  ;;  %v6052_v47 = vld [vmem:[%s7585_s6 + $0x78] sm:$0xff]  }
 0x759   : > { %v3383_v35 = vpack.c.bf16 %v3372_v4, %v3371_v30  ;;  %v5021_v26 = vadd.f32 %v5020_v24, %v5019_v6  ;;  %5239 = vmatpush3.bf16.msra.mxu1 %v3381_v12  ;;  %v5022_v62 = vpop.f32.mrb[178].mxu1  ;;  %v6053_v30 = vld [vmem:[%s7585_s6 + $0x80] sm:$0xff]   ;;  %v6054_v4 = vld [vmem:[%s7585_s6 + $0x88] sm:$0xff]   ;;  %v6055_v6 = vld [vmem:[%s7585_s6 + $0x90] sm:$0xff]  }
 0x75a   : > { %v3382_v34 = vpack.c.bf16 %v3370_v27, %v3369_v16  ;;  %v5230_v2 = vpop.f32.mrb[168].mxu0  ;;  %v5023_v13 = vpop.f32.mrb[179].mxu1  ;;  %v6056_v16 = vld [vmem:[%s7585_s6 + $0x98] sm:$0xff]   ;;  %v6057_v27 = vld [vmem:[%s7585_s6 + $0xa0] sm:$0xff]   ;;  %v6058_v24 = vld [vmem:[%s7585_s6 + $0xa8] sm:$0xff]  }
 0x75b   : > { %v3344_v36 = vadd.f32 %v5230_v2, %v3248_v1  ;;  %v5024_v51 = vadd.f32 %v5023_v13, %v5022_v62  ;;  %v3335_v42 = vpop.f32.mrb[169].mxu0  ;;  %v3256_v46 = vadd.f32 %v5021_v26, %v7353_v9  ;;  %v6046_v1 = vld [vmem:[%s7585_s6 + $0x48] sm:$0xff]   ;;  %v6060_v26 = vld [vmem:[%s7585_s6 + $0xb8] sm:$0xff]   ;;  %v6063_v62 = vld [vmem:[%s7586_s7 + $0x4] ss:$16 sps:$4 sm:$0xff]  }
 0x75c   : > { %v3336_v61 = vadd.f32 %v3335_v42, %v3240_v52  ;;  %v5231_v48 = vpop.f32.mrb[170].mxu0  ;;  %5240 = vmatprep.subr.bf16.mxu1 %v3382_v34  ;;  %4058 = vmatprep.mubr.bf16.mxu0 %v6063_v62 }
 0x75d   : > { %v3347_v5 = vadd.f32 %v5231_v48, %v3251_v19  ;;  %v3338_v21 = vpop.f32.mrb[171].mxu0  ;;  %5241 = vmatpush3.bf16.msra.mxu1 %v3382_v34  ;;  %v3259_v15 = vadd.f32 %v5024_v51, %v7356_v8  ;;  %v3375_v56 = vmax.f32 %v3344_v36, 0.0  ;;  %v6051_v19 = vld [vmem:[%s7585_s6 + $0x70] sm:$0xff]  }
 0x75e   : > { %v3339_v57 = vadd.f32 %v3338_v21, %v3243_v63  ;;  %5242 = vmatprep.subr.bf16.mxu1 %v3383_v35  ;;  %v3373_v49 = vmax.f32 %v3336_v61, 0.0 }
 0x75f   : > { %v3376_v41 = vmax.f32 %v3347_v5, 0.0  ;;  %v5025_v43 = vpop.f32.mrb[180].mxu1 }
 0x760   : > { %v3374_v60 = vmax.f32 %v3339_v57, 0.0  ;;  %v5026_v45 = vpop.f32.mrb[181].mxu1 }
 0x761   : > { %v3385_v18 = vpack.c.bf16 %v3376_v41, %v3375_v56  ;;  %v5027_v38 = vadd.f32 %v5026_v45, %v5025_v43  ;;  %5243 = vmatpush3.bf16.msra.mxu1 %v3383_v35  ;;  %v5028_v9 = vpop.f32.mrb[182].mxu1  ;;  %v6059_v35 = vld [vmem:[%s7585_s6 + $0xb0] sm:$0xff]  }
 0x762   : > { %v3384_v52 = vpack.c.bf16 %v3374_v60, %v3373_v49  ;;  %v5234_v20 = vpop.f32.mrb[172].mxu0  ;;  %v5029_v59 = vpop.f32.mrb[183].mxu1 }
 0x763   : > { %v3264_v10 = vadd.f32 %v5027_v38, %v7359_v50  ;;  %v3351_v25 = vpop.f32.mrb[173].mxu0  ;;  %v6038_v50 = vld [vmem:[%s7585_s6 + $0x8] sm:$0xff]  }
 0x764   : > { %v3352_v31 = vadd.f32 %v3351_v25, %v3256_v46  ;;  %v5235_v8 = vpop.f32.mrb[174].mxu0  ;;  %5244 = vmatprep.subr.bf16.mxu1 %v3384_v52 }
 0x765   : > { %v3360_v63 = vadd.f32 %v5234_v20, %v3264_v10  ;;  %v3354_v39 = vpop.f32.mrb[175].mxu0  ;;  %5245 = vmatpush3.bf16.msra.mxu1 %v3384_v52 }
 0x766   : > { %v3355_v7 = vadd.f32 %v3354_v39, %v3259_v15  ;;  %5246 = vmatprep.subr.bf16.mxu1 %v3385_v18  ;;  %v3377_v17 = vmax.f32 %v3352_v31, 0.0 }
 0x767   : > { %v3379_v11 = vmax.f32 %v3360_v63, 0.0 }
 0x768   : > { %v3378_v12 = vmax.f32 %v3355_v7, 0.0 }
 0x769   : > { %v3387_v40 = vpack.c.bf16 %v6229_v55, %v3379_v11  ;;  %5247 = vmatpush3.bf16.msra.mxu1 %v3385_v18  ;;  %v6040_v55 = vld [vmem:[%s7585_s6 + $0x18] sm:$0xff]  }
 0x76a   : > { %v3386_v32 = vpack.c.bf16 %v3378_v12, %v3377_v17 }
 0x76b   : > { %v3630_v3 = vand.u32 %v3387_v40, %v6803_v58  ;;  %v6041_v58 = vld [vmem:[%s7585_s6 + $0x20] sm:$0xff]  }
 0x76c   : > { %5248 = vmatprep.subr.bf16.mxu1 %v3386_v32 }
 0x76d   : > { %5249 = vmatpush3.bf16.msra.mxu1 %v3386_v32 }
 0x76e   : > { %5250 = vmatprep.subr.bf16.mxu1 %v3630_v3 }
 0x771   : > { %5251 = vmatpush3.bf16.msra.mxu1 %v3630_v3 }
 0x774   : > { %5253 = vmatmul.mubr.msk.bf16.vlgmr.msra.gmra.mrb[184].mxu1 %vm3556_vm9, %v6038_v50 }
 0x775   : > { %5256 = vmatprep.mubr.msk.bf16.mxu1 %vm3556_vm9, %v6039_v14 }
 0x77c   : > { %5257 = vmatmul.mubr.msk.bf16.gmra.mrb[188].mxu1 %vm3556_vm9, %v6040_v55 }
 0x77d   : > { %5260 = vmatprep.mubr.msk.bf16.mxu1 %vm3556_vm9, %v6041_v58 }
 0x784   : > { %5261 = vmatmul.mubr.msk.bf16.gmra.mrb[192].mxu1 %vm3556_vm9, %v6042_v37 }
 0x785   : > { %5264 = vmatprep.mubr.msk.bf16.mxu1 %vm3556_vm9, %v6043_v22 }
 0x78c   : > { %5265 = vmatmul.mubr.msk.bf16.gmra.mrb[196].mxu1 %vm3556_vm9, %v6044_v53 }
 0x78d   : > { %5268 = vmatprep.mubr.msk.bf16.mxu1 %vm3556_vm9, %v6045_v33 }
 0x794   : > { %5269 = vmatmul.mubr.msk.bf16.gmra.mrb[200].mxu1 %vm3556_vm9, %v6046_v1 }
 0x795   : > { %5272 = vmatprep.mubr.msk.bf16.mxu1 %vm3556_vm9, %v6047_v29 }
 0x79c   : > { %5273 = vmatmul.mubr.msk.bf16.gmra.mrb[204].mxu1 %vm3556_vm9, %v6048_v54 }
 0x79d   : > { %5276 = vmatprep.mubr.msk.bf16.mxu1 %vm3556_vm9, %v6049_v23 }
 0x7a4   : > { %5277 = vmatmul.mubr.msk.bf16.gmra.mrb[208].mxu1 %vm3556_vm9, %v6050_v28 }
 0x7a5   : > { %5280 = vmatprep.mubr.msk.bf16.mxu1 %vm3556_vm9, %v6051_v19 }
 0x7ac   : > { %5281 = vmatmul.mubr.msk.bf16.gmra.mrb[212].mxu1 %vm3556_vm9, %v6052_v47 }
 0x7ad   : > { %5284 = vmatprep.mubr.msk.bf16.mxu1 %vm3556_vm9, %v6053_v30 }
 0x7b4   : > { %5285 = vmatmul.mubr.msk.bf16.gmra.mrb[216].mxu1 %vm3556_vm9, %v6054_v4 }
 0x7b5   : > { %5288 = vmatprep.mubr.msk.bf16.mxu1 %vm3556_vm9, %v6055_v6 }
 0x7bc   : > { %5289 = vmatmul.mubr.msk.bf16.gmra.mrb[220].mxu1 %vm3556_vm9, %v6056_v16 }
 0x7bd   : > { %5292 = vmatprep.mubr.msk.bf16.mxu1 %vm3556_vm9, %v6057_v27 }
 0x7c4   : > { %5293 = vmatmul.mubr.msk.bf16.gmra.mrb[224].mxu1 %vm3556_vm9, %v6058_v24 }
 0x7c5   : > { %5296 = vmatprep.mubr.msk.bf16.mxu1 %vm3556_vm9, %v6059_v35 }
 0x7cc   : > { %5297 = vmatmul.mubr.msk.bf16.gmra.mrb[228].mxu1 %vm3556_vm9, %v6060_v26 }
 0x847   : > { %v5254_v34 = vpop.f32.mrb[184].mxu1 }
 0x848   : > { %v3666_v2 = vpop.f32.mrb[185].mxu1  ;;  %v3859_v36 = vmax.f32 %v5254_v34, 0.0 }
 0x849   : > { %v5255_v13 = vpop.f32.mrb[186].mxu1  ;;  %v3857_v46 = vmax.f32 %v3666_v2, 0.0 }
 0x84a   : > { %v3860_v51 = vmax.f32 %v5255_v13, 0.0  ;;  %v3669_v42 = vpop.f32.mrb[187].mxu1 }
 0x84b   : > { %v3858_v61 = vmax.f32 %v3669_v42, 0.0 }
 0x84c   : > { %v3906_v48 = vpack.c.bf16 %v3860_v51, %v3859_v36 }
 0x84d   : > { %v3905_v5 = vpack.c.bf16 %v3858_v61, %v3857_v46 }
 0x84f   : > { %v5258_v21 = vpop.f32.mrb[188].mxu1 }
 0x850   : > { %v3682_v15 = vpop.f32.mrb[189].mxu1  ;;  %v3863_v56 = vmax.f32 %v5258_v21, 0.0 }
 0x851   : > { %v5259_v57 = vpop.f32.mrb[190].mxu1  ;;  %v3861_v49 = vmax.f32 %v3682_v15, 0.0 }
 0x852   : > { %v3864_v41 = vmax.f32 %v5259_v57, 0.0  ;;  %v3685_v43 = vpop.f32.mrb[191].mxu1 }
 0x853   : > { %v3862_v60 = vmax.f32 %v3685_v43, 0.0 }
 0x854   : > { %v3908_v45 = vpack.c.bf16 %v3864_v41, %v3863_v56 }
 0x855   : > { %v3907_v18 = vpack.c.bf16 %v3862_v60, %v3861_v49 }
 0x857   : > { %v5262_v38 = vpop.f32.mrb[192].mxu1 }
 0x858   : > { %v3698_v9 = vpop.f32.mrb[193].mxu1  ;;  %v3867_v20 = vmax.f32 %v5262_v38, 0.0 }
 0x859   : > { %v5263_v52 = vpop.f32.mrb[194].mxu1  ;;  %v3865_v25 = vmax.f32 %v3698_v9, 0.0 }
 0x85a   : > { %v3868_v59 = vmax.f32 %v5263_v52, 0.0  ;;  %v3701_v10 = vpop.f32.mrb[195].mxu1 }
 0x85b   : > { %v3866_v31 = vmax.f32 %v3701_v10, 0.0 }
 0x85c   : > { %v3910_v8 = vpack.c.bf16 %v3868_v59, %v3867_v20 }
 0x85d   : > { %v3909_v63 = vpack.c.bf16 %v3866_v31, %v3865_v25  ;;  %v6061_v25 = vld [vmem:[%s7586_s7] ss:$16 sps:$4 sm:$0xff]  }
 0x85f   : > { %v5266_v39 = vpop.f32.mrb[196].mxu1 }
 0x860   : > { %v3714_v7 = vpop.f32.mrb[197].mxu1  ;;  %v3871_v17 = vmax.f32 %v5266_v39, 0.0 }
 0x861   : > { %v5267_v11 = vpop.f32.mrb[198].mxu1  ;;  %v3869_v32 = vmax.f32 %v3714_v7, 0.0 }
 0x862   : > { %v3872_v12 = vmax.f32 %v5267_v11, 0.0  ;;  %v3717_v40 = vpop.f32.mrb[199].mxu1 }
 0x863   : > { %v3870_v3 = vmax.f32 %v3717_v40, 0.0 }
 0x864   : > { %v7471_v50 = vpack.c.bf16 %v3872_v12, %v3871_v17 }
 0x865   : > { %v3911_v14 = vpack.c.bf16 %v3870_v3, %v3869_v32 }
 0x867   : > { %v5270_v55 = vpop.f32.mrb[200].mxu1 }
 0x868   : > { %v3730_v58 = vpop.f32.mrb[201].mxu1  ;;  %v3875_v22 = vmax.f32 %v5270_v55, 0.0  ;;  %v6067_v55 = vld [vmem:[%s7586_s7 + $0x44] ss:$16 sps:$4 sm:$0xff]  }
 0x869   : > { %v5271_v37 = vpop.f32.mrb[202].mxu1  ;;  %v3873_v1 = vmax.f32 %v3730_v58, 0.0 }
 0x86a   : > { %v3876_v53 = vmax.f32 %v5271_v37, 0.0  ;;  %v3733_v33 = vpop.f32.mrb[203].mxu1 }
 0x86b   : > { %v3874_v29 = vmax.f32 %v3733_v33, 0.0 }
 0x86c   : > { %v3914_v54 = vpack.c.bf16 %v3876_v53, %v3875_v22 }
 0x86d   : > { %v3913_v23 = vpack.c.bf16 %v3874_v29, %v3873_v1  ;;  %v3941_v1 = vld [vmem:[%s7586_s7 + $0x60] sm:$0x77] }
 0x86f   : > { %v5274_v28 = vpop.f32.mrb[204].mxu1  ;;  %5074 = vmatprep.subr.bf16.mxu0 %v3913_v23 }
 0x870   : > { %v3746_v19 = vpop.f32.mrb[205].mxu1  ;;  %5075 = vmatpush3.bf16.msra.mxu0 %v3905_v5  ;;  %v3879_v30 = vmax.f32 %v5274_v28, 0.0 }
 0x871   : > { %v5275_v47 = vpop.f32.mrb[206].mxu1  ;;  %5076 = vmatprep.subr.bf16.mxu0 %v3914_v54  ;;  %v3877_v16 = vmax.f32 %v3746_v19, 0.0  ;;  %v6069_v19 = vld [vmem:[%s7586_s7 + $0x40] ss:$16 sps:$4 sm:$0xff]  }
 0x872   : > { %v3880_v4 = vmax.f32 %v5275_v47, 0.0  ;;  %v3749_v6 = vpop.f32.mrb[207].mxu1 }
 0x873   : > { %v3878_v27 = vmax.f32 %v3749_v6, 0.0 }
 0x874   : > { %v3916_v24 = vpack.c.bf16 %v3880_v4, %v3879_v30  ;;  %5077 = vmatpush3.bf16.msra.mxu0 %v3906_v48  ;;  %v4561_v30 = vcombine.high %v3941_v1, %v3941_v1 }
 0x875   : > { %v3915_v35 = vpack.c.bf16 %v3878_v27, %v3877_v16 }
 0x877   : > { %v5278_v26 = vpop.f32.mrb[208].mxu1  ;;  %5078 = vmatprep.subr.bf16.mxu0 %v3915_v35 }
 0x878   : > { %v3762_v62 = vpop.f32.mrb[209].mxu1  ;;  %5079 = vmatpush3.bf16.msra.mxu0 %v3907_v18  ;;  %v3883_v2 = vmax.f32 %v5278_v26, 0.0 }
 0x879   : > { %v5279_v34 = vpop.f32.mrb[210].mxu1  ;;  %5080 = vmatprep.subr.bf16.mxu0 %v3916_v24  ;;  %v3881_v51 = vmax.f32 %v3762_v62, 0.0 }
 0x87a   : > { %v3884_v13 = vmax.f32 %v5279_v34, 0.0  ;;  %v3765_v36 = vpop.f32.mrb[211].mxu1 }
 0x87b   : > { %v3882_v42 = vmax.f32 %v3765_v36, 0.0  ;;  %v6074_v36 = vld [vmem:[%s7586_s7 + $0xc] ss:$16 sps:$4 sm:$0xff]  }
 0x87c   : > { %v3918_v46 = vpack.c.bf16 %v3884_v13, %v3883_v2  ;;  %5081 = vmatpush3.bf16.msra.mxu0 %v3908_v45  ;;  %v4560_v2 = vcombine.low %v3941_v1, %v3941_v1 }
 0x87d   : > { %v3917_v61 = vpack.c.bf16 %v3882_v42, %v3881_v51  ;;  %v6072_v42 = vld [vmem:[%s7586_s7 + $0x8] ss:$16 sps:$4 sm:$0xff]  }
 0x87f   : > { %v5282_v5 = vpop.f32.mrb[212].mxu1  ;;  %5082 = vmatprep.subr.bf16.mxu0 %v3917_v61  ;;  %v6077_v61 = vld [vmem:[%s7586_s7 + $0x28] ss:$16 sps:$4 sm:$0xff]  }
 0x880   : > { %v3778_v21 = vpop.f32.mrb[213].mxu1  ;;  %5083 = vmatpush3.bf16.msra.mxu0 %v3909_v63  ;;  %v3887_v15 = vmax.f32 %v5282_v5, 0.0  ;;  %v6080_v5 = vld [vmem:[%s7586_s7 + $0x48] ss:$16 sps:$4 sm:$0xff]  }
 0x881   : > { %v5283_v48 = vpop.f32.mrb[214].mxu1  ;;  %5084 = vmatprep.subr.bf16.mxu0 %v3918_v46  ;;  %v3885_v41 = vmax.f32 %v3778_v21, 0.0  ;;  %v6075_v46 = vld [vmem:[%s7586_s7 + $0x2c] ss:$16 sps:$4 sm:$0xff]  }
 0x882   : > { %v3888_v57 = vmax.f32 %v5283_v48, 0.0  ;;  %v3781_v56 = vpop.f32.mrb[215].mxu1 }
 0x883   : > { %v3886_v43 = vmax.f32 %v3781_v56, 0.0 }
 0x884   : > { %v3920_v49 = vpack.c.bf16 %v3888_v57, %v3887_v15  ;;  %5085 = vmatpush3.bf16.msra.mxu0 %v3910_v8  ;;  %v6064_v8 = vld [vmem:[%s7586_s7 + $0x24] ss:$16 sps:$4 sm:$0xff]  }
 0x885   : > { %v3919_v60 = vpack.c.bf16 %v3886_v43, %v3885_v41 }
 0x887   : > { %5086 = vmatprep.subr.bf16.mxu0 %v3919_v60  ;;  %v5286_v18 = vpop.f32.mrb[216].mxu1 }
 0x888   : > { %v3891_v38 = vmax.f32 %v5286_v18, 0.0  ;;  %5087 = vmatpush3.bf16.msra.mxu0 %v3911_v14  ;;  %v3794_v45 = vpop.f32.mrb[217].mxu1 }
 0x889   : > { %v5287_v9 = vpop.f32.mrb[218].mxu1  ;;  %5088 = vmatprep.subr.bf16.mxu0 %v3920_v49  ;;  %v3889_v59 = vmax.f32 %v3794_v45, 0.0 }
 0x88a   : > { %v3892_v52 = vmax.f32 %v5287_v9, 0.0  ;;  %v3797_v20 = vpop.f32.mrb[219].mxu1 }
 0x88b   : > { %v3890_v10 = vmax.f32 %v3797_v20, 0.0 }
 0x88c   : > { %v3922_v31 = vpack.c.bf16 %v3892_v52, %v3891_v38  ;;  %5089 = vmatpush3.bf16.msra.mxu0 %v7471_v50  ;;  %v6066_v50 = vld [vmem:[%s7586_s7 + $0x20] ss:$16 sps:$4 sm:$0xff]  }
 0x88d   : > { %v3921_v63 = vpack.c.bf16 %v3890_v10, %v3889_v59  ;;  %4090 = vmatprep.subr.bf16.mxu0 %v6221_v0 }
 0x88f   : > { %v5290_v39 = vpop.f32.mrb[220].mxu1  ;;  %4059 = vmatmul.mubr.bf16.vlgmr.msra.gmra.mrb[176].mxu0 %v6061_v25 }
 0x890   : > { %v3895_v7 = vmax.f32 %v5290_v39, 0.0  ;;  %4091 = vmatpush1.bf16.msra.mxu0 %v3921_v63  ;;  %v3810_v11 = vpop.f32.mrb[221].mxu1  ;;  %4066 = vmatprep.mubr.bf16.mxu0 %v6064_v8 }
 0x891   : > { %v5291_v17 = vpop.f32.mrb[222].mxu1  ;;  %4092 = vmatprep.subr.bf16.mxu0 %v6221_v0  ;;  %v3893_v32 = vmax.f32 %v3810_v11, 0.0 }
 0x892   : > { %v3896_v12 = vmax.f32 %v5291_v17, 0.0  ;;  %v3813_v40 = vpop.f32.mrb[223].mxu1 }
 0x893   : > { %v3894_v3 = vmax.f32 %v3813_v40, 0.0 }
 0x894   : > { %v3924_v14 = vpack.c.bf16 %v3896_v12, %v3895_v7  ;;  %4093 = vmatpush1.bf16.msra.mxu0 %v3922_v31 }
 0x895   : > { %v3923_v58 = vpack.c.bf16 %v3894_v3, %v3893_v32  ;;  %4094 = vmatprep.subr.bf16.mxu0 %v6221_v0 }
 0x897   : > { %v5294_v37 = vpop.f32.mrb[224].mxu1  ;;  %4067 = vmatmul.mubr.bf16.gmra.mrb[180].mxu0 %v6066_v50 }
 0x898   : > { %v3899_v22 = vmax.f32 %v5294_v37, 0.0  ;;  %4095 = vmatpush1.bf16.msra.mxu0 %v3923_v58  ;;  %v3826_v53 = vpop.f32.mrb[225].mxu1  ;;  %4074 = vmatprep.mubr.bf16.mxu0 %v6067_v55 }
 0x899   : > { %v5295_v33 = vpop.f32.mrb[226].mxu1  ;;  %4096 = vmatprep.subr.bf16.mxu0 %v6221_v0  ;;  %v3897_v23 = vmax.f32 %v3826_v53, 0.0 }
 0x89a   : > { %v3900_v29 = vmax.f32 %v5295_v33, 0.0  ;;  %v3829_v54 = vpop.f32.mrb[227].mxu1 }
 0x89b   : > { %v3898_v28 = vmax.f32 %v3829_v54, 0.0 }
 0x89c   : > { %v3926_v47 = vpack.c.bf16 %v3900_v29, %v3899_v22  ;;  %4097 = vmatpush1.bf16.msra.mxu0 %v3924_v14 }
 0x89d   : > { %v3925_v4 = vpack.c.bf16 %v3898_v28, %v3897_v23  ;;  %4098 = vmatprep.subr.bf16.mxu0 %v6221_v0 }
 0x89f   : > { %v5298_v6 = vpop.f32.mrb[228].mxu1  ;;  %4075 = vmatmul.mubr.bf16.gmra.mrb[184].mxu0 %v6069_v19 }
 0x8a0   : > { %v3903_v16 = vmax.f32 %v5298_v6, 0.0  ;;  %4099 = vmatpush1.bf16.msra.mxu0 %v3925_v4  ;;  %v3842_v27 = vpop.f32.mrb[229].mxu1  ;;  %4082 = vmatprep.mubr.bf16.mxu0 %v4561_v30 }
 0x8a1   : > { %v5299_v24 = vpop.f32.mrb[230].mxu1  ;;  %4100 = vmatprep.subr.bf16.mxu0 %v6221_v0  ;;  %v3901_v62 = vmax.f32 %v3842_v27, 0.0 }
 0x8a2   : > { %v3904_v35 = vmax.f32 %v5299_v24, 0.0  ;;  %v3845_v26 = vpop.f32.mrb[231].mxu1 }
 0x8a3   : > { %v3902_v34 = vmax.f32 %v3845_v26, 0.0 }
 0x8a4   : > { %v3928_v13 = vpack.c.bf16 %v3904_v35, %v3903_v16  ;;  %4101 = vmatpush1.bf16.msra.mxu0 %v3926_v47 }
 0x8a5   : > { %v3927_v51 = vpack.c.bf16 %v3902_v34, %v3901_v62  ;;  %4102 = vmatprep.subr.bf16.mxu0 %v6221_v0 }
 0x8a7   : > { %4083 = vmatmul.mubr.bf16.gmra.mrb[188].mxu0 %v4560_v2 }
 0x8a8   : > { %4103 = vmatpush1.bf16.msra.mxu0 %v3927_v51  ;;  %4564 = vmatprep.mubr.msk.bf16.mxu0 %vm4013_vm10, %v6074_v36 }
 0x8a9   : > { %4104 = vmatprep.subr.bf16.mxu0 %v6221_v0 }
 0x8ac   : > { %4105 = vmatpush1.bf16.msra.mxu0 %v3928_v13 }
 0x8ad   : > { %4106 = vmatprep.subr.bf16.mxu0 %v6221_v0  ;;  %v6078_v0 = vld [vmem:[%s7586_s7 + $0x4c] ss:$16 sps:$4 sm:$0xff]  }
 0x8b0   : > { %4107 = vmatpush1.bf16.msra.mxu0 %v6454_v44  ;;  %v3942_v44 = vld [vmem:[%s7586_s7 + $0x68] sm:$0x77] }
 0x8b1   : > { %v4563_v21 = vcombine.high %v3942_v44, %v3942_v44  ;;  %v4562_v48 = vcombine.low %v3942_v44, %v3942_v44 }
 0x8b3   : > { %4123 = vmatmul.mubr.bf16.vlgmr.msra.gmra.mrb[192].mxu0 %v6072_v42 }
 0x8b4   : > { %4565 = vmatprep.mubr.msk.bf16.mxu0 %vm4013_vm10, %v6075_v46 }
 0x8bb   : > { %4131 = vmatmul.mubr.bf16.gmra.mrb[196].mxu0 %v6077_v61 }
 0x8bc   : > { %4566 = vmatprep.mubr.msk.bf16.mxu0 %vm4013_vm10, %v6078_v0 }
 0x8c3   : > { %4139 = vmatmul.mubr.bf16.gmra.mrb[200].mxu0 %v6080_v5 }
 0x8c4   : > { %4567 = vmatprep.mubr.msk.bf16.mxu0 %vm4013_vm10, %v4563_v21 }
 0x8cb   : > { %4147 = vmatmul.mubr.bf16.gmra.mrb[204].mxu0 %v4562_v48 }
 0x962   : > { %v5090_v15 = vpop.f32.mrb[176].mxu0 }
 0x963   : > { %v5091_v57 = vpop.f32.mrb[177].mxu0 }
 0x964   : > { %v5092_v56 = vadd.f32 %v5091_v57, %v5090_v15  ;;  %v5093_v41 = vpop.f32.mrb[178].mxu0 }
 0x965   : > { %v5094_v43 = vpop.f32.mrb[179].mxu0 }
 0x966   : > { %v5095_v49 = vadd.f32 %v5094_v43, %v5093_v41 }
 0x96a   : > { %v5096_v60 = vpop.f32.mrb[180].mxu0 }
 0x96b   : > { %v5097_v18 = vpop.f32.mrb[181].mxu0 }
 0x96c   : > { %v5098_v38 = vadd.f32 %v5097_v18, %v5096_v60  ;;  %v5099_v45 = vpop.f32.mrb[182].mxu0 }
 0x96d   : > { %v5100_v9 = vpop.f32.mrb[183].mxu0 }
 0x96e   : > { %v5101_v52 = vadd.f32 %v5100_v9, %v5099_v45 }
 0x972   : > { %v5102_v20 = vpop.f32.mrb[184].mxu0 }
 0x973   : > { %v5103_v59 = vpop.f32.mrb[185].mxu0 }
 0x974   : > { %v5104_v10 = vadd.f32 %v5103_v59, %v5102_v20  ;;  %v5105_v25 = vpop.f32.mrb[186].mxu0 }
 0x975   : > { %v5106_v31 = vpop.f32.mrb[187].mxu0 }
 0x976   : > { %v5107_v8 = vadd.f32 %v5106_v31, %v5105_v25 }
 0x97a   : > { %v5108_v63 = vpop.f32.mrb[188].mxu0 }
 0x97b   : > { %v5109_v39 = vpop.f32.mrb[189].mxu0 }
 0x97c   : > { %v5110_v7 = vadd.f32 %v5109_v39, %v5108_v63  ;;  %v5111_v11 = vpop.f32.mrb[190].mxu0 }
 0x97d   : > { %v5112_v17 = vpop.f32.mrb[191].mxu0 }
 0x986   : > { %v4124_v12 = vpop.f32.mrb[192].mxu0 }
 0x987   : > { %v4125_v40 = vadd.f32 %v5092_v56, %v4124_v12  ;;  %v4126_v32 = vpop.f32.mrb[193].mxu0 }
 0x988   : > { %v4127_v3 = vpop.f32.mrb[194].mxu0 }
 0x989   : > { %4154 = vxpose.xlu0.b32.start [1/7] (short) (narrow) %v4125_v40, 8  ;;  %v4128_v50 = vadd.f32 %v5095_v49, %v4127_v3  ;;  %v4129_v14 = vpop.f32.mrb[195].mxu0 }
 0x98d   : > { %4155 = vxpose.xlu0.b32.cont [2/7] (short) (narrow) %v4128_v50, 8 }
 0x98e   : > { %v4132_v55 = vpop.f32.mrb[196].mxu0 }
 0x98f   : > { %v4133_v58 = vadd.f32 %v5098_v38, %v4132_v55  ;;  %v4134_v37 = vpop.f32.mrb[197].mxu0 }
 0x990   : > { %v4135_v22 = vpop.f32.mrb[198].mxu0 }
 0x991   : > { %4156 = vxpose.xlu0.b32.cont [3/7] (short) (narrow) %v4133_v58, 8  ;;  %v4136_v53 = vadd.f32 %v5101_v52, %v4135_v22  ;;  %v4137_v33 = vpop.f32.mrb[199].mxu0 }
 0x995   : > { %4157 = vxpose.xlu0.b32.cont [4/7] (short) (narrow) %v4136_v53, 8 }
 0x996   : > { %v4140_v1 = vpop.f32.mrb[200].mxu0 }
 0x997   : > { %v4141_v29 = vadd.f32 %v5104_v10, %v4140_v1  ;;  %v4142_v54 = vpop.f32.mrb[201].mxu0 }
 0x998   : > { %v4143_v23 = vpop.f32.mrb[202].mxu0 }
 0x999   : > { %4158 = vxpose.xlu0.b32.cont [5/7] (short) (narrow) %v4141_v29, 8  ;;  %v4144_v28 = vadd.f32 %v5107_v8, %v4143_v23  ;;  %v4145_v19 = vpop.f32.mrb[203].mxu0 }
 0x99d   : > { %4159 = vxpose.xlu0.b32.cont [6/7] (short) (narrow) %v4144_v28, 8 }
 0x99e   : > { %v4148_v47 = vpop.f32.mrb[204].mxu0 }
 0x99f   : > { %v4149_v30 = vadd.f32 %v5110_v7, %v4148_v47  ;;  %v4150_v4 = vpop.f32.mrb[205].mxu0 }
 0x9a0   : > { %v4151_v6 = vpop.f32.mrb[206].mxu0 }
 0x9a1   : > { %4160 = vxpose.xlu0.b32.end [7/7] (short) (narrow) %v4149_v30, 8  ;;  %v4152_v16 = vpop.f32.mrb[207].mxu0 }
 0xa09   : > { %v4170_v27 = vpop.trf.xlu0 }
 0xa0a   : > { %v4187_v24 = vsel %vm4186_vm11, %v4170_v27, -inf }
 0xa0b   : > { %4188 = vmax.xlane.f32.xlu1 %v4187_v24 }
 0xa98   : > { %v4189_v35 = vpop.xlane.xlu1 %4188 }
 0xa99   : > { %v4190_v26 = vsub.f32 %v4170_v27, %v4189_v35 }
 0xa9b   : > { %v4191_v62 = vmul.f32 1.442695, %v4190_v26 }
 0xa9d   : > { %6083 = vpow2.f32 %v4191_v62 }
 0xaa7   : > { %v6084_v34 = vpop.eup %6083 }
 0xaa8   : > { %v4193_v2 = vsel %vm4186_vm11, %v6084_v34, 0.0 }
 0xaa9   : > { %4194 = vadd.xlane.f32.xlu1 %v4193_v2 }
 0xb36   : > { %v4195_v13 = vpop.xlane.xlu1 %4194 }
 0xb37   : > { %6085 = vrcp.f32 %v4195_v13 }
 0xb41   : > { %v6086_v36 = vpop.eup %6085 }
 0xb42   : > { %v4197_v51 = vmul.f32 %v6086_v36, %v6084_v34 }
 0xb44   : > { %v4198_v42 = vmul.f32 100.0, %v4197_v51 }
 0xb46   : > { %4199 = vst.msk [vmem:[%s337_s16] sm:$0x1] %vm4186_vm11, %v4198_v42 }
 0xb47   : > { %6158 = shalt.err (!%p6155_p7)
}
 0xb48   : > { %s6159_s26 = scalar_lea.hbm %s7534_s20, 16  ;;  %s6163_s21 = scalar_lea.hbm %s7587_s8, 32 }
 0xb49   : > { %p6160_p9 = scmp.ne.s32.totalorder %s7534_s20, %s6159_s26  ;;  %p6164_p5 = scmp.lt.u32.totalorder %s7534_s20, %s7587_s8 }
 0xb4a   : > { %p6165_p2 = scmp.lt.u32.totalorder %s6163_s21, %s6159_s26  ;;  %p6167_p4 = scmp.lt.u32.totalorder %s6159_s26, %s7534_s20 }
 0xb4b   : > { %p6161_p1 = pnand %p6160_p9, %p6370_p12 }
 0xb4c   : > { %p6166_p11 = por %p6165_p2, %p6164_p5 }
 0xb4d   : > { %p6162_p0 = pneg %p6161_p1 }
 0xb4e   : > { %p6168_p6 = por %p6167_p4, %p6166_p11 }
 0xb50   : > { %p6169_p8 = pnand %p6168_p6, %p6162_p0 }
 0xb52   : > { %6172 = shalt.err (!%p6169_p8)
}
 0xb53   : > { %5323 = dma.vmem_to_hbm [thread:$0]  (%p6370_p12), %s7536_s17, 16, %s7534_s20, %s4201_s18  }
 0xb54 PF: > { %s4225_s13 = sand.u32 1, %s6203_s27   ;;  %p7610_p10 = scmp.ne.s32.totalorder %s7597_s12, 0 }
 0xb55   : > { %p7611_p13 = scmp.ge.s32.totalorder %s6215_s30, 2  ;;  %s4226_s11 = scalar_lea.sflag [#allocation4], %s4225_s13 }
 0xb57   : > { %p5334_p3 = pnand %p7611_p13, %p7610_p10 }
 0xb59   : > { %6198 = dma.done.wait (!%p5334_p3), %s4226_s11, 16  }
 0xb5a   : > { %6200 = vsyncadd (!%p5334_p3), %s4226_s11, 4294967280  ;;  %s7612_s30 = sld [smem:[#allocation11_spill]]  ;;  %s7613_s27 = smov %s6207_s28 }
 0xb5b   : > { %s7614_s28 = smov %s6211_s29  ;;  %s7615_s29 = smov %s6366_s23 }
 0xb60   : > { %p22_p7 = scmp.ge.s32.totalorder %s7612_s30, 4  }
 0xb62   :  { %24 = sbr.rel (!%p22_p7) target bundleno = 6 (0x6), region = 101 }
 0xb69   :  { %4230 = vsyncpa [#allocation3], 1 }
 0xb6a   :  { %4232 = vsyncpa [#allocation3 + $0x1], 1 }
 0xb6b   :  { %4233 = vsyncpa [#allocation6], 1 }
 0xb6c   :  { %4234 = vsyncpa [#allocation4], 1 }
 0xb6d   :  { %4236 = vsyncpa [#allocation4 + $0x1], 1 }

</bundles_post_ra>
